<compile_context>
chip_gen: v6e
topology: v6e:2x2x1
jax: 0.10.0
libtpu: 0.0.40
codegen_flags: <defaults>
</compile_context>

<pallas_src>
import jax
import jax.numpy as jnp
from jax.experimental import pallas as pl
from jax.experimental.pallas import tpu as pltpu


def _ln(x, g, b, eps=1e-5):
    # Single-pass LayerNorm over the last (channel/lane) axis, biased variance,
    # matching torch.nn.LayerNorm. mean(x) and mean(x*x) can issue back-to-back.
    mu = jnp.mean(x, axis=-1, keepdims=True)
    ms = jnp.mean(x * x, axis=-1, keepdims=True)
    var = jnp.maximum(ms - mu * mu, 0.0)
    return (x - mu) * jax.lax.rsqrt(var + eps) * g + b


def _lrelu(x, slope=0.05):
    return jnp.where(x >= 0, x, slope * x)


def _lindisc_v1_kernel(x_ref, w1_ref, whc_ref, w2_ref, vec_ref, ws_ref, o_ref):
    Bblk, T, F = x_ref.shape
    D = w1_ref.shape[1]
    N = Bblk * T
    Tp = T // 8

    x = x_ref[...].reshape(N, F)            # bf16, (N, F)

    # --- unpack the packed small parameters (all f32) ---------------------
    vec = vec_ref[...]                      # (18, Wv)
    ws = ws_ref[...]                        # (88, 16)
    b1, g1, be1 = vec[0:1, :D], vec[1:2, :D], vec[2:3, :D]
    bhc = vec[3:4, :2 * D]
    gh1, bh1 = vec[4:5, :D], vec[5:6, :D]
    gh2, bh2 = vec[6:7, :D], vec[7:8, :D]
    b2, g2, be2 = vec[8:9, :64], vec[9:10, :64], vec[10:11, :64]
    b3, g3, be3 = vec[11:12, :16], vec[12:13, :16], vec[13:14, :16]
    b4, g4, be4 = vec[14:15, :8], vec[15:16, :8], vec[16:17, :8]
    b5 = vec[17:18, :1]
    W3, W4, W5 = ws[0:64, :16], ws[64:80, :8], ws[80:88, :1]

    # --- conv1 (k=1) + ln1; dp1 -> identity -------------------------------
    h = jnp.dot(x, w1_ref[...], preferred_element_type=jnp.float32) + b1
    h = _ln(h, g1, be1)                     # (N, D) f32

    # --- highwayConv: Conv1d(D -> 2D, k=3, dil=1, "same"), fused matmul ----
    # Taps masked at per-batch-element time boundaries (row % T == 0 / T-1),
    # so the flattened roll never leaks across batch elements.
    row = jax.lax.broadcasted_iota(jnp.int32, (N, 1), 0)
    rmod = row % T
    h_prev = jnp.where(rmod == 0, 0.0, pltpu.roll(h, shift=1, axis=0))
    h_next = jnp.where(rmod == T - 1, 0.0, pltpu.roll(h, shift=N - 1, axis=0))
    hin = jnp.concatenate(
        [h_prev.astype(jnp.bfloat16), h.astype(jnp.bfloat16),
         h_next.astype(jnp.bfloat16)], axis=1)                   # (N, 3D) bf16
    c = jnp.dot(hin, whc_ref[...], preferred_element_type=jnp.float32) + bhc  # (N, 2D)
    H1 = _ln(c[:, :D], gh1, bh1)
    H2 = _ln(c[:, D:], gh2, bh2)
    gate = jax.nn.sigmoid(H1)
    h = gate * H2 + (1.0 - gate) * h        # highway residual; hc dropout -> identity

    # --- pl1 (AvgPool1d k=8) commuted before conv2 (both linear) -----------
    hp = jnp.mean(h.reshape(N // 8, 8, D), axis=1)              # (Bblk*Tp, D)

    # --- conv2 (k=1) + ln2 + leaky_relu(0.05); dp2 -> identity -------------
    y = jnp.dot(hp.astype(jnp.bfloat16), w2_ref[...],
                preferred_element_type=jnp.float32) + b2        # (Bblk*Tp, 64)
    y = _lrelu(_ln(y, g2, be2))

    # --- conv3 (k=1) + ln3 --------------------------------------------------
    y = _ln(jnp.dot(y, W3, preferred_element_type=jnp.float32) + b3, g3, be3)
    # --- conv4(leaky_relu(.)) + ln4 ----------------------------------------
    y = _ln(jnp.dot(_lrelu(y), W4, preferred_element_type=jnp.float32) + b4, g4, be4)
    # --- conv5(leaky_relu(.)) with pl3 (global time-avg) commuted before the
    #     linear k=1 conv5: mean_t(z @ W5 + b5) == mean_t(z) @ W5 + b5 --------
    z = jnp.mean(_lrelu(y).reshape(Bblk, Tp, 8), axis=1)        # (Bblk, 8)
    s = jnp.dot(z, W5, preferred_element_type=jnp.float32) + b5  # (Bblk, 1)
    o_ref[...] = jax.nn.sigmoid(s).reshape(Bblk, 1, 1)


def _full_spec(shape):
    zeros = (0,) * len(shape)
    return pl.BlockSpec(shape, lambda b, z=zeros: z)


def _pick_bblk(batch, target=8):
    # Largest divisor of batch that is <= target, preferring ones that leave at
    # least 2 grid steps (so v7x's two TensorCores both get work).
    divs = [d for d in range(1, min(batch, target) + 1) if batch % d == 0]
    two_step = [d for d in divs if batch // d >= 2]
    return max(two_step) if two_step else max(divs)


def _pack_vectors(p, D):
    """Pack all (1, C) biases / LN gains / LN betas into one (18, Wv) f32 array."""
    Wv = max(2 * D, 64)

    def pad(v):
        v = v.reshape(1, -1).astype(jnp.float32)
        return jnp.pad(v, ((0, 0), (0, Wv - v.shape[1])))

    rows = [p["b1"], p["g1"], p["be1"], p["bhc"],
            p["gh1"], p["bh1"], p["gh2"], p["bh2"],
            p["b2"], p["g2"], p["be2"],
            p["b3"], p["g3"], p["be3"],
            p["b4"], p["g4"], p["be4"],
            p["b5"]]
    return jnp.concatenate([pad(r) for r in rows], axis=0)      # (18, Wv)


def _pack_small_weights(p):
    """Pack W3 (64,16), W4 (16,8), W5 (8,1) into one (88, 16) f32 array."""
    W3 = p["W3"].astype(jnp.float32)
    W4 = jnp.pad(p["W4"].astype(jnp.float32), ((0, 0), (0, 8)))
    W5 = jnp.pad(p["W5"].astype(jnp.float32), ((0, 0), (0, 15)))
    return jnp.concatenate([W3, W4, W5], axis=0)                # (88, 16)


@jax.jit
def lin_disc_v1(x, params):
    """x: (B, T, freq_bins) float32, channels-last. Returns (B, 1, 1) float32."""
    B, T, F = x.shape
    D = params["W1"].shape[1]
    assert T % 8 == 0, "T must be divisible by the AvgPool1d kernel size (8)"
    Bblk = _pick_bblk(B)

    # bf16 for the MXU-heavy operands; halves the dominant HBM traffic (x DMA).
    xb = x.astype(jnp.bfloat16)
    W1b = params["W1"].astype(jnp.bfloat16)                             # (F, D)
    Whcb = params["Whc"].reshape(3 * D, 2 * D).astype(jnp.bfloat16)     # fused k=3 taps
    W2b = params["W2"].astype(jnp.bfloat16)                             # (D, 64)
    VEC = _pack_vectors(params, D)
    WS = _pack_small_weights(params)

    args = [xb, W1b, Whcb, W2b, VEC, WS]
    in_specs = [pl.BlockSpec((Bblk, T, F), lambda i: (i, 0, 0))]
    in_specs += [_full_spec(a.shape) for a in args[1:]]

    out = pl.pallas_call(
        _lindisc_v1_kernel,
        out_shape=jax.ShapeDtypeStruct((B, 1, 1), jnp.float32),
        grid_spec=pltpu.PrefetchScalarGridSpec(
            num_scalar_prefetch=0,
            grid=(B // Bblk,),
            in_specs=in_specs,
            out_specs=pl.BlockSpec((Bblk, 1, 1), lambda i: (i, 0, 0)),
        ),
        compiler_params=pltpu.CompilerParams(
            # batch axis parallel -> shards across v7x's 2 TensorCores.
            dimension_semantics=("parallel",),
            # Working set is tiny (no pooling matrix); 32 MiB leaves ample
            # headroom even on v7x's 64 MiB VMEM.
            vmem_limit_bytes=32 * 1024 * 1024,
        ),
    )(*args)
    return out


def _ref_lindisc_v1(x, p):
    """Pure-JAX f32 reference with the original (non-commuted) op order."""
    D = p["W1"].shape[1]

    def ln(v, g, b, eps=1e-5):
        mu = v.mean(-1, keepdims=True)
        var = ((v - mu) ** 2).mean(-1, keepdims=True)
        return (v - mu) / jnp.sqrt(var + eps) * g + b

    lrelu = lambda v: jnp.where(v >= 0, v, 0.05 * v)

    h = x @ p["W1"] + p["b1"]
    h = ln(h, p["g1"], p["be1"])
    hp = jnp.pad(h, ((0, 0), (1, 1), (0, 0)))
    c = (hp[:, :-2] @ p["Whc"][0] + hp[:, 1:-1] @ p["Whc"][1]
         + hp[:, 2:] @ p["Whc"][2] + p["bhc"])
    H1 = ln(c[..., :D], p["gh1"], p["bh1"])
    H2 = ln(c[..., D:], p["gh2"], p["bh2"])
    g = jax.nn.sigmoid(H1)
    h = g * H2 + (1 - g) * h
    y = h @ p["W2"] + p["b2"]
    B, T, _ = y.shape
    y = y.reshape(B, T // 8, 8, -1).mean(axis=2)                # AvgPool1d(8)
    y = lrelu(ln(y, p["g2"], p["be2"]))
    y = ln(y @ p["W3"] + p["b3"], p["g3"], p["be3"])
    y = ln(lrelu(y) @ p["W4"] + p["b4"], p["g4"], p["be4"])
    y = lrelu(y) @ p["W5"] + p["b5"]                            # (B, Tp, 1)
    return jax.nn.sigmoid(y.mean(axis=1, keepdims=True))        # (B, 1, 1)


def init_params(key, freq_bins, disc_dim):
    D = disc_dim
    ks = jax.random.split(key, 12)

    def w(k, shape, scale=0.1):
        return scale * jax.random.normal(k, shape, jnp.float32)

    return {
        # conv1: Conv1d(freq_bins -> D, k=1); stored as (Cin, Cout)
        "W1": w(ks[0], (freq_bins, D)), "b1": w(ks[1], (1, D)),
        "g1": jnp.ones((1, D), jnp.float32), "be1": jnp.zeros((1, D), jnp.float32),
        # highwayConv: Conv1d(D -> 2D, k=3); stored as (3 taps, Cin, 2D)
        "Whc": w(ks[2], (3, D, 2 * D)), "bhc": w(ks[3], (1, 2 * D)),
        "gh1": jnp.ones((1, D), jnp.float32), "bh1": jnp.zeros((1, D), jnp.float32),
        "gh2": jnp.ones((1, D), jnp.float32), "bh2": jnp.zeros((1, D), jnp.float32),
        # conv2: D -> 64
        "W2": w(ks[4], (D, 64)), "b2": w(ks[5], (1, 64)),
        "g2": jnp.ones((1, 64), jnp.float32), "be2": jnp.zeros((1, 64), jnp.float32),
        # conv3: 64 -> 16
        "W3": w(ks[6], (64, 16)), "b3": w(ks[7], (1, 16)),
        "g3": jnp.ones((1, 16), jnp.float32), "be3": jnp.zeros((1, 16), jnp.float32),
        # conv4: 16 -> 8
        "W4": w(ks[8], (16, 8)), "b4": w(ks[9], (1, 8)),
        "g4": jnp.ones((1, 8), jnp.float32), "be4": jnp.zeros((1, 8), jnp.float32),
        # conv5: 8 -> 1
        "W5": w(ks[10], (8, 1)), "b5": w(ks[11], (1, 1)),
    }


if __name__ == "__main__":
    B, T, FREQ_BINS, DISC_DIM = 8, 64, 32, 32
    key = jax.random.PRNGKey(0)
    kx, kp = jax.random.split(key)

    # layout: (B, T, freq_bins) channels-last (PyTorch input would be (B, freq_bins, T))
    x = jax.random.normal(kx, (B, T, FREQ_BINS), jnp.float32)
    params = init_params(kp, FREQ_BINS, DISC_DIM)

    out = lin_disc_v1(x, params)
    out = jax.block_until_ready(out)

    assert out.shape == (B, 1, 1)
    assert bool(jnp.all(jnp.isfinite(out)))
    assert bool(jnp.all((out > 0.0) & (out < 1.0)))   # sigmoid output range

    ref = _ref_lindisc_v1(x, params)
    err = float(jnp.max(jnp.abs(out - ref)))
    assert err < 5e-2, f"kernel vs f32 reference mismatch: {err}"

    print("KERNEL_OK")
</pallas_src>

<mosaic_0001>
module attributes {stable_mosaic.version = 11 : i64} {
  func.func @_lindisc_v1_kernel(%arg0: i32, %arg1: memref<4x64x32xbf16, #tpu.memory_space<vmem>>, %arg2: memref<32x32xbf16, #tpu.memory_space<vmem>>, %arg3: memref<96x64xbf16, #tpu.memory_space<vmem>>, %arg4: memref<32x64xbf16, #tpu.memory_space<vmem>>, %arg5: memref<18x64xf32, #tpu.memory_space<vmem>>, %arg6: memref<88x16xf32, #tpu.memory_space<vmem>>, %arg7: memref<4x1x1xf32, #tpu.memory_space<vmem>>) attributes {dimension_semantics = [#tpu.dimension_semantics<parallel>], iteration_bounds = array<i64: 2>, scalar_prefetch = 0 : i64, scratch_operands = 0 : i64, tpu.core_type = #tpu.core_type<tc>, window_params = [{transform_indices = @transform_0, window_bounds = array<i64: 4, 64, 32>}, {pipeline_mode = #tpu.pipeline_mode<synchronous>, transform_indices = @transform_1, window_bounds = array<i64: 32, 32>}, {pipeline_mode = #tpu.pipeline_mode<synchronous>, transform_indices = @transform_2, window_bounds = array<i64: 96, 64>}, {pipeline_mode = #tpu.pipeline_mode<synchronous>, transform_indices = @transform_3, window_bounds = array<i64: 32, 64>}, {pipeline_mode = #tpu.pipeline_mode<synchronous>, transform_indices = @transform_4, window_bounds = array<i64: 18, 64>}, {pipeline_mode = #tpu.pipeline_mode<synchronous>, transform_indices = @transform_5, window_bounds = array<i64: 88, 16>}, {transform_indices = @transform_6, window_bounds = array<i64: 4, 1, 1>}]} {
    %c0 = arith.constant 0 : index
    %c0_0 = arith.constant 0 : index
    %c0_1 = arith.constant 0 : index
    %0 = vector.load %arg1[%c0, %c0_0, %c0_1] : memref<4x64x32xbf16, #tpu.memory_space<vmem>>, vector<4x64x32xbf16>
    %1 = vector.shape_cast %0 : vector<4x64x32xbf16> to vector<256x32xbf16>
    %c0_2 = arith.constant 0 : index
    %c0_3 = arith.constant 0 : index
    %2 = vector.load %arg5[%c0_2, %c0_3] : memref<18x64xf32, #tpu.memory_space<vmem>>, vector<18x64xf32>
    %c0_4 = arith.constant 0 : index
    %c0_5 = arith.constant 0 : index
    %3 = vector.load %arg6[%c0_4, %c0_5] : memref<88x16xf32, #tpu.memory_space<vmem>>, vector<88x16xf32>
    %4 = vector.extract_strided_slice %2 {offsets = [0, 0], sizes = [1, 32], strides = [1, 1]} : vector<18x64xf32> to vector<1x32xf32>
    %5 = vector.extract_strided_slice %2 {offsets = [1, 0], sizes = [1, 32], strides = [1, 1]} : vector<18x64xf32> to vector<1x32xf32>
    %6 = vector.extract_strided_slice %2 {offsets = [2, 0], sizes = [1, 32], strides = [1, 1]} : vector<18x64xf32> to vector<1x32xf32>
    %7 = vector.extract_strided_slice %2 {offsets = [3, 0], sizes = [1, 64], strides = [1, 1]} : vector<18x64xf32> to vector<1x64xf32>
    %8 = vector.extract_strided_slice %2 {offsets = [4, 0], sizes = [1, 32], strides = [1, 1]} : vector<18x64xf32> to vector<1x32xf32>
    %9 = vector.extract_strided_slice %2 {offsets = [5, 0], sizes = [1, 32], strides = [1, 1]} : vector<18x64xf32> to vector<1x32xf32>
    %10 = vector.extract_strided_slice %2 {offsets = [6, 0], sizes = [1, 32], strides = [1, 1]} : vector<18x64xf32> to vector<1x32xf32>
    %11 = vector.extract_strided_slice %2 {offsets = [7, 0], sizes = [1, 32], strides = [1, 1]} : vector<18x64xf32> to vector<1x32xf32>
    %12 = vector.extract_strided_slice %2 {offsets = [8, 0], sizes = [1, 64], strides = [1, 1]} : vector<18x64xf32> to vector<1x64xf32>
    %13 = vector.extract_strided_slice %2 {offsets = [9, 0], sizes = [1, 64], strides = [1, 1]} : vector<18x64xf32> to vector<1x64xf32>
    %14 = vector.extract_strided_slice %2 {offsets = [10, 0], sizes = [1, 64], strides = [1, 1]} : vector<18x64xf32> to vector<1x64xf32>
    %15 = vector.extract_strided_slice %2 {offsets = [11, 0], sizes = [1, 16], strides = [1, 1]} : vector<18x64xf32> to vector<1x16xf32>
    %16 = vector.extract_strided_slice %2 {offsets = [12, 0], sizes = [1, 16], strides = [1, 1]} : vector<18x64xf32> to vector<1x16xf32>
    %17 = vector.extract_strided_slice %2 {offsets = [13, 0], sizes = [1, 16], strides = [1, 1]} : vector<18x64xf32> to vector<1x16xf32>
    %18 = vector.extract_strided_slice %2 {offsets = [14, 0], sizes = [1, 8], strides = [1, 1]} : vector<18x64xf32> to vector<1x8xf32>
    %19 = vector.extract_strided_slice %2 {offsets = [15, 0], sizes = [1, 8], strides = [1, 1]} : vector<18x64xf32> to vector<1x8xf32>
    %20 = vector.extract_strided_slice %2 {offsets = [16, 0], sizes = [1, 8], strides = [1, 1]} : vector<18x64xf32> to vector<1x8xf32>
    %21 = vector.extract_strided_slice %2 {offsets = [17, 0], sizes = [1, 1], strides = [1, 1]} : vector<18x64xf32> to vector<1x1xf32>
    %22 = vector.extract_strided_slice %3 {offsets = [0, 0], sizes = [64, 16], strides = [1, 1]} : vector<88x16xf32> to vector<64x16xf32>
    %23 = vector.extract_strided_slice %3 {offsets = [64, 0], sizes = [16, 8], strides = [1, 1]} : vector<88x16xf32> to vector<16x8xf32>
    %24 = vector.extract_strided_slice %3 {offsets = [80, 0], sizes = [8, 1], strides = [1, 1]} : vector<88x16xf32> to vector<8x1xf32>
    %c0_6 = arith.constant 0 : index
    %c0_7 = arith.constant 0 : index
    %25 = vector.load %arg2[%c0_6, %c0_7] : memref<32x32xbf16, #tpu.memory_space<vmem>>, vector<32x32xbf16>
    %cst = arith.constant dense<0.000000e+00> : vector<256x32xf32>
    %26 = tpu.matmul %1, %25, %cst {dimension_numbers = #tpu.dot_dimension_numbers<[1], [0], [0], [1], [0, 0, 1, 1], [], []>} : vector<256x32xbf16>, vector<32x32xbf16>, vector<256x32xf32> -> vector<256x32xf32>
    %27 = vector.broadcast %4 : vector<1x32xf32> to vector<256x32xf32>
    %28 = arith.addf %26, %27 : vector<256x32xf32>
    %cst_8 = arith.constant dense<0.000000e+00> : vector<256xf32>
    %29 = vector.multi_reduction <add>, %28, %cst_8 [1] : vector<256x32xf32> to vector<256xf32>
    %30 = vector.shape_cast %29 : vector<256xf32> to vector<256x1xf32>
    %cst_9 = arith.constant 3.200000e+01 : f32
    %31 = vector.broadcast %cst_9 : f32 to vector<256x1xf32>
    %32 = arith.divf %30, %31 : vector<256x1xf32>
    %33 = arith.mulf %28, %28 : vector<256x32xf32>
    %cst_10 = arith.constant dense<0.000000e+00> : vector<256xf32>
    %34 = vector.multi_reduction <add>, %33, %cst_10 [1] : vector<256x32xf32> to vector<256xf32>
    %35 = vector.shape_cast %34 : vector<256xf32> to vector<256x1xf32>
    %cst_11 = arith.constant 3.200000e+01 : f32
    %36 = vector.broadcast %cst_11 : f32 to vector<256x1xf32>
    %37 = arith.divf %35, %36 : vector<256x1xf32>
    %38 = arith.mulf %32, %32 : vector<256x1xf32>
    %39 = arith.subf %37, %38 : vector<256x1xf32>
    %cst_12 = arith.constant 0.000000e+00 : f32
    %40 = vector.broadcast %cst_12 : f32 to vector<256x1xf32>
    %41 = arith.maximumf %39, %40 : vector<256x1xf32>
    %42 = vector.broadcast %32 : vector<256x1xf32> to vector<256x32xf32>
    %43 = arith.subf %28, %42 : vector<256x32xf32>
    %cst_13 = arith.constant 9.99999974E-6 : f32
    %44 = vector.broadcast %cst_13 : f32 to vector<256x1xf32>
    %45 = arith.addf %41, %44 : vector<256x1xf32>
    %46 = math.rsqrt %45 : vector<256x1xf32>
    %47 = vector.broadcast %46 : vector<256x1xf32> to vector<256x32xf32>
    %48 = arith.mulf %43, %47 : vector<256x32xf32>
    %49 = vector.broadcast %5 : vector<1x32xf32> to vector<256x32xf32>
    %50 = arith.mulf %48, %49 : vector<256x32xf32>
    %51 = vector.broadcast %6 : vector<1x32xf32> to vector<256x32xf32>
    %52 = arith.addf %50, %51 : vector<256x32xf32>
    %53 = tpu.iota {dimensions = array<i32: 0>} : vector<256x1xi32>
    %c64_i32 = arith.constant 64 : i32
    %c0_i32 = arith.constant 0 : i32
    %54 = arith.cmpi eq, %c64_i32, %c0_i32 : i32
    %c1_i32 = arith.constant 1 : i32
    %55 = arith.select %54, %c1_i32, %c64_i32 : i32
    %56 = vector.broadcast %55 : i32 to vector<256x1xi32>
    %57 = arith.remsi %53, %56 : vector<256x1xi32>
    %c0_i32_14 = arith.constant 0 : i32
    %58 = vector.broadcast %c0_i32_14 : i32 to vector<256x1xi32>
    %59 = arith.cmpi ne, %57, %58 : vector<256x1xi32>
    %c0_i32_15 = arith.constant 0 : i32
    %60 = vector.broadcast %c0_i32_15 : i32 to vector<256x1xi32>
    %61 = arith.cmpi slt, %57, %60 : vector<256x1xi32>
    %c0_i32_16 = arith.constant 0 : i32
    %62 = arith.cmpi slt, %55, %c0_i32_16 : i32
    %63 = vector.broadcast %62 : i1 to vector<256x1xi1>
    %64 = vector.broadcast %63 : vector<256x1xi1> to vector<256x1xi1>
    %65 = arith.xori %61, %64 : vector<256x1xi1>
    %66 = arith.andi %65, %59 : vector<256x1xi1>
    %67 = vector.broadcast %55 : i32 to vector<256x1xi32>
    %68 = arith.addi %57, %67 : vector<256x1xi32>
    %69 = arith.select %66, %68, %57 : vector<256x1xi1>, vector<256x1xi32>
    %c0_i32_17 = arith.constant 0 : i32
    %70 = vector.broadcast %c0_i32_17 : i32 to vector<256x1xi32>
    %71 = arith.cmpi eq, %69, %70 : vector<256x1xi32>
    %c1_i32_18 = arith.constant 1 : i32
    %72 = tpu.dynamic_rotate %52 by %c1_i32_18 dim 0 : vector<256x32xf32>, i32 -> vector<256x32xf32>
    %cst_19 = arith.constant 0.000000e+00 : f32
    %73 = vector.shape_cast %71 : vector<256x1xi1> to vector<256x1xi1>
    %74 = vector.broadcast %73 : vector<256x1xi1> to vector<256x32xi1>
    %75 = vector.broadcast %cst_19 : f32 to vector<256x32xf32>
    %76 = arith.select %74, %75, %72 : vector<256x32xi1>, vector<256x32xf32>
    %c63_i32 = arith.constant 63 : i32
    %77 = vector.broadcast %c63_i32 : i32 to vector<256x1xi32>
    %78 = arith.cmpi eq, %69, %77 : vector<256x1xi32>
    %c255_i32 = arith.constant 255 : i32
    %79 = tpu.dynamic_rotate %52 by %c255_i32 dim 0 : vector<256x32xf32>, i32 -> vector<256x32xf32>
    %cst_20 = arith.constant 0.000000e+00 : f32
    %80 = vector.shape_cast %78 : vector<256x1xi1> to vector<256x1xi1>
    %81 = vector.broadcast %80 : vector<256x1xi1> to vector<256x32xi1>
    %82 = vector.broadcast %cst_20 : f32 to vector<256x32xf32>
    %83 = arith.select %81, %82, %79 : vector<256x32xi1>, vector<256x32xf32>
    %84 = arith.truncf %76 : vector<256x32xf32> to vector<256x32xbf16>
    %85 = arith.truncf %52 : vector<256x32xf32> to vector<256x32xbf16>
    %86 = arith.truncf %83 : vector<256x32xf32> to vector<256x32xbf16>
    %87 = tpu.concatenate %84, %85, %86 in 1 : vector<256x32xbf16>, vector<256x32xbf16>, vector<256x32xbf16> -> vector<256x96xbf16>
    %c0_21 = arith.constant 0 : index
    %c0_22 = arith.constant 0 : index
    %88 = vector.load %arg3[%c0_21, %c0_22] : memref<96x64xbf16, #tpu.memory_space<vmem>>, vector<96x64xbf16>
    %cst_23 = arith.constant dense<0.000000e+00> : vector<256x64xf32>
    %89 = tpu.matmul %87, %88, %cst_23 {dimension_numbers = #tpu.dot_dimension_numbers<[1], [0], [0], [1], [0, 0, 1, 1], [], []>} : vector<256x96xbf16>, vector<96x64xbf16>, vector<256x64xf32> -> vector<256x64xf32>
    %90 = vector.broadcast %7 : vector<1x64xf32> to vector<256x64xf32>
    %91 = arith.addf %89, %90 : vector<256x64xf32>
    %92 = vector.extract_strided_slice %91 {offsets = [0, 0], sizes = [256, 32], strides = [1, 1]} : vector<256x64xf32> to vector<256x32xf32>
    %cst_24 = arith.constant dense<0.000000e+00> : vector<256xf32>
    %93 = vector.multi_reduction <add>, %92, %cst_24 [1] : vector<256x32xf32> to vector<256xf32>
    %94 = vector.shape_cast %93 : vector<256xf32> to vector<256x1xf32>
    %cst_25 = arith.constant 3.200000e+01 : f32
    %95 = vector.broadcast %cst_25 : f32 to vector<256x1xf32>
    %96 = arith.divf %94, %95 : vector<256x1xf32>
    %97 = arith.mulf %92, %92 : vector<256x32xf32>
    %cst_26 = arith.constant dense<0.000000e+00> : vector<256xf32>
    %98 = vector.multi_reduction <add>, %97, %cst_26 [1] : vector<256x32xf32> to vector<256xf32>
    %99 = vector.shape_cast %98 : vector<256xf32> to vector<256x1xf32>
    %cst_27 = arith.constant 3.200000e+01 : f32
    %100 = vector.broadcast %cst_27 : f32 to vector<256x1xf32>
    %101 = arith.divf %99, %100 : vector<256x1xf32>
    %102 = arith.mulf %96, %96 : vector<256x1xf32>
    %103 = arith.subf %101, %102 : vector<256x1xf32>
    %cst_28 = arith.constant 0.000000e+00 : f32
    %104 = vector.broadcast %cst_28 : f32 to vector<256x1xf32>
    %105 = arith.maximumf %103, %104 : vector<256x1xf32>
    %106 = vector.broadcast %96 : vector<256x1xf32> to vector<256x32xf32>
    %107 = arith.subf %92, %106 : vector<256x32xf32>
    %cst_29 = arith.constant 9.99999974E-6 : f32
    %108 = vector.broadcast %cst_29 : f32 to vector<256x1xf32>
    %109 = arith.addf %105, %108 : vector<256x1xf32>
    %110 = math.rsqrt %109 : vector<256x1xf32>
    %111 = vector.broadcast %110 : vector<256x1xf32> to vector<256x32xf32>
    %112 = arith.mulf %107, %111 : vector<256x32xf32>
    %113 = vector.broadcast %8 : vector<1x32xf32> to vector<256x32xf32>
    %114 = arith.mulf %112, %113 : vector<256x32xf32>
    %115 = vector.broadcast %9 : vector<1x32xf32> to vector<256x32xf32>
    %116 = arith.addf %114, %115 : vector<256x32xf32>
    %117 = vector.extract_strided_slice %91 {offsets = [0, 32], sizes = [256, 32], strides = [1, 1]} : vector<256x64xf32> to vector<256x32xf32>
    %cst_30 = arith.constant dense<0.000000e+00> : vector<256xf32>
    %118 = vector.multi_reduction <add>, %117, %cst_30 [1] : vector<256x32xf32> to vector<256xf32>
    %119 = vector.shape_cast %118 : vector<256xf32> to vector<256x1xf32>
    %cst_31 = arith.constant 3.200000e+01 : f32
    %120 = vector.broadcast %cst_31 : f32 to vector<256x1xf32>
    %121 = arith.divf %119, %120 : vector<256x1xf32>
    %122 = arith.mulf %117, %117 : vector<256x32xf32>
    %cst_32 = arith.constant dense<0.000000e+00> : vector<256xf32>
    %123 = vector.multi_reduction <add>, %122, %cst_32 [1] : vector<256x32xf32> to vector<256xf32>
    %124 = vector.shape_cast %123 : vector<256xf32> to vector<256x1xf32>
    %cst_33 = arith.constant 3.200000e+01 : f32
    %125 = vector.broadcast %cst_33 : f32 to vector<256x1xf32>
    %126 = arith.divf %124, %125 : vector<256x1xf32>
    %127 = arith.mulf %121, %121 : vector<256x1xf32>
    %128 = arith.subf %126, %127 : vector<256x1xf32>
    %cst_34 = arith.constant 0.000000e+00 : f32
    %129 = vector.broadcast %cst_34 : f32 to vector<256x1xf32>
    %130 = arith.maximumf %128, %129 : vector<256x1xf32>
    %131 = vector.broadcast %121 : vector<256x1xf32> to vector<256x32xf32>
    %132 = arith.subf %117, %131 : vector<256x32xf32>
    %cst_35 = arith.constant 9.99999974E-6 : f32
    %133 = vector.broadcast %cst_35 : f32 to vector<256x1xf32>
    %134 = arith.addf %130, %133 : vector<256x1xf32>
    %135 = math.rsqrt %134 : vector<256x1xf32>
    %136 = vector.broadcast %135 : vector<256x1xf32> to vector<256x32xf32>
    %137 = arith.mulf %132, %136 : vector<256x32xf32>
    %138 = vector.broadcast %10 : vector<1x32xf32> to vector<256x32xf32>
    %139 = arith.mulf %137, %138 : vector<256x32xf32>
    %140 = vector.broadcast %11 : vector<1x32xf32> to vector<256x32xf32>
    %141 = arith.addf %139, %140 : vector<256x32xf32>
    %142 = arith.negf %116 : vector<256x32xf32>
    %143 = math.exp %142 : vector<256x32xf32>
    %cst_36 = arith.constant 1.000000e+00 : f32
    %144 = vector.broadcast %cst_36 : f32 to vector<256x32xf32>
    %145 = arith.addf %144, %143 : vector<256x32xf32>
    %146 = arith.divf %144, %145 : vector<256x32xf32>
    %147 = arith.mulf %146, %141 : vector<256x32xf32>
    %cst_37 = arith.constant 1.000000e+00 : f32
    %148 = vector.broadcast %cst_37 : f32 to vector<256x32xf32>
    %149 = arith.subf %148, %146 : vector<256x32xf32>
    %150 = arith.mulf %149, %52 : vector<256x32xf32>
    %151 = arith.addf %147, %150 : vector<256x32xf32>
    %152 = vector.shape_cast %151 : vector<256x32xf32> to vector<32x8x32xf32>
    %cst_38 = arith.constant dense<0.000000e+00> : vector<32x32xf32>
    %153 = vector.multi_reduction <add>, %152, %cst_38 [1] : vector<32x8x32xf32> to vector<32x32xf32>
    %cst_39 = arith.constant 8.000000e+00 : f32
    %154 = vector.broadcast %cst_39 : f32 to vector<32x32xf32>
    %155 = arith.divf %153, %154 : vector<32x32xf32>
    %156 = arith.truncf %155 : vector<32x32xf32> to vector<32x32xbf16>
    %c0_40 = arith.constant 0 : index
    %c0_41 = arith.constant 0 : index
    %157 = vector.load %arg4[%c0_40, %c0_41] : memref<32x64xbf16, #tpu.memory_space<vmem>>, vector<32x64xbf16>
    %cst_42 = arith.constant dense<0.000000e+00> : vector<32x64xf32>
    %158 = tpu.matmul %156, %157, %cst_42 {dimension_numbers = #tpu.dot_dimension_numbers<[1], [0], [0], [1], [0, 0, 1, 1], [], []>} : vector<32x32xbf16>, vector<32x64xbf16>, vector<32x64xf32> -> vector<32x64xf32>
    %159 = vector.broadcast %12 : vector<1x64xf32> to vector<32x64xf32>
    %160 = arith.addf %158, %159 : vector<32x64xf32>
    %cst_43 = arith.constant dense<0.000000e+00> : vector<32xf32>
    %161 = vector.multi_reduction <add>, %160, %cst_43 [1] : vector<32x64xf32> to vector<32xf32>
    %162 = vector.shape_cast %161 : vector<32xf32> to vector<32x1xf32>
    %cst_44 = arith.constant 6.400000e+01 : f32
    %163 = vector.broadcast %cst_44 : f32 to vector<32x1xf32>
    %164 = arith.divf %162, %163 : vector<32x1xf32>
    %165 = arith.mulf %160, %160 : vector<32x64xf32>
    %cst_45 = arith.constant dense<0.000000e+00> : vector<32xf32>
    %166 = vector.multi_reduction <add>, %165, %cst_45 [1] : vector<32x64xf32> to vector<32xf32>
    %167 = vector.shape_cast %166 : vector<32xf32> to vector<32x1xf32>
    %cst_46 = arith.constant 6.400000e+01 : f32
    %168 = vector.broadcast %cst_46 : f32 to vector<32x1xf32>
    %169 = arith.divf %167, %168 : vector<32x1xf32>
    %170 = arith.mulf %164, %164 : vector<32x1xf32>
    %171 = arith.subf %169, %170 : vector<32x1xf32>
    %cst_47 = arith.constant 0.000000e+00 : f32
    %172 = vector.broadcast %cst_47 : f32 to vector<32x1xf32>
    %173 = arith.maximumf %171, %172 : vector<32x1xf32>
    %174 = vector.broadcast %164 : vector<32x1xf32> to vector<32x64xf32>
    %175 = arith.subf %160, %174 : vector<32x64xf32>
    %cst_48 = arith.constant 9.99999974E-6 : f32
    %176 = vector.broadcast %cst_48 : f32 to vector<32x1xf32>
    %177 = arith.addf %173, %176 : vector<32x1xf32>
    %178 = math.rsqrt %177 : vector<32x1xf32>
    %179 = vector.broadcast %178 : vector<32x1xf32> to vector<32x64xf32>
    %180 = arith.mulf %175, %179 : vector<32x64xf32>
    %181 = vector.broadcast %13 : vector<1x64xf32> to vector<32x64xf32>
    %182 = arith.mulf %180, %181 : vector<32x64xf32>
    %183 = vector.broadcast %14 : vector<1x64xf32> to vector<32x64xf32>
    %184 = arith.addf %182, %183 : vector<32x64xf32>
    %cst_49 = arith.constant 0.000000e+00 : f32
    %185 = vector.broadcast %cst_49 : f32 to vector<32x64xf32>
    %186 = arith.cmpf oge, %184, %185 : vector<32x64xf32>
    %cst_50 = arith.constant 5.000000e-02 : f32
    %187 = vector.broadcast %cst_50 : f32 to vector<32x64xf32>
    %188 = arith.mulf %187, %184 : vector<32x64xf32>
    %189 = arith.select %186, %184, %188 : vector<32x64xi1>, vector<32x64xf32>
    %cst_51 = arith.constant dense<0.000000e+00> : vector<32x16xf32>
    %190 = tpu.matmul %189, %22, %cst_51 {dimension_numbers = #tpu.dot_dimension_numbers<[1], [0], [0], [1], [0, 0, 1, 1], [], []>} : vector<32x64xf32>, vector<64x16xf32>, vector<32x16xf32> -> vector<32x16xf32>
    %191 = vector.broadcast %15 : vector<1x16xf32> to vector<32x16xf32>
    %192 = arith.addf %190, %191 : vector<32x16xf32>
    %cst_52 = arith.constant dense<0.000000e+00> : vector<32xf32>
    %193 = vector.multi_reduction <add>, %192, %cst_52 [1] : vector<32x16xf32> to vector<32xf32>
    %194 = vector.shape_cast %193 : vector<32xf32> to vector<32x1xf32>
    %cst_53 = arith.constant 1.600000e+01 : f32
    %195 = vector.broadcast %cst_53 : f32 to vector<32x1xf32>
    %196 = arith.divf %194, %195 : vector<32x1xf32>
    %197 = arith.mulf %192, %192 : vector<32x16xf32>
    %cst_54 = arith.constant dense<0.000000e+00> : vector<32xf32>
    %198 = vector.multi_reduction <add>, %197, %cst_54 [1] : vector<32x16xf32> to vector<32xf32>
    %199 = vector.shape_cast %198 : vector<32xf32> to vector<32x1xf32>
    %cst_55 = arith.constant 1.600000e+01 : f32
    %200 = vector.broadcast %cst_55 : f32 to vector<32x1xf32>
    %201 = arith.divf %199, %200 : vector<32x1xf32>
    %202 = arith.mulf %196, %196 : vector<32x1xf32>
    %203 = arith.subf %201, %202 : vector<32x1xf32>
    %cst_56 = arith.constant 0.000000e+00 : f32
    %204 = vector.broadcast %cst_56 : f32 to vector<32x1xf32>
    %205 = arith.maximumf %203, %204 : vector<32x1xf32>
    %206 = vector.broadcast %196 : vector<32x1xf32> to vector<32x16xf32>
    %207 = arith.subf %192, %206 : vector<32x16xf32>
    %cst_57 = arith.constant 9.99999974E-6 : f32
    %208 = vector.broadcast %cst_57 : f32 to vector<32x1xf32>
    %209 = arith.addf %205, %208 : vector<32x1xf32>
    %210 = math.rsqrt %209 : vector<32x1xf32>
    %211 = vector.broadcast %210 : vector<32x1xf32> to vector<32x16xf32>
    %212 = arith.mulf %207, %211 : vector<32x16xf32>
    %213 = vector.broadcast %16 : vector<1x16xf32> to vector<32x16xf32>
    %214 = arith.mulf %212, %213 : vector<32x16xf32>
    %215 = vector.broadcast %17 : vector<1x16xf32> to vector<32x16xf32>
    %216 = arith.addf %214, %215 : vector<32x16xf32>
    %cst_58 = arith.constant 0.000000e+00 : f32
    %217 = vector.broadcast %cst_58 : f32 to vector<32x16xf32>
    %218 = arith.cmpf oge, %216, %217 : vector<32x16xf32>
    %cst_59 = arith.constant 5.000000e-02 : f32
    %219 = vector.broadcast %cst_59 : f32 to vector<32x16xf32>
    %220 = arith.mulf %219, %216 : vector<32x16xf32>
    %221 = arith.select %218, %216, %220 : vector<32x16xi1>, vector<32x16xf32>
    %cst_60 = arith.constant dense<0.000000e+00> : vector<32x8xf32>
    %222 = tpu.matmul %221, %23, %cst_60 {dimension_numbers = #tpu.dot_dimension_numbers<[1], [0], [0], [1], [0, 0, 1, 1], [], []>} : vector<32x16xf32>, vector<16x8xf32>, vector<32x8xf32> -> vector<32x8xf32>
    %223 = vector.broadcast %18 : vector<1x8xf32> to vector<32x8xf32>
    %224 = arith.addf %222, %223 : vector<32x8xf32>
    %cst_61 = arith.constant dense<0.000000e+00> : vector<32xf32>
    %225 = vector.multi_reduction <add>, %224, %cst_61 [1] : vector<32x8xf32> to vector<32xf32>
    %226 = vector.shape_cast %225 : vector<32xf32> to vector<32x1xf32>
    %cst_62 = arith.constant 8.000000e+00 : f32
    %227 = vector.broadcast %cst_62 : f32 to vector<32x1xf32>
    %228 = arith.divf %226, %227 : vector<32x1xf32>
    %229 = arith.mulf %224, %224 : vector<32x8xf32>
    %cst_63 = arith.constant dense<0.000000e+00> : vector<32xf32>
    %230 = vector.multi_reduction <add>, %229, %cst_63 [1] : vector<32x8xf32> to vector<32xf32>
    %231 = vector.shape_cast %230 : vector<32xf32> to vector<32x1xf32>
    %cst_64 = arith.constant 8.000000e+00 : f32
    %232 = vector.broadcast %cst_64 : f32 to vector<32x1xf32>
    %233 = arith.divf %231, %232 : vector<32x1xf32>
    %234 = arith.mulf %228, %228 : vector<32x1xf32>
    %235 = arith.subf %233, %234 : vector<32x1xf32>
    %cst_65 = arith.constant 0.000000e+00 : f32
    %236 = vector.broadcast %cst_65 : f32 to vector<32x1xf32>
    %237 = arith.maximumf %235, %236 : vector<32x1xf32>
    %238 = vector.broadcast %228 : vector<32x1xf32> to vector<32x8xf32>
    %239 = arith.subf %224, %238 : vector<32x8xf32>
    %cst_66 = arith.constant 9.99999974E-6 : f32
    %240 = vector.broadcast %cst_66 : f32 to vector<32x1xf32>
    %241 = arith.addf %237, %240 : vector<32x1xf32>
    %242 = math.rsqrt %241 : vector<32x1xf32>
    %243 = vector.broadcast %242 : vector<32x1xf32> to vector<32x8xf32>
    %244 = arith.mulf %239, %243 : vector<32x8xf32>
    %245 = vector.broadcast %19 : vector<1x8xf32> to vector<32x8xf32>
    %246 = arith.mulf %244, %245 : vector<32x8xf32>
    %247 = vector.broadcast %20 : vector<1x8xf32> to vector<32x8xf32>
    %248 = arith.addf %246, %247 : vector<32x8xf32>
    %cst_67 = arith.constant 0.000000e+00 : f32
    %249 = vector.broadcast %cst_67 : f32 to vector<32x8xf32>
    %250 = arith.cmpf oge, %248, %249 : vector<32x8xf32>
    %cst_68 = arith.constant 5.000000e-02 : f32
    %251 = vector.broadcast %cst_68 : f32 to vector<32x8xf32>
    %252 = arith.mulf %251, %248 : vector<32x8xf32>
    %253 = arith.select %250, %248, %252 : vector<32x8xi1>, vector<32x8xf32>
    %254 = vector.shape_cast %253 : vector<32x8xf32> to vector<4x8x8xf32>
    %cst_69 = arith.constant dense<0.000000e+00> : vector<4x8xf32>
    %255 = vector.multi_reduction <add>, %254, %cst_69 [1] : vector<4x8x8xf32> to vector<4x8xf32>
    %cst_70 = arith.constant 8.000000e+00 : f32
    %256 = vector.broadcast %cst_70 : f32 to vector<4x8xf32>
    %257 = arith.divf %255, %256 : vector<4x8xf32>
    %cst_71 = arith.constant dense<0.000000e+00> : vector<4x1xf32>
    %258 = tpu.matmul %257, %24, %cst_71 {dimension_numbers = #tpu.dot_dimension_numbers<[1], [0], [0], [1], [0, 0, 1, 1], [], []>} : vector<4x8xf32>, vector<8x1xf32>, vector<4x1xf32> -> vector<4x1xf32>
    %259 = vector.broadcast %21 : vector<1x1xf32> to vector<4x1xf32>
    %260 = arith.addf %258, %259 : vector<4x1xf32>
    %261 = arith.negf %260 : vector<4x1xf32>
    %262 = math.exp %261 : vector<4x1xf32>
    %cst_72 = arith.constant 1.000000e+00 : f32
    %263 = vector.broadcast %cst_72 : f32 to vector<4x1xf32>
    %264 = arith.addf %263, %262 : vector<4x1xf32>
    %265 = arith.divf %263, %264 : vector<4x1xf32>
    %266 = vector.shape_cast %265 : vector<4x1xf32> to vector<4x1x1xf32>
    %c0_73 = arith.constant 0 : index
    %c0_74 = arith.constant 0 : index
    %c0_75 = arith.constant 0 : index
    %267 = vector.load %arg7[%c0_73, %c0_74, %c0_75] : memref<4x1x1xf32, #tpu.memory_space<vmem>>, vector<4x1x1xf32>
    tpu.vector_store %arg7[%c0_73, %c0_74, %c0_75], %266 {strides = array<i32>} : memref<4x1x1xf32, #tpu.memory_space<vmem>>, vector<4x1x1xf32>,
    return
  }
  func.func @transform_0(%arg0: i32) -> (i32, i32, i32) {
    %c0_i32 = arith.constant 0 : i32
    %c0_i32_0 = arith.constant 0 : i32
    %c0_i32_1 = arith.constant 0 : i32
    return %arg0, %c0_i32, %c0_i32_0 : i32, i32, i32
  }
  func.func @transform_1(%arg0: i32) -> (i32, i32) {
    %c0_i32 = arith.constant 0 : i32
    %c0_i32_0 = arith.constant 0 : i32
    %c0_i32_1 = arith.constant 0 : i32
    return %c0_i32, %c0_i32_0 : i32, i32
  }
  func.func @transform_2(%arg0: i32) -> (i32, i32) {
    %c0_i32 = arith.constant 0 : i32
    %c0_i32_0 = arith.constant 0 : i32
    %c0_i32_1 = arith.constant 0 : i32
    return %c0_i32, %c0_i32_0 : i32, i32
  }
  func.func @transform_3(%arg0: i32) -> (i32, i32) {
    %c0_i32 = arith.constant 0 : i32
    %c0_i32_0 = arith.constant 0 : i32
    %c0_i32_1 = arith.constant 0 : i32
    return %c0_i32, %c0_i32_0 : i32, i32
  }
  func.func @transform_4(%arg0: i32) -> (i32, i32) {
    %c0_i32 = arith.constant 0 : i32
    %c0_i32_0 = arith.constant 0 : i32
    %c0_i32_1 = arith.constant 0 : i32
    return %c0_i32, %c0_i32_0 : i32, i32
  }
  func.func @transform_5(%arg0: i32) -> (i32, i32) {
    %c0_i32 = arith.constant 0 : i32
    %c0_i32_0 = arith.constant 0 : i32
    %c0_i32_1 = arith.constant 0 : i32
    return %c0_i32, %c0_i32_0 : i32, i32
  }
  func.func @transform_6(%arg0: i32) -> (i32, i32, i32) {
    %c0_i32 = arith.constant 0 : i32
    %c0_i32_0 = arith.constant 0 : i32
    %c0_i32_1 = arith.constant 0 : i32
    return %arg0, %c0_i32, %c0_i32_0 : i32, i32, i32
  }
}

</mosaic_0001>

<bundles_post_ra>
// kernel: lin_disc_v1.1
= control target key start
LH: loop header
LB: loop body
LE: loop exit
PB: predicated region body
PF: predicated region fallthrough
CT: control target
= control target key end

     0   :  { %s6214_s21 = smov 0   ;;  %s9428_s0 = inlined_call_operand.vmem [shape: bf16[8,64,32], index: 0, kind: input, shape index: {}]   ;;  %s9429_s1 = inlined_call_operand.vmem [shape: bf16[32,32], index: 1, kind: input, shape index: {}]   ;;  %s9430_s2 = inlined_call_operand.vmem [shape: bf16[96,64], index: 2, kind: input, shape index: {}]   ;;  %s9431_s3 = inlined_call_operand.vmem [shape: bf16[32,64], index: 3, kind: input, shape index: {}]   ;;  %s9432_s4 = inlined_call_operand.vmem [shape: f32[18,64], index: 4, kind: input, shape index: {}]   ;;  %s9433_s5 = inlined_call_operand.vmem [shape: f32[88,16], index: 5, kind: input, shape index: {}]   ;;  %s9434_s6 = inlined_call_operand.vmem [shape: f32[8,1,1], index: 6, kind: output, shape index: {}]  }
   0x1 LB: > { %s5472_s22 = sadd.s32 4294967295, %s6171_s21   ;;  %p5476_p0 = scmp.ge.s32.totalorder %s6171_s21, 1  ;;  %s6171_s21 = sphi %s6214_s21, %s16_s21  }
   0x2   : > { %p214_p1 = scmp.lt.s32.totalorder %s6171_s21, 3 }
   0x4   : > { %p215_p2 = pnand %p5476_p0, %p214_p1 }
   0x6   : > { %218 = sbr.rel (%p215_p2) target bundleno = 3848 (0xf08), region = 44 }
   0xb   : > { %v5789_v0 = vld [vmem:[%s9429_s1 + $0x8] sm:$0xff]   ;;  %s5477_s25 = sshll.u32 %s5472_s22, 2  ;;  %v5790_v1 = vld [vmem:[%s9429_s1] sm:$0xff]   ;;  %vm403_vm0 = vcmask 261120   ;;  %v307_v18 = vlaneseq  ;;  %s6173_s18 = smov 32   ;;  %vm2193_vm8 = vcmask 523264  }
   0xc   : > { %p245_p3 = scmp.lt.s32.totalorder %s5477_s25, 7  ;;  %5650 = vmatprep.subr.bf16.mxu0 %v5789_v0  ;;  %v6276_v21 = vld [vmem:[%s9432_s4] sm:$0xff]  ;;  %s6174_s24 = smov 64   ;;  %vm2278_vm9 = vcmask 785408   ;;  %vm4681_vm13 = vcmask 1041409   ;;  %vm4683_vm14 = vcmask 1042434  }
   0xd   : > { %5651 = vmatpush3.bf16.msra.mxu0 %v5789_v0  ;;  %v6268_v19 = vshrl.u32 %v307_v18, 7  ;;  %vm4685_vm15 = vcmask 1043459  }
   0xe   : > { %s9925_s25 = smov (!%p245_p3, %s5477_s25), 7  ;;  %5652 = vmatprep.subr.bf16.mxu0 %v5790_v1 }
   0xf   : > { %s5585_s28 = sshll.u32 %s9925_s25, 5  ;;  %9575 = vst [vmem:[#allocation2_spill] sm:$0xff] %v6268_v19  ;;  %v6271_v20 = vsub.s32 0, %v6268_v19  ;;  %vm1872_vm1 = vcmp.lt.s32.totalorder %v6268_v19, 7  ;;  %vm1679_vm5 = vcmp.lt.s32.totalorder %v6268_v19, 1  ;;  %s254_s17 = scalar_lea.vmem %s9434_s6, %s9925_s25 }
  0x10   : > { %s6234_s7 = scalar_lea.vmem %s9428_s0, %s5585_s28  ;;  %s6175_s28 = smov 96  }
  0x11   : > { %5653 = vmatpush3.bf16.msra.mxu0 %v5790_v1  ;;  %v5791_v2 = vld [vmem:[%s6234_s7] sm:$0xff]   ;;  %v5792_v3 = vld [vmem:[%s6234_s7 + $0x8] sm:$0xff]   ;;  %v5793_v4 = vld [vmem:[%s6234_s7 + $0x10] sm:$0xff]   ;;  %9576 = vst [vmem:[#allocation3_spill] sm:$0xff] %v6271_v20  ;;  %v6280_v22 = vrot.slane %v6276_v21, %v6271_v20 }
  0x12   : > { %5654 = vmatprep.mubr.msk.bf16.mxu0 %vm403_vm0, %v5791_v2  ;;  %v5794_v5 = vld [vmem:[%s6234_s7 + $0x18] sm:$0xff]   ;;  %v5795_v6 = vld [vmem:[%s6234_s7 + $0x20] sm:$0xff]   ;;  %v5796_v7 = vld [vmem:[%s6234_s7 + $0x28] sm:$0xff]  }
  0x13   : > { %v5797_v8 = vld [vmem:[%s6234_s7 + $0x30] sm:$0xff]   ;;  %v5798_v9 = vld [vmem:[%s6234_s7 + $0x38] sm:$0xff]   ;;  %v5799_v10 = vld [vmem:[%s6234_s7 + $0x40] sm:$0xff]  }
  0x14   : > { %5655 = vmatmul.mubr.msk.bf16.vlgmr.msra.gmra.mxu0 %vm403_vm0, %v5792_v3  ;;  %v5800_v11 = vld [vmem:[%s6234_s7 + $0x48] sm:$0xff]   ;;  %v5801_v12 = vld [vmem:[%s6234_s7 + $0x50] sm:$0xff]   ;;  %v5802_v13 = vld [vmem:[%s6234_s7 + $0x58] sm:$0xff]  }
  0x15   : > { %5658 = vmatprep.mubr.msk.bf16.mxu0 %vm403_vm0, %v5793_v4  ;;  %v5803_v14 = vld [vmem:[%s6234_s7 + $0x60] sm:$0xff]   ;;  %v5804_v15 = vld [vmem:[%s6234_s7 + $0x68] sm:$0xff]   ;;  %v5805_v16 = vld [vmem:[%s6234_s7 + $0x70] sm:$0xff]  }
  0x16   : > { %v5806_v17 = vld [vmem:[%s6234_s7 + $0x78] sm:$0xff]  }
  0x1c   : > { %5659 = vmatmul.mubr.msk.bf16.gmra.mxu0 %vm403_vm0, %v5794_v5 }
  0x1d   : > { %5662 = vmatprep.mubr.msk.bf16.mxu0 %vm403_vm0, %v5795_v6 }
  0x24   : > { %5663 = vmatmul.mubr.msk.bf16.gmra.mxu0 %vm403_vm0, %v5796_v7 }
  0x25   : > { %5666 = vmatprep.mubr.msk.bf16.mxu0 %vm403_vm0, %v5797_v8 }
  0x2c   : > { %5667 = vmatmul.mubr.msk.bf16.gmra.mxu0 %vm403_vm0, %v5798_v9 }
  0x2d   : > { %5670 = vmatprep.mubr.msk.bf16.mxu0 %vm403_vm0, %v5799_v10 }
  0x34   : > { %5671 = vmatmul.mubr.msk.bf16.gmra.mxu0 %vm403_vm0, %v5800_v11 }
  0x35   : > { %5674 = vmatprep.mubr.msk.bf16.mxu0 %vm403_vm0, %v5801_v12 }
  0x3c   : > { %5675 = vmatmul.mubr.msk.bf16.gmra.mxu0 %vm403_vm0, %v5802_v13 }
  0x3d   : > { %5678 = vmatprep.mubr.msk.bf16.mxu0 %vm403_vm0, %v5803_v14 }
  0x44   : > { %5679 = vmatmul.mubr.msk.bf16.gmra.mxu0 %vm403_vm0, %v5804_v15 }
  0x45   : > { %5682 = vmatprep.mubr.msk.bf16.mxu0 %vm403_vm0, %v5805_v16 }
  0x4c   : > { %5683 = vmatmul.mubr.msk.bf16.gmra.mxu0 %vm403_vm0, %v5806_v17 }
  0xd4   : > { %v5656_v23 = vpop.f32.mrf.mxu0 }
  0xd5   : > { %v6283_v24 = vadd.f32 %v5656_v23, %v6280_v22 }
  0xd6   : > { %v486_v25 = vpop.f32.mrf.mxu0 }
  0xd7   : > { %v6286_v26 = vadd.f32 %v486_v25, %v6280_v22  ;;  %v619_v27 = vsel %vm403_vm0, %v6283_v24, 0.0  ;;  %v744_v28 = vmul.f32 %v6283_v24, %v6283_v24 }
  0xd8   : > { %620 = vadd.xlane.f32.xlu1 %v619_v27  ;;  %v5657_v29 = vpop.f32.mrf.mxu0 }
  0xd9   : > { %v6293_v30 = vadd.f32 %v5657_v29, %v6280_v22  ;;  %v613_v31 = vsel %vm403_vm0, %v6286_v26, 0.0  ;;  %v780_v34 = vsel %vm403_vm0, %v744_v28, 0.0  ;;  %v742_v39 = vmul.f32 %v6286_v26, %v6286_v26 }
  0xda   : > { %v489_v32 = vpop.f32.mrf.mxu0  ;;  %614 = vadd.xlane.f32.xlu0 %v613_v31 }
  0xdb   : > { %v6298_v33 = vadd.f32 %v489_v32, %v6280_v22  ;;  %v745_v37 = vmul.f32 %v6293_v30, %v6293_v30  ;;  %v622_v38 = vsel %vm403_vm0, %v6293_v30, 0.0  ;;  %v774_v44 = vsel %vm403_vm0, %v742_v39, 0.0 }
  0xdc   : > { %781 = vadd.xlane.f32.xlu1 %v780_v34  ;;  %v5660_v35 = vpop.f32.mrf.mxu0 }
  0xdd   : > { %v616_v36 = vsel %vm403_vm0, %v6298_v33, 0.0  ;;  %v6310_v41 = vadd.f32 %v5660_v35, %v6280_v22  ;;  %v783_v42 = vsel %vm403_vm0, %v745_v37, 0.0  ;;  %v743_v43 = vmul.f32 %v6298_v33, %v6298_v33 }
  0xde   : > { %617 = vadd.xlane.f32.xlu0 %v616_v36  ;;  %v502_v40 = vpop.f32.mrf.mxu0 }
  0xdf   : > { %v6317_v46 = vadd.f32 %v502_v40, %v6280_v22  ;;  %v777_v47 = vsel %vm403_vm0, %v743_v43, 0.0  ;;  %v631_v48 = vsel %vm403_vm0, %v6310_v41, 0.0  ;;  %v748_v49 = vmul.f32 %v6310_v41, %v6310_v41 }
  0xe0   : > { %623 = vadd.xlane.f32.xlu1 %v622_v38  ;;  %v5661_v45 = vpop.f32.mrf.mxu0 }
  0xe1   : > { %v6325_v51 = vadd.f32 %v5661_v45, %v6280_v22  ;;  %v625_v52 = vsel %vm403_vm0, %v6317_v46, 0.0  ;;  %v792_v54 = vsel %vm403_vm0, %v748_v49, 0.0  ;;  %v746_v55 = vmul.f32 %v6317_v46, %v6317_v46 }
  0xe2   : > { %784 = vadd.xlane.f32.xlu0 %v783_v42  ;;  %v505_v50 = vpop.f32.mrf.mxu0 }
  0xe3   : > { %v6333_v56 = vadd.f32 %v505_v50, %v6280_v22  ;;  %v634_v57 = vsel %vm403_vm0, %v6325_v51, 0.0  ;;  %v786_v60 = vsel %vm403_vm0, %v746_v55, 0.0  ;;  %v749_v0 = vmul.f32 %v6325_v51, %v6325_v51 }
  0xe4   : > { %775 = vadd.xlane.f32.xlu1 %v774_v44  ;;  %v5664_v53 = vpop.f32.mrf.mxu0 }
  0xe5   : > { %v6338_v58 = vadd.f32 %v5664_v53, %v6280_v22  ;;  %v628_v61 = vsel %vm403_vm0, %v6333_v56, 0.0  ;;  %v795_v2 = vsel %vm403_vm0, %v749_v0, 0.0  ;;  %v747_v4 = vmul.f32 %v6333_v56, %v6333_v56 }
  0xe6   : > { %778 = vadd.xlane.f32.xlu0 %v777_v47  ;;  %v518_v59 = vpop.f32.mrf.mxu0 }
  0xe7   : > { %v6344_v62 = vadd.f32 %v518_v59, %v6280_v22  ;;  %v643_v63 = vsel %vm403_vm0, %v6338_v58, 0.0  ;;  %v752_v5 = vmul.f32 %v6338_v58, %v6338_v58  ;;  %v789_v8 = vsel %vm403_vm0, %v747_v4, 0.0 }
  0xe8   : > { %632 = vadd.xlane.f32.xlu1 %v631_v48  ;;  %v5665_v1 = vpop.f32.mrf.mxu0 }
  0xe9   : > { %v637_v3 = vsel %vm403_vm0, %v6344_v62, 0.0  ;;  %v6358_v7 = vadd.f32 %v5665_v1, %v6280_v22  ;;  %v804_v9 = vsel %vm403_vm0, %v752_v5, 0.0  ;;  %v750_v10 = vmul.f32 %v6344_v62, %v6344_v62 }
  0xea   : > { %626 = vadd.xlane.f32.xlu0 %v625_v52  ;;  %v521_v6 = vpop.f32.mrf.mxu0 }
  0xeb   : > { %v6365_v12 = vadd.f32 %v521_v6, %v6280_v22  ;;  %v646_v13 = vsel %vm403_vm0, %v6358_v7, 0.0  ;;  %v798_v15 = vsel %vm403_vm0, %v750_v10, 0.0  ;;  %v753_v18 = vmul.f32 %v6358_v7, %v6358_v7 }
  0xec   : > { %793 = vadd.xlane.f32.xlu1 %v792_v54  ;;  %v5668_v11 = vpop.f32.mrf.mxu0 }
  0xed   : > { %v6370_v14 = vadd.f32 %v5668_v11, %v6280_v22  ;;  %v640_v17 = vsel %vm403_vm0, %v6365_v12, 0.0  ;;  %v807_v27 = vsel %vm403_vm0, %v753_v18, 0.0  ;;  %v751_v28 = vmul.f32 %v6365_v12, %v6365_v12 }
  0xee   : > { %635 = vadd.xlane.f32.xlu0 %v634_v57  ;;  %v534_v16 = vpop.f32.mrf.mxu0 }
  0xef   : > { %v6378_v23 = vadd.f32 %v534_v16, %v6280_v22  ;;  %v655_v25 = vsel %vm403_vm0, %v6370_v14, 0.0  ;;  %v756_v32 = vmul.f32 %v6370_v14, %v6370_v14  ;;  %v801_v36 = vsel %vm403_vm0, %v751_v28, 0.0 }
  0xf0   : > { %787 = vadd.xlane.f32.xlu1 %v786_v60  ;;  %v5669_v29 = vpop.f32.mrf.mxu0 }
  0xf1   : > { %v649_v31 = vsel %vm403_vm0, %v6378_v23, 0.0  ;;  %v6390_v35 = vadd.f32 %v5669_v29, %v6280_v22  ;;  %v816_v37 = vsel %vm403_vm0, %v756_v32, 0.0  ;;  %v754_v38 = vmul.f32 %v6378_v23, %v6378_v23 }
  0xf2   : > { %629 = vadd.xlane.f32.xlu0 %v628_v61  ;;  %v537_v34 = vpop.f32.mrf.mxu0 }
  0xf3   : > { %v6397_v40 = vadd.f32 %v537_v34, %v6280_v22  ;;  %v658_v42 = vsel %vm403_vm0, %v6390_v35, 0.0  ;;  %v810_v44 = vsel %vm403_vm0, %v754_v38, 0.0  ;;  %v757_v48 = vmul.f32 %v6390_v35, %v6390_v35 }
  0xf4   : > { %644 = vadd.xlane.f32.xlu1 %v643_v63  ;;  %v5672_v39 = vpop.f32.mrf.mxu0 }
  0xf5   : > { %v6402_v43 = vadd.f32 %v5672_v39, %v6280_v22  ;;  %v652_v47 = vsel %vm403_vm0, %v6397_v40, 0.0  ;;  %v819_v52 = vsel %vm403_vm0, %v757_v48, 0.0  ;;  %v755_v53 = vmul.f32 %v6397_v40, %v6397_v40 }
  0xf6   : > { %796 = vadd.xlane.f32.xlu0 %v795_v2  ;;  %v550_v45 = vpop.f32.mrf.mxu0 }
  0xf7   : > { %v6410_v49 = vadd.f32 %v550_v45, %v6280_v22  ;;  %v667_v50 = vsel %vm403_vm0, %v6402_v43, 0.0  ;;  %v760_v57 = vmul.f32 %v6402_v43, %v6402_v43  ;;  %v813_v61 = vsel %vm403_vm0, %v755_v53, 0.0 }
  0xf8   : > { %638 = vadd.xlane.f32.xlu1 %v637_v3  ;;  %v5673_v54 = vpop.f32.mrf.mxu0 }
  0xf9   : > { %v661_v55 = vsel %vm403_vm0, %v6410_v49, 0.0  ;;  %v6422_v60 = vadd.f32 %v5673_v54, %v6280_v22  ;;  %v828_v63 = vsel %vm403_vm0, %v760_v57, 0.0  ;;  %v758_v0 = vmul.f32 %v6410_v49, %v6410_v49 }
  0xfa   : > { %790 = vadd.xlane.f32.xlu0 %v789_v8  ;;  %v553_v59 = vpop.f32.mrf.mxu0 }
  0xfb   : > { %v6429_v2 = vadd.f32 %v553_v59, %v6280_v22  ;;  %v670_v3 = vsel %vm403_vm0, %v6422_v60, 0.0  ;;  %v822_v5 = vsel %vm403_vm0, %v758_v0, 0.0 }
  0xfc   : > { %805 = vadd.xlane.f32.xlu1 %v804_v9  ;;  %v5676_v1 = vpop.f32.mrf.mxu0  ;;  %v761_v9 = vmul.f32 %v6422_v60, %v6422_v60 }
  0xfd   : > { %v6434_v4 = vadd.f32 %v5676_v1, %v6280_v22  ;;  %v664_v8 = vsel %vm403_vm0, %v6429_v2, 0.0 }
  0xfe   : > { %647 = vadd.xlane.f32.xlu0 %v646_v13  ;;  %v566_v6 = vpop.f32.mrf.mxu0  ;;  %v831_v13 = vsel %vm403_vm0, %v761_v9, 0.0 }
  0xff   : > { %v6442_v10 = vadd.f32 %v566_v6, %v6280_v22  ;;  %v679_v11 = vsel %vm403_vm0, %v6434_v4, 0.0  ;;  %v764_v18 = vmul.f32 %v6434_v4, %v6434_v4 }
 0x100   : > { %799 = vadd.xlane.f32.xlu1 %v798_v15  ;;  %v759_v15 = vmul.f32 %v6429_v2, %v6429_v2  ;;  %v5677_v16 = vpop.f32.mrf.mxu0 }
 0x101   : > { %v840_v29 = vsel %vm403_vm0, %v764_v18, 0.0 }
 0x102   : > { %641 = vadd.xlane.f32.xlu0 %v640_v17  ;;  %v673_v17 = vsel %vm403_vm0, %v6442_v10, 0.0  ;;  %v825_v28 = vsel %vm403_vm0, %v759_v15, 0.0 }
 0x104   : > { %656 = vadd.xlane.f32.xlu1 %v655_v25  ;;  %v569_v25 = vpop.f32.mrf.mxu0 }
 0x105   : > { %v6461_v34 = vadd.f32 %v569_v25, %v6280_v22 }
 0x106   : > { %808 = vadd.xlane.f32.xlu0 %v807_v27  ;;  %v6454_v27 = vadd.f32 %v5677_v16, %v6280_v22  ;;  %v5680_v32 = vpop.f32.mrf.mxu0 }
 0x108   : > { %650 = vadd.xlane.f32.xlu1 %v649_v31  ;;  %v762_v31 = vmul.f32 %v6442_v10, %v6442_v10  ;;  %v582_v39 = vpop.f32.mrf.mxu0 }
 0x109   : > { %v6474_v45 = vadd.f32 %v582_v39, %v6280_v22 }
 0x10a   : > { %802 = vadd.xlane.f32.xlu0 %v801_v36  ;;  %v682_v36 = vsel %vm403_vm0, %v6454_v27, 0.0  ;;  %v834_v38 = vsel %vm403_vm0, %v762_v31, 0.0 }
 0x10b   : > { %v685_v53 = vsel %vm403_vm0, %v6474_v45, 0.0 }
 0x10c   : > { %817 = vadd.xlane.f32.xlu1 %v816_v37  ;;  %v6466_v37 = vadd.f32 %v5680_v32, %v6280_v22 }
 0x10e   : > { %659 = vadd.xlane.f32.xlu0 %v658_v42  ;;  %v676_v42 = vsel %vm403_vm0, %v6461_v34, 0.0  ;;  %v768_v54 = vmul.f32 %v6466_v37, %v6466_v37 }
 0x110   : > { %811 = vadd.xlane.f32.xlu1 %v810_v44  ;;  %v765_v44 = vmul.f32 %v6454_v27, %v6454_v27 }
 0x112   : > { %653 = vadd.xlane.f32.xlu0 %v652_v47  ;;  %v691_v47 = vsel %vm403_vm0, %v6466_v37, 0.0  ;;  %v843_v48 = vsel %vm403_vm0, %v765_v44, 0.0 }
 0x114   : > { %668 = vadd.xlane.f32.xlu1 %v667_v50  ;;  %v763_v50 = vmul.f32 %v6461_v34, %v6461_v34 }
 0x116   : > { %820 = vadd.xlane.f32.xlu0 %v819_v52  ;;  %v5681_v52 = vpop.f32.mrf.mxu0  ;;  %v837_v59 = vsel %vm403_vm0, %v763_v50, 0.0 }
 0x117   : > { %v6486_v57 = vadd.f32 %v5681_v52, %v6280_v22 }
 0x118   : > { %662 = vadd.xlane.f32.xlu1 %v661_v55  ;;  %v585_v55 = vpop.f32.mrf.mxu0 }
 0x119   : > { %v6493_v1 = vadd.f32 %v585_v55, %v6280_v22 }
 0x11a   : > { %814 = vadd.xlane.f32.xlu0 %v813_v61  ;;  %v852_v61 = vsel %vm403_vm0, %v768_v54, 0.0  ;;  %v5684_v0 = vpop.f32.mrf.mxu0 }
 0x11b   : > { %v688_v9 = vsel %vm403_vm0, %v6493_v1, 0.0  ;;  %v767_v18 = vmul.f32 %v6493_v1, %v6493_v1 }
 0x11c   : > { %829 = vadd.xlane.f32.xlu1 %v828_v63  ;;  %v766_v63 = vmul.f32 %v6474_v45, %v6474_v45 }
 0x11d   : > { %v849_v32 = vsel %vm403_vm0, %v767_v18, 0.0 }
 0x11e   : > { %671 = vadd.xlane.f32.xlu0 %v670_v3  ;;  %v694_v3 = vsel %vm403_vm0, %v6486_v57, 0.0  ;;  %v846_v6 = vsel %vm403_vm0, %v766_v63, 0.0 }
 0x120   : > { %823 = vadd.xlane.f32.xlu1 %v822_v5  ;;  %v6498_v5 = vadd.f32 %v5684_v0, %v6280_v22 }
 0x122   : > { %665 = vadd.xlane.f32.xlu0 %v664_v8  ;;  %v598_v8 = vpop.f32.mrf.mxu0  ;;  %v703_v15 = vsel %vm403_vm0, %v6498_v5, 0.0 }
 0x124   : > { %680 = vadd.xlane.f32.xlu1 %v679_v11  ;;  %v769_v11 = vmul.f32 %v6486_v57, %v6486_v57  ;;  %v5685_v16 = vpop.f32.mrf.mxu0 }
 0x126   : > { %832 = vadd.xlane.f32.xlu0 %v831_v13  ;;  %v6506_v13 = vadd.f32 %v598_v8, %v6280_v22  ;;  %v601_v31 = vpop.f32.mrf.mxu0 }
 0x127   : > { %v6525_v39 = vadd.f32 %v601_v31, %v6280_v22 }
 0x128   : > { %674 = vadd.xlane.f32.xlu1 %v673_v17  ;;  %v855_v17 = vsel %vm403_vm0, %v769_v11, 0.0  ;;  %v697_v25 = vsel %vm403_vm0, %v6506_v13, 0.0 }
 0x129   : > { %v700_v52 = vsel %vm403_vm0, %v6525_v39, 0.0 }
 0x12a   : > { %826 = vadd.xlane.f32.xlu0 %v825_v28  ;;  %v770_v28 = vmul.f32 %v6506_v13, %v6506_v13 }
 0x12c   : > { %841 = vadd.xlane.f32.xlu1 %v840_v29  ;;  %v6518_v29 = vadd.f32 %v5685_v16, %v6280_v22 }
 0x12e   : > { %683 = vadd.xlane.f32.xlu0 %v682_v36  ;;  %v772_v36 = vmul.f32 %v6498_v5, %v6498_v5  ;;  %v706_v50 = vsel %vm403_vm0, %v6518_v29, 0.0 }
 0x130   : > { %835 = vadd.xlane.f32.xlu1 %v834_v38  ;;  %v858_v38 = vsel %vm403_vm0, %v770_v28, 0.0  ;;  %v864_v44 = vsel %vm403_vm0, %v772_v36, 0.0 }
 0x132   : > { %677 = vadd.xlane.f32.xlu0 %v676_v42  ;;  %v773_v42 = vmul.f32 %v6518_v29, %v6518_v29 }
 0x134   : > { %692 = vadd.xlane.f32.xlu1 %v691_v47  ;;  %v867_v47 = vsel %vm403_vm0, %v773_v42, 0.0 }
 0x136   : > { %844 = vadd.xlane.f32.xlu0 %v843_v48  ;;  %v771_v48 = vmul.f32 %v6525_v39, %v6525_v39 }
 0x138   : > { %686 = vadd.xlane.f32.xlu1 %v685_v53  ;;  %v861_v22 = vsel %vm403_vm0, %v771_v48, 0.0 }
 0x13a   : > { %838 = vadd.xlane.f32.xlu0 %v837_v59 }
 0x13c   : > { %853 = vadd.xlane.f32.xlu1 %v852_v61 }
 0x13e   : > { %695 = vadd.xlane.f32.xlu0 %v694_v3 }
 0x140   : > { %847 = vadd.xlane.f32.xlu1 %v846_v6 }
 0x142   : > { %689 = vadd.xlane.f32.xlu0 %v688_v9 }
 0x144   : > { %704 = vadd.xlane.f32.xlu1 %v703_v15 }
 0x146   : > { %856 = vadd.xlane.f32.xlu0 %v855_v17 }
 0x148   : > { %698 = vadd.xlane.f32.xlu1 %v697_v25 }
 0x14a   : > { %850 = vadd.xlane.f32.xlu0 %v849_v32 }
 0x14c   : > { %859 = vadd.xlane.f32.xlu1 %v858_v38 }
 0x14e   : > { %865 = vadd.xlane.f32.xlu0 %v864_v44 }
 0x150   : > { %868 = vadd.xlane.f32.xlu1 %v867_v47 }
 0x152   : > { %707 = vadd.xlane.f32.xlu0 %v706_v50 }
 0x154   : > { %862 = vadd.xlane.f32.xlu1 %v861_v22 }
 0x156   : > { %701 = vadd.xlane.f32.xlu0 %v700_v52 }
 0x161   : > { %v621_v53 = vpop.xlane.xlu1 %620 }
 0x162   : > { %v712_v54 = vmul.f32 0.03125, %v621_v53 }
 0x163   : > { %v615_v55 = vpop.xlane.xlu0 %614 }
 0x164   : > { %v904_v61 = vmul.f32 %v712_v54, %v712_v54  ;;  %v6538_v8 = vmul.f32 0.03125, %v615_v55 }
 0x165   : > { %v782_v59 = vpop.xlane.xlu1 %781 }
 0x166   : > { %v872_v63 = vmul.f32 0.03125, %v782_v59  ;;  %v902_v31 = vmul.f32 %v6538_v8, %v6538_v8 }
 0x167   : > { %v618_v0 = vpop.xlane.xlu0 %617 }
 0x168   : > { %v936_v3 = vsub.f32 %v872_v63, %v904_v61  ;;  %v6542_v17 = vmul.f32 0.03125, %v618_v0 }
 0x169   : > { %v624_v6 = vpop.xlane.xlu1 %623 }
 0x16a   : > { %v968_v9 = vmax.f32 %v936_v3, 0.0  ;;  %v6540_v11 = vmul.f32 0.03125, %v624_v6  ;;  %v903_v42 = vmul.f32 %v6542_v17, %v6542_v17 }
 0x16b   : > { %v785_v15 = vpop.xlane.xlu0 %784 }
 0x16c   : > { %v1032_v16 = vadd.f32 1e-05, %v968_v9  ;;  %v905_v18 = vmul.f32 %v6540_v11, %v6540_v11  ;;  %v873_v25 = vmul.f32 0.03125, %v785_v15 }
 0x16d   : > { %v776_v28 = vpop.xlane.xlu1 %775 }
 0x16e   : > { %v937_v32 = vsub.f32 %v873_v25, %v905_v18  ;;  %v870_v36 = vmul.f32 0.03125, %v776_v28  ;;  %5815 = vrsqrt.f32 %v1032_v16 }
 0x16f   : > { %v779_v38 = vpop.xlane.xlu0 %778 }
 0x170   : > { %v969_v44 = vmax.f32 %v937_v32, 0.0  ;;  %v934_v47 = vsub.f32 %v870_v36, %v902_v31  ;;  %v871_v48 = vmul.f32 0.03125, %v779_v38  ;;  %v6559_v38 = vsub.s32 1, %v6268_v19 }
 0x171   : > { %v633_v50 = vpop.xlane.xlu1 %632 }
 0x172   : > { %v1033_v22 = vadd.f32 1e-05, %v969_v44  ;;  %v966_v52 = vmax.f32 %v934_v47, 0.0  ;;  %v935_v53 = vsub.f32 %v871_v48, %v903_v42  ;;  %v6550_v55 = vmul.f32 0.03125, %v633_v50  ;;  %9577 = vst [vmem:[#allocation4_spill] sm:$0xff] %v6559_v38 }
 0x173   : > { %v627_v59 = vpop.xlane.xlu0 %626  ;;  %v1000_v48 = vsub.f32 %v6283_v24, %v712_v54 }
 0x174   : > { %5817 = vrsqrt.f32 %v1033_v22  ;;  %v1030_v61 = vadd.f32 1e-05, %v966_v52  ;;  %v967_v63 = vmax.f32 %v935_v53, 0.0  ;;  %v908_v0 = vmul.f32 %v6550_v55, %v6550_v55  ;;  %v5807_v53 = vld [vmem:[%s9430_s2 + $0x28] sm:$0xff]  }
 0x175   : > { %v794_v3 = vpop.xlane.xlu1 %793  ;;  %v6554_v9 = vmul.f32 0.03125, %v627_v59  ;;  %v9435_v22 = vsub.s32 2, %v6268_v19  ;;  %v1001_v59 = vsub.f32 %v6293_v30, %v6540_v11  ;;  %5686 = vmatprep.subr.bf16.mxu1 %v5807_v53 }
 0x176   : > { %5819 = vrsqrt.f32 %v1030_v61  ;;  %v1031_v6 = vadd.f32 1e-05, %v967_v63  ;;  %v876_v15 = vmul.f32 0.03125, %v794_v3  ;;  %v6572_v3 = vrot.slane %v6276_v21, %v6559_v38  ;;  %5687 = vmatpush3.bf16.msra.mxu1 %v5807_v53 }
 0x177   : > { %v636_v16 = vpop.xlane.xlu0 %635  ;;  %v906_v28 = vmul.f32 %v6554_v9, %v6554_v9  ;;  %v6581_v30 = vrot.slane %v6276_v21, %v9435_v22 }
 0x178   : > { %5821 = vrsqrt.f32 %v1031_v6  ;;  %v940_v18 = vsub.f32 %v876_v15, %v908_v0  ;;  %v6561_v44 = vmul.f32 0.03125, %v636_v16 }
 0x179   : > { %v788_v25 = vpop.xlane.xlu1 %787 }
 0x17a   : > { %v874_v31 = vmul.f32 0.03125, %v788_v25  ;;  %v972_v32 = vmax.f32 %v940_v18, 0.0  ;;  %v909_v24 = vmul.f32 %v6561_v44, %v6561_v44 }
 0x17b   : > { %v630_v36 = vpop.xlane.xlu0 %629  ;;  %v5816_v42 = vpop.eup %5815 }
 0x17c   : > { %v938_v47 = vsub.f32 %v874_v31, %v906_v28  ;;  %v1036_v61 = vadd.f32 1e-05, %v972_v32  ;;  %v1096_v0 = vmul.f32 %v5816_v42, %v1000_v48  ;;  %v6576_v6 = vmul.f32 0.03125, %v630_v36  ;;  %v5808_v31 = vld [vmem:[%s9430_s2 + $0x20] sm:$0xff]  }
 0x17d   : > { %v645_v50 = vpop.xlane.xlu1 %644  ;;  %v998_v36 = vsub.f32 %v6286_v26, %v6538_v8  ;;  %v999_v42 = vsub.f32 %v6298_v33, %v6542_v17  ;;  %5688 = vmatprep.subr.bf16.mxu1 %v5808_v31 }
 0x17e   : > { %v970_v52 = vmax.f32 %v938_v47, 0.0  ;;  %v6583_v11 = vmul.f32 0.03125, %v645_v50  ;;  %v1132_v47 = vmul.f32 %v6572_v3, %v1096_v0  ;;  %v907_v48 = vmul.f32 %v6576_v6, %v6576_v6  ;;  %5689 = vmatpush3.bf16.msra.mxu1 %v5808_v31  ;;  %v5810_v31 = vld [vmem:[%s9430_s2 + $0x10] sm:$0xff]  }
 0x17f   : > { %v797_v63 = vpop.xlane.xlu0 %796 }
 0x180   : > { %v1034_v54 = vadd.f32 1e-05, %v970_v52  ;;  %v877_v15 = vmul.f32 0.03125, %v797_v63  ;;  %v912_v50 = vmul.f32 %v6583_v11, %v6583_v11 }
 0x181   : > { %v5818_v16 = vpop.eup %5817  ;;  %v639_v18 = vpop.xlane.xlu1 %638 }
 0x182   : > { %5823 = vrsqrt.f32 %v1034_v54  ;;  %v941_v25 = vsub.f32 %v877_v15, %v909_v24  ;;  %v1097_v28 = vmul.f32 %v5818_v16, %v1001_v59  ;;  %v6598_v0 = vmul.f32 0.03125, %v639_v18 }
 0x183   : > { %v5820_v32 = vpop.eup %5819  ;;  %5825 = vrsqrt.f32 %v1036_v61  ;;  %v791_v21 = vpop.xlane.xlu0 %790  ;;  %v6601_v15 = vadd.f32 %v6581_v30, %v1132_v47 }
 0x184   : > { %v973_v52 = vmax.f32 %v941_v25, 0.0  ;;  %v875_v53 = vmul.f32 0.03125, %v791_v21  ;;  %v1133_v26 = vmul.f32 %v6572_v3, %v1097_v28  ;;  %v1094_v8 = vmul.f32 %v5820_v32, %v998_v36  ;;  %v5809_v28 = vld [vmem:[%s9430_s2 + $0x18] sm:$0xff]  }
 0x185   : > { %v5822_v59 = vpop.eup %5821  ;;  %v806_v63 = vpop.xlane.xlu1 %805  ;;  %9578 = vst [vmem:[#allocation5_spill] sm:$0xff] %v6601_v15  ;;  %v910_v36 = vmul.f32 %v6598_v0, %v6598_v0  ;;  %5690 = vmatprep.subr.bf16.mxu1 %v5809_v28 }
 0x186   : > { %v1037_v33 = vadd.f32 1e-05, %v973_v52  ;;  %v939_v17 = vsub.f32 %v875_v53, %v907_v48  ;;  %v880_v61 = vmul.f32 0.03125, %v806_v63  ;;  %v1095_v24 = vmul.f32 %v5822_v59, %v999_v42  ;;  %5691 = vmatpush3.bf16.msra.mxu1 %v5809_v28 }
 0x187   : > { %v648_v54 = vpop.xlane.xlu0 %647  ;;  %v6604_v16 = vadd.f32 %v6581_v30, %v1133_v26  ;;  %v1130_v25 = vmul.f32 %v6572_v3, %v1094_v8  ;;  %5692 = vmatprep.subr.bf16.mxu1 %v5810_v31  ;;  %v5811_v26 = vld [vmem:[%s9430_s2 + $0x8] sm:$0xff]  }
 0x188   : > { %5827 = vrsqrt.f32 %v1037_v33  ;;  %v971_v18 = vmax.f32 %v939_v17, 0.0  ;;  %v944_v32 = vsub.f32 %v880_v61, %v912_v50  ;;  %v1131_v47 = vmul.f32 %v6572_v3, %v1095_v24 }
 0x189   : > { %9579 = vst [vmem:[#allocation6_spill] sm:$0xff] %v6604_v16  ;;  %v800_v42 = vpop.xlane.xlu1 %799  ;;  %v2018_v21 = vpack.c.bf16 %v6604_v16, %v6601_v15  ;;  %v6619_v48 = vadd.f32 %v6581_v30, %v1130_v25  ;;  %v6628_v8 = vmul.f32 0.03125, %v648_v54  ;;  %v9436_v17 = vrot.slane %v6601_v15, 1 }
 0x18a   : > { %v1035_v52 = vadd.f32 1e-05, %v971_v18  ;;  %v976_v53 = vmax.f32 %v944_v32, 0.0  ;;  %v878_v59 = vmul.f32 0.03125, %v800_v42  ;;  %v6623_v63 = vadd.f32 %v6581_v30, %v1131_v47  ;;  %5693 = vmatpush3.bf16.msra.mxu1 %v5810_v31 }
 0x18b   : > { %9580 = vst [vmem:[#allocation7_spill] sm:$0xff] %v6619_v48  ;;  %2067 = vrot.lane.b32.xlu1 %v2018_v21, %s6173_s18  ;;  %v642_v50 = vpop.xlane.xlu0 %641  ;;  %v9441_v33 = vrot.slane %v6619_v48, 1  ;;  %v1002_v32 = vsub.f32 %v6317_v46, %v6554_v9  ;;  %v913_v42 = vmul.f32 %v6628_v8, %v6628_v8  ;;  %5694 = vmatprep.subr.bf16.mxu1 %v5811_v26 }
 0x18c   : > { %9581 = vst [vmem:[#allocation8_spill] sm:$0xff] %v6623_v63  ;;  %5829 = vrsqrt.f32 %v1035_v52  ;;  %v1040_v61 = vadd.f32 1e-05, %v976_v53  ;;  %v942_v24 = vsub.f32 %v878_v59, %v910_v36  ;;  %v2017_v28 = vpack.c.bf16 %v6623_v63, %v6619_v48 }
 0x18d   : > { %v657_v25 = vpop.xlane.xlu1 %656  ;;  %v1841_v18 = vrot.slane %v6623_v63, 1  ;;  %v6649_v53 = vmul.f32 0.03125, %v642_v50  ;;  %v1004_v59 = vsub.f32 %v6310_v41, %v6550_v55  ;;  %v5812_v50 = vld [vmem:[%s9430_s2] sm:$0xff]  }
 0x18e   : > { %v974_v21 = vmax.f32 %v942_v24, 0.0  ;;  %2065 = vrot.lane.b32.xlu0 %v2017_v28, %s6173_s18  ;;  %5831 = vrsqrt.f32 %v1040_v61  ;;  %v6655_v38 = vmul.f32 0.03125, %v657_v25  ;;  %5695 = vmatpush3.bf16.msra.mxu1 %v5811_v26  ;;  %v1005_v61 = vsub.f32 %v6325_v51, %v6561_v44 }
 0x18f   : > { %v5824_v54 = vpop.eup %5823  ;;  %v809_v36 = vpop.xlane.xlu0 %808  ;;  %v1902_v47 = vsel %vm1872_vm1, %v1841_v18, %v9436_v17  ;;  %v1903_v46 = vsel %vm1872_vm1, %v9441_v33, %v1841_v18  ;;  %v911_v17 = vmul.f32 %v6649_v53, %v6649_v53  ;;  %5696 = vmatprep.subr.bf16.mxu1 %v5812_v50 }
 0x190   : > { %v5826_v9 = vpop.eup %5825  ;;  %v1098_v52 = vmul.f32 %v5824_v54, %v1002_v32  ;;  %v881_v31 = vmul.f32 0.03125, %v809_v36  ;;  %v1038_v24 = vadd.f32 1e-05, %v974_v21  ;;  %v2033_v22 = vpack.c.bf16 %v1902_v47, %v1903_v46 }
 0x191   : > { %v651_v28 = vpop.xlane.xlu1 %650  ;;  %v1100_v55 = vmul.f32 %v5826_v9, %v1004_v59  ;;  %v916_v25 = vmul.f32 %v6655_v38, %v6655_v38  ;;  %v1003_v59 = vsub.f32 %v6333_v56, %v6576_v6 }
 0x192   : > { %v945_v20 = vsub.f32 %v881_v31, %v913_v42  ;;  %v1134_v18 = vmul.f32 %v6572_v3, %v1098_v52  ;;  %5833 = vrsqrt.f32 %v1038_v24  ;;  %2113 = vrot.lane.b32.xlu1 %v2033_v22, %s6174_s24  ;;  %5697 = vmatpush3.bf16.msra.mxu1 %v5812_v50  ;;  %v6669_v9 = vmul.f32 0.03125, %v651_v28 }
 0x193   : > { %v803_v41 = vpop.xlane.xlu0 %802  ;;  %v1136_v51 = vmul.f32 %v6572_v3, %v1100_v55 }
 0x194   : > { %v977_v32 = vmax.f32 %v945_v20, 0.0  ;;  %v879_v42 = vmul.f32 0.03125, %v803_v41  ;;  %v6667_v21 = vadd.f32 %v6581_v30, %v1134_v18  ;;  %v914_v24 = vmul.f32 %v6669_v9, %v6669_v9 }
 0x195   : > { %v5828_v26 = vpop.eup %5827  ;;  %v818_v54 = vpop.xlane.xlu1 %817 }
 0x196   : > { %9582 = vst [vmem:[#allocation9_spill] sm:$0xff] %v6667_v21  ;;  %v1041_v36 = vadd.f32 1e-05, %v977_v32  ;;  %v943_v47 = vsub.f32 %v879_v42, %v911_v17  ;;  %v884_v46 = vmul.f32 0.03125, %v818_v54  ;;  %v1101_v22 = vmul.f32 %v5828_v26, %v1005_v61 }
 0x197   : > { %v660_v52 = vpop.xlane.xlu0 %659  ;;  %v1844_v50 = vrot.slane %v6667_v21, 1  ;;  %v1843_v61 = vrot.slane %v6604_v16, 1 }
 0x198   : > { %5835 = vrsqrt.f32 %v1041_v36  ;;  %v975_v44 = vmax.f32 %v943_v47, 0.0  ;;  %v948_v20 = vsub.f32 %v884_v46, %v916_v25  ;;  %v1137_v17 = vmul.f32 %v6572_v3, %v1101_v22 }
 0x199   : > { %v5830_v31 = vpop.eup %5829  ;;  %v812_v18 = vpop.xlane.xlu1 %811  ;;  %v6680_v25 = vadd.f32 %v6581_v30, %v1136_v51  ;;  %v6685_v26 = vmul.f32 0.03125, %v660_v52  ;;  %v1900_v46 = vsel %vm1872_vm1, %v1843_v61, %v1844_v50 }
 0x19a   : > { %v1039_v28 = vadd.f32 1e-05, %v975_v44  ;;  %v980_v41 = vmax.f32 %v948_v20, 0.0  ;;  %v882_v55 = vmul.f32 0.03125, %v812_v18  ;;  %v6683_v42 = vadd.f32 %v6581_v30, %v1137_v17 }
 0x19b   : > { %v654_v32 = vpop.xlane.xlu0 %653  ;;  %9583 = vst [vmem:[#allocation10_spill] sm:$0xff] %v6680_v25  ;;  %v1099_v56 = vmul.f32 %v5830_v31, %v1003_v59  ;;  %v5832_v51 = vpop.eup %5831  ;;  %v1008_v44 = vsub.f32 %v6338_v58, %v6583_v11  ;;  %v1006_v20 = vsub.f32 %v6344_v62, %v6598_v0  ;;  %v917_v52 = vmul.f32 %v6685_v26, %v6685_v26 }
 0x19c   : > { %9584 = vst [vmem:[#allocation11_spill] sm:$0xff] %v6683_v42  ;;  %5837 = vrsqrt.f32 %v1039_v28  ;;  %v1044_v6 = vadd.f32 1e-05, %v980_v41  ;;  %v946_v54 = vsub.f32 %v882_v55, %v914_v24  ;;  %v2020_v47 = vpack.c.bf16 %v6683_v42, %v6680_v25 }
 0x19d   : > { %v669_v36 = vpop.xlane.xlu1 %668  ;;  %v1135_v22 = vmul.f32 %v6572_v3, %v1099_v56  ;;  %v1206_v31 = vadd.s32 56, %v6268_v19  ;;  %v9585_v18 = vrot.slane %v6601_v15, 1  ;;  %v6708_v11 = vmul.f32 0.03125, %v654_v32 }
 0x19e   : > { %v978_v59 = vmax.f32 %v946_v54, 0.0  ;;  %2071 = vrot.lane.b32.xlu1 %v2020_v47, %s6173_s18  ;;  %5839 = vrsqrt.f32 %v1044_v6  ;;  %v1104_v58 = vmul.f32 %v5832_v51, %v1008_v44  ;;  %v9587_v6 = vrot.slane %v6680_v25, 1 }
 0x19f   : > { %v821_v24 = vpop.xlane.xlu0 %820  ;;  %v1901_v17 = vsel %vm1872_vm1, %v9585_v18, %v1843_v61  ;;  %v6705_v28 = vadd.f32 %v6581_v30, %v1135_v22  ;;  %v5834_v62 = vpop.eup %5833  ;;  %v915_v61 = vmul.f32 %v6708_v11, %v6708_v11  ;;  %v6715_v22 = vmul.f32 0.03125, %v669_v36 }
 0x1a0   : > { %v885_v0 = vmul.f32 0.03125, %v821_v24  ;;  %v2034_v41 = vpack.c.bf16 %v1900_v46, %v1901_v17  ;;  %v1102_v55 = vmul.f32 %v5834_v62, %v1006_v20  ;;  %v1042_v56 = vadd.f32 1e-05, %v978_v59 }
 0x1a1   : > { %9586 = vst [vmem:[#allocation12_spill] sm:$0xff] %v6705_v28  ;;  %v663_v54 = vpop.xlane.xlu1 %662  ;;  %v2019_v47 = vpack.c.bf16 %v6705_v28, %v6667_v21  ;;  %v1845_v33 = vrot.slane %v6705_v28, 1  ;;  %v1009_v36 = vsub.f32 %v6358_v7, %v6628_v8  ;;  %v920_v51 = vmul.f32 %v6715_v22, %v6715_v22 }
 0x1a2   : > { %v949_v18 = vsub.f32 %v885_v0, %v917_v52  ;;  %5841 = vrsqrt.f32 %v1042_v56  ;;  %2115 = vrot.lane.b32.xlu1 %v2034_v41, %s6174_s24  ;;  %v1138_v59 = vmul.f32 %v6572_v3, %v1102_v55  ;;  %v1284_v41 = vand.u32 63, %v1206_v31 }
 0x1a3   : > { %2069 = vrot.lane.b32.xlu0 %v2019_v47, %s6173_s18  ;;  %v815_v32 = vpop.xlane.xlu0 %814  ;;  %v1898_v46 = vsel %vm1872_vm1, %v1845_v33, %v9587_v6  ;;  %v1899_v20 = vsel %vm1872_vm1, %v1844_v50, %v1845_v33  ;;  %v6733_v55 = vmul.f32 0.03125, %v663_v54  ;;  %v1140_v8 = vmul.f32 %v6572_v3, %v1104_v58 }
 0x1a4   : > { %v981_v44 = vmax.f32 %v949_v18, 0.0  ;;  %v883_v52 = vmul.f32 0.03125, %v815_v32  ;;  %v2035_v62 = vpack.c.bf16 %v1898_v46, %v1899_v20  ;;  %v6731_v0 = vadd.f32 %v6581_v30, %v1138_v59 }
 0x1a5   : > { %v5836_v24 = vpop.eup %5835  ;;  %v830_v17 = vpop.xlane.xlu1 %829  ;;  %v1847_v46 = vrot.slane %v6683_v42, 1  ;;  %v1007_v31 = vsub.f32 %v6365_v12, %v6649_v53  ;;  %v918_v54 = vmul.f32 %v6733_v55, %v6733_v55  ;;  %vm6744_vm2 = vcmp.eq.s32.totalorder %v1284_v41, 63 }
 0x1a6   : > { %9588 = vst [vmem:[#allocation13_spill] sm:$0xff] %v6731_v0  ;;  %v1045_v56 = vadd.f32 1e-05, %v981_v44  ;;  %v947_v47 = vsub.f32 %v883_v52, %v915_v61  ;;  %v888_v33 = vmul.f32 0.03125, %v830_v17  ;;  %v1105_v50 = vmul.f32 %v5836_v24, %v1009_v36 }
 0x1a7   : > { %2117 = vrot.lane.b32.xlu0 %v2035_v62, %s6174_s24  ;;  %v672_v7 = vpop.xlane.xlu0 %671  ;;  %v1848_v18 = vrot.slane %v6731_v0, 1  ;;  %v6751_v17 = vadd.f32 %v6581_v30, %v1140_v8  ;;  %v1012_v8 = vsub.f32 %v6370_v14, %v6655_v38 }
 0x1a8   : > { %5843 = vrsqrt.f32 %v1045_v56  ;;  %v979_v32 = vmax.f32 %v947_v47, 0.0  ;;  %v952_v6 = vsub.f32 %v888_v33, %v920_v51  ;;  %v1141_v59 = vmul.f32 %v6572_v3, %v1105_v50 }
 0x1a9   : > { %v5838_v20 = vpop.eup %5837  ;;  %v824_v61 = vpop.xlane.xlu1 %823  ;;  %v1896_v51 = vsel %vm1872_vm1, %v1847_v46, %v1848_v18  ;;  %9591 = vst [vmem:[#allocation14_spill] sm:$0xff] %v6751_v17  ;;  %v6756_v62 = vmul.f32 0.03125, %v672_v7  ;;  %v1850_v14 = vrot.slane %v6751_v17, 1 }
 0x1aa   : > { %v1043_v36 = vadd.f32 1e-05, %v979_v32  ;;  %v984_v44 = vmax.f32 %v952_v6, 0.0  ;;  %v886_v52 = vmul.f32 0.03125, %v824_v61  ;;  %v6754_v12 = vadd.f32 %v6581_v30, %v1141_v59 }
 0x1ab   : > { %v666_v24 = vpop.xlane.xlu0 %665  ;;  %v1103_v53 = vmul.f32 %v5838_v20, %v1007_v31  ;;  %v5840_v56 = vpop.eup %5839  ;;  %v1976_v50 = vsel %vm6744_vm2, 0.0, %v1896_v51  ;;  %v1010_v6 = vsub.f32 %v6378_v23, %v6669_v9  ;;  %v921_v7 = vmul.f32 %v6756_v62, %v6756_v62 }
 0x1ac   : > { %9592 = vst [vmem:[#allocation15_spill] sm:$0xff] %v6754_v12  ;;  %5845 = vrsqrt.f32 %v1043_v36  ;;  %v950_v41 = vsub.f32 %v886_v52, %v918_v54  ;;  %v2022_v33 = vpack.c.bf16 %v6754_v12, %v6751_v17  ;;  %v1048_v20 = vadd.f32 1e-05, %v984_v44 }
 0x1ad   : > { %v681_v47 = vpop.xlane.xlu1 %680  ;;  %v1139_v32 = vmul.f32 %v6572_v3, %v1103_v53  ;;  %v9593_v61 = vrot.slane %v6680_v25, 1  ;;  %v6778_v23 = vmul.f32 0.03125, %v666_v24  ;;  %v1108_v58 = vmul.f32 %v5840_v56, %v1012_v8 }
 0x1ae   : > { %v982_v31 = vmax.f32 %v950_v41, 0.0  ;;  %2075 = vrot.lane.b32.xlu1 %v2022_v33, %s6173_s18  ;;  %5847 = vrsqrt.f32 %v1048_v20  ;;  %vm4689_vm2 = vcmask 1045509  }
 0x1af   : > { %v833_v54 = vpop.xlane.xlu0 %832  ;;  %v1897_v59 = vsel %vm1872_vm1, %v9593_v61, %v1847_v46  ;;  %v6775_v36 = vadd.f32 %v6581_v30, %v1139_v32  ;;  %v5842_v38 = vpop.eup %5841  ;;  %v919_v46 = vmul.f32 %v6778_v23, %v6778_v23  ;;  %v6785_v32 = vmul.f32 0.03125, %v681_v47 }
 0x1b0   : > { %v889_v9 = vmul.f32 0.03125, %v833_v54  ;;  %v2036_v44 = vpack.c.bf16 %v1976_v50, %v1897_v59  ;;  %v1106_v51 = vmul.f32 %v5842_v38, %v1010_v6  ;;  %v1046_v52 = vadd.f32 1e-05, %v982_v31 }
 0x1b1   : > { %9594 = vst [vmem:[#allocation16_spill] sm:$0xff] %v6775_v36  ;;  %v675_v53 = vpop.xlane.xlu1 %674  ;;  %v2021_v41 = vpack.c.bf16 %v6775_v36, %v6731_v0  ;;  %v1849_v33 = vrot.slane %v6775_v36, 1  ;;  %v1013_v47 = vsub.f32 %v6390_v35, %v6685_v26  ;;  %v924_v6 = vmul.f32 %v6785_v32, %v6785_v32 }
 0x1b2   : > { %v953_v61 = vsub.f32 %v889_v9, %v921_v7  ;;  %5849 = vrsqrt.f32 %v1046_v52  ;;  %2119 = vrot.lane.b32.xlu1 %v2036_v44, %s6174_s24  ;;  %v1142_v8 = vmul.f32 %v6572_v3, %v1106_v51  ;;  %v1144_v26 = vmul.f32 %v6572_v3, %v1108_v58 }
 0x1b3   : > { %2073 = vrot.lane.b32.xlu0 %v2021_v41, %s6173_s18  ;;  %v827_v24 = vpop.xlane.xlu0 %826  ;;  %v1894_v56 = vsel %vm1872_vm1, %v1849_v33, %v1850_v14  ;;  %v1895_v50 = vsel %vm1872_vm1, %v1848_v18, %v1849_v33  ;;  %v6803_v41 = vmul.f32 0.03125, %v675_v53 }
 0x1b4   : > { %v985_v20 = vmax.f32 %v953_v61, 0.0  ;;  %v887_v7 = vmul.f32 0.03125, %v827_v24  ;;  %v2037_v59 = vpack.c.bf16 %v1894_v56, %v1895_v50  ;;  %v6801_v38 = vadd.f32 %v6581_v30, %v1142_v8 }
 0x1b5   : > { %v5844_v31 = vpop.eup %5843  ;;  %v842_v54 = vpop.xlane.xlu1 %841  ;;  %v1011_v24 = vsub.f32 %v6397_v40, %v6708_v11  ;;  %v922_v56 = vmul.f32 %v6803_v41, %v6803_v41 }
 0x1b6   : > { %9595 = vst [vmem:[#allocation17_spill] sm:$0xff] %v6801_v38  ;;  %v1049_v9 = vadd.f32 1e-05, %v985_v20  ;;  %v951_v44 = vsub.f32 %v887_v7, %v919_v46  ;;  %v892_v52 = vmul.f32 0.03125, %v842_v54  ;;  %v1109_v18 = vmul.f32 %v5844_v31, %v1013_v47 }
 0x1b7   : > { %2121 = vrot.lane.b32.xlu0 %v2037_v59, %s6174_s24  ;;  %v684_v35 = vpop.xlane.xlu0 %683  ;;  %v1852_v53 = vrot.slane %v6801_v38, 1  ;;  %v1851_v20 = vrot.slane %v6754_v12, 1 }
 0x1b8   : > { %5851 = vrsqrt.f32 %v1049_v9  ;;  %v983_v51 = vmax.f32 %v951_v44, 0.0  ;;  %v956_v33 = vsub.f32 %v892_v52, %v924_v6  ;;  %v1145_v50 = vmul.f32 %v6572_v3, %v1109_v18 }
 0x1b9   : > { %v5846_v61 = vpop.eup %5845  ;;  %v836_v46 = vpop.xlane.xlu1 %835  ;;  %v6815_v6 = vadd.f32 %v6581_v30, %v1144_v26  ;;  %v6820_v54 = vmul.f32 0.03125, %v684_v35  ;;  %v1892_v52 = vsel %vm1872_vm1, %v1851_v20, %v1852_v53  ;;  %v1016_v26 = vsub.f32 %v6402_v43, %v6715_v22 }
 0x1ba   : > { %v1047_v8 = vadd.f32 1e-05, %v983_v51  ;;  %v988_v47 = vmax.f32 %v956_v33, 0.0  ;;  %v890_v58 = vmul.f32 0.03125, %v836_v46  ;;  %v6818_v31 = vadd.f32 %v6581_v30, %v1145_v50 }
 0x1bb   : > { %v678_v7 = vpop.xlane.xlu0 %677  ;;  %9596 = vst [vmem:[#allocation18_spill] sm:$0xff] %v6815_v6  ;;  %v1107_v40 = vmul.f32 %v5846_v61, %v1011_v24  ;;  %v1014_v51 = vsub.f32 %v6410_v49, %v6733_v55  ;;  %v925_v35 = vmul.f32 %v6820_v54, %v6820_v54  ;;  %v1214_v33 = vadd.s32 120, %v6268_v19  ;;  %v5848_v61 = vpop.eup %5847 }
 0x1bc   : > { %9597 = vst [vmem:[#allocation19_spill] sm:$0xff] %v6818_v31  ;;  %5853 = vrsqrt.f32 %v1047_v8  ;;  %v1052_v11 = vadd.f32 1e-05, %v988_v47  ;;  %v954_v59 = vsub.f32 %v890_v58, %v922_v56  ;;  %v2024_v44 = vpack.c.bf16 %v6818_v31, %v6815_v6 }
 0x1bd   : > { %v693_v9 = vpop.xlane.xlu1 %692  ;;  %v1143_v18 = vmul.f32 %v6572_v3, %v1107_v40  ;;  %v1893_v46 = vsel %vm1872_vm1, %v1850_v14, %v1851_v20  ;;  %v6843_v55 = vmul.f32 0.03125, %v678_v7  ;;  %v1112_v49 = vmul.f32 %v5848_v61, %v1016_v26 }
 0x1be   : > { %v986_v24 = vmax.f32 %v954_v59, 0.0  ;;  %2079 = vrot.lane.b32.xlu1 %v2024_v44, %s6173_s18  ;;  %5855 = vrsqrt.f32 %v1052_v11  ;;  %v2038_v8 = vpack.c.bf16 %v1892_v52, %v1893_v46  ;;  %v6850_v20 = vmul.f32 0.03125, %v693_v9 }
 0x1bf   : > { %v845_v56 = vpop.xlane.xlu0 %844  ;;  %v6840_v43 = vadd.f32 %v6581_v30, %v1143_v18  ;;  %v5850_v22 = vpop.eup %5849  ;;  %v923_v14 = vmul.f32 %v6843_v55, %v6843_v55  ;;  %v9599_v11 = vrot.slane %v6815_v6, 1  ;;  %v1017_v9 = vsub.f32 %v6422_v60, %v6756_v62 }
 0x1c0   : > { %v893_v50 = vmul.f32 0.03125, %v845_v56  ;;  %v1110_v47 = vmul.f32 %v5850_v22, %v1014_v51  ;;  %v1050_v58 = vadd.f32 1e-05, %v986_v24  ;;  %v928_v26 = vmul.f32 %v6850_v20, %v6850_v20 }
 0x1c1   : > { %9598 = vst [vmem:[#allocation20_spill] sm:$0xff] %v6840_v43  ;;  %v687_v40 = vpop.xlane.xlu1 %686  ;;  %v2023_v59 = vpack.c.bf16 %v6840_v43, %v6801_v38  ;;  %v1853_v44 = vrot.slane %v6840_v43, 1  ;;  %v1148_v62 = vmul.f32 %v6572_v3, %v1112_v49 }
 0x1c2   : > { %v957_v18 = vsub.f32 %v893_v50, %v925_v35  ;;  %5857 = vrsqrt.f32 %v1050_v58  ;;  %2123 = vrot.lane.b32.xlu1 %v2038_v8, %s6174_s24  ;;  %v1146_v24 = vmul.f32 %v6572_v3, %v1110_v47  ;;  %v1340_v8 = vand.u32 63, %v1214_v33 }
 0x1c3   : > { %2077 = vrot.lane.b32.xlu0 %v2023_v59, %s6173_s18  ;;  %v839_v7 = vpop.xlane.xlu0 %838  ;;  %v1890_v52 = vsel %vm1872_vm1, %v1853_v44, %v9599_v11  ;;  %v1891_v51 = vsel %vm1872_vm1, %v1852_v53, %v1853_v44  ;;  %v6868_v47 = vmul.f32 0.03125, %v687_v40  ;;  %v1015_v33 = vsub.f32 %v6429_v2, %v6778_v23 }
 0x1c4   : > { %v989_v35 = vmax.f32 %v957_v18, 0.0  ;;  %v891_v61 = vmul.f32 0.03125, %v839_v7  ;;  %v2039_v22 = vpack.c.bf16 %v1890_v52, %v1891_v51  ;;  %v6866_v50 = vadd.f32 %v6581_v30, %v1146_v24 }
 0x1c5   : > { %v5852_v56 = vpop.eup %5851  ;;  %v854_v46 = vpop.xlane.xlu1 %853  ;;  %v1855_v52 = vrot.slane %v6818_v31, 1  ;;  %v926_v40 = vmul.f32 %v6868_v47, %v6868_v47  ;;  %vm6879_vm3 = vcmp.eq.s32.totalorder %v1340_v8, 63 }
 0x1c6   : > { %9600 = vst [vmem:[#allocation21_spill] sm:$0xff] %v6866_v50  ;;  %v1053_v58 = vadd.f32 1e-05, %v989_v35  ;;  %v955_v59 = vsub.f32 %v891_v61, %v923_v14  ;;  %v896_v53 = vmul.f32 0.03125, %v854_v46  ;;  %v1113_v44 = vmul.f32 %v5852_v56, %v1017_v9 }
 0x1c7   : > { %2125 = vrot.lane.b32.xlu0 %v2039_v22, %s6174_s24  ;;  %v696_v60 = vpop.xlane.xlu0 %695  ;;  %v1856_v18 = vrot.slane %v6866_v50, 1  ;;  %v6886_v46 = vadd.f32 %v6581_v30, %v1148_v62 }
 0x1c8   : > { %5859 = vrsqrt.f32 %v1053_v58  ;;  %v987_v7 = vmax.f32 %v955_v59, 0.0  ;;  %v960_v11 = vsub.f32 %v896_v53, %v928_v26  ;;  %v1149_v24 = vmul.f32 %v6572_v3, %v1113_v44 }
 0x1c9   : > { %v5854_v51 = vpop.eup %5853  ;;  %v848_v14 = vpop.xlane.xlu1 %847  ;;  %v1888_v26 = vsel %vm1872_vm1, %v1855_v52, %v1856_v18  ;;  %9603 = vst [vmem:[#allocation22_spill] sm:$0xff] %v6886_v46  ;;  %v6891_v58 = vmul.f32 0.03125, %v696_v60 }
 0x1ca   : > { %v1051_v9 = vadd.f32 1e-05, %v987_v7  ;;  %v992_v35 = vmax.f32 %v960_v11, 0.0  ;;  %v894_v61 = vmul.f32 0.03125, %v848_v14  ;;  %v6889_v2 = vadd.f32 %v6581_v30, %v1149_v24 }
 0x1cb   : > { %v690_v56 = vpop.xlane.xlu0 %689  ;;  %v1111_v23 = vmul.f32 %v5854_v51, %v1015_v33  ;;  %v5856_v8 = vpop.eup %5855  ;;  %v1984_v7 = vsel %vm6879_vm3, 0.0, %v1888_v26  ;;  %v1020_v11 = vsub.f32 %v6434_v4, %v6785_v32  ;;  %v1018_v51 = vsub.f32 %v6442_v10, %v6803_v41 }
 0x1cc   : > { %9604 = vst [vmem:[#allocation23_spill] sm:$0xff] %v6889_v2  ;;  %5861 = vrsqrt.f32 %v1051_v9  ;;  %v1056_v22 = vadd.f32 1e-05, %v992_v35  ;;  %v958_v59 = vsub.f32 %v894_v61, %v926_v40  ;;  %v2026_v44 = vpack.c.bf16 %v6889_v2, %v6886_v46 }
 0x1cd   : > { %v705_v53 = vpop.xlane.xlu1 %704  ;;  %v1147_v62 = vmul.f32 %v6572_v3, %v1111_v23  ;;  %v929_v60 = vmul.f32 %v6891_v58, %v6891_v58  ;;  %v9605_v33 = vrot.slane %v6815_v6, 1  ;;  %v6908_v24 = vmul.f32 0.03125, %v690_v56 }
 0x1ce   : > { %v990_v14 = vmax.f32 %v958_v59, 0.0  ;;  %2083 = vrot.lane.b32.xlu1 %v2026_v44, %s6173_s18  ;;  %v9442_v4 = vrot.slane %v6886_v46, 1  ;;  %5863 = vrsqrt.f32 %v1056_v22  ;;  %v1116_v49 = vmul.f32 %v5856_v8, %v1020_v11 }
 0x1cf   : > { %v1889_v40 = vsel %vm1872_vm1, %v9605_v33, %v1855_v52  ;;  %v857_v9 = vpop.xlane.xlu0 %856  ;;  %v6912_v35 = vadd.f32 %v6581_v30, %v1147_v62  ;;  %v5858_v10 = vpop.eup %5857  ;;  %v927_v59 = vmul.f32 %v6908_v24, %v6908_v24  ;;  %v6920_v44 = vmul.f32 0.03125, %v705_v53 }
 0x1d0   : > { %v897_v32 = vmul.f32 0.03125, %v857_v9  ;;  %v2040_v41 = vpack.c.bf16 %v1984_v7, %v1889_v40  ;;  %v1114_v26 = vmul.f32 %v5858_v10, %v1018_v51  ;;  %v1054_v61 = vadd.f32 1e-05, %v990_v14 }
 0x1d1   : > { %9606 = vst [vmem:[#allocation24_spill] sm:$0xff] %v6912_v35  ;;  %v699_v23 = vpop.xlane.xlu1 %698  ;;  %v2025_v52 = vpack.c.bf16 %v6912_v35, %v6866_v50  ;;  %v1857_v56 = vrot.slane %v6912_v35, 1  ;;  %v1021_v11 = vsub.f32 %v6454_v27, %v6820_v54  ;;  %v932_v9 = vmul.f32 %v6920_v44, %v6920_v44 }
 0x1d2   : > { %v961_v62 = vsub.f32 %v897_v32, %v929_v60  ;;  %v6922_v33 = vmul.f32 0.03125, %v699_v23  ;;  %5865 = vrsqrt.f32 %v1054_v61  ;;  %2127 = vrot.lane.b32.xlu1 %v2040_v41, %s6174_s24  ;;  %v1150_v53 = vmul.f32 %v6572_v3, %v1114_v26 }
 0x1d3   : > { %2081 = vrot.lane.b32.xlu0 %v2025_v52, %s6173_s18  ;;  %v851_v22 = vpop.xlane.xlu0 %850  ;;  %v1886_v8 = vsel %vm1872_vm1, %v1857_v56, %v9442_v4  ;;  %v1887_v7 = vsel %vm1872_vm1, %v1856_v18, %v1857_v56  ;;  %v1152_v41 = vmul.f32 %v6572_v3, %v1116_v49  ;;  %v1019_v49 = vsub.f32 %v6461_v34, %v6843_v55 }
 0x1d4   : > { %v993_v51 = vmax.f32 %v961_v62, 0.0  ;;  %v930_v60 = vmul.f32 %v6922_v33, %v6922_v33  ;;  %v895_v40 = vmul.f32 0.03125, %v851_v22  ;;  %v2041_v32 = vpack.c.bf16 %v1886_v8, %v1887_v7 }
 0x1d5   : > { %v5860_v14 = vpop.eup %5859  ;;  %v860_v10 = vpop.xlane.xlu1 %859  ;;  %v6941_v18 = vadd.f32 %v6581_v30, %v1150_v53  ;;  %vm4691_vm3 = vcmask 1046534  }
 0x1d6   : > { %v1057_v26 = vadd.f32 1e-05, %v993_v51  ;;  %v959_v61 = vsub.f32 %v895_v40, %v927_v59  ;;  %v898_v23 = vmul.f32 0.03125, %v860_v10  ;;  %v1117_v27 = vmul.f32 %v5860_v14, %v1021_v11 }
 0x1d7   : > { %9607 = vst [vmem:[#allocation25_spill] sm:$0xff] %v6941_v18  ;;  %2129 = vrot.lane.b32.xlu0 %v2041_v32, %s6174_s24  ;;  %v866_v54 = vpop.xlane.xlu0 %865  ;;  %v1860_v52 = vrot.slane %v6941_v18, 1  ;;  %v1859_v59 = vrot.slane %v6889_v2, 1  ;;  %v6950_v40 = vadd.f32 %v6581_v30, %v1152_v41 }
 0x1d8   : > { %5867 = vrsqrt.f32 %v1057_v26  ;;  %v991_v56 = vmax.f32 %v959_v61, 0.0  ;;  %v962_v62 = vsub.f32 %v898_v23, %v930_v60  ;;  %v900_v22 = vmul.f32 0.03125, %v866_v54 }
 0x1d9   : > { %v5862_v4 = vpop.eup %5861  ;;  %v869_v8 = vpop.xlane.xlu1 %868  ;;  %v1153_v7 = vmul.f32 %v6572_v3, %v1117_v27  ;;  %9608 = vst [vmem:[#allocation26_spill] sm:$0xff] %v6950_v40  ;;  %v1884_v32 = vsel %vm1872_vm1, %v1859_v59, %v1860_v52 }
 0x1da   : > { %v1055_v53 = vadd.f32 1e-05, %v991_v56  ;;  %v994_v11 = vmax.f32 %v962_v62, 0.0  ;;  %v964_v51 = vsub.f32 %v900_v22, %v932_v9  ;;  %v901_v10 = vmul.f32 0.03125, %v869_v8 }
 0x1db   : > { %v708_v14 = vpop.xlane.xlu0 %707  ;;  %v6953_v60 = vadd.f32 %v6581_v30, %v1153_v7  ;;  %v1115_v34 = vmul.f32 %v5862_v4, %v1019_v49  ;;  %v5864_v23 = vpop.eup %5863  ;;  %v1024_v9 = vsub.f32 %v6466_v37, %v6850_v20  ;;  %v1222_v56 = vadd.s32 184, %v6268_v19 }
 0x1dc   : > { %5869 = vrsqrt.f32 %v1055_v53  ;;  %v1058_v55 = vadd.f32 1e-05, %v994_v11  ;;  %v996_v26 = vmax.f32 %v964_v51, 0.0  ;;  %v6957_v61 = vmul.f32 0.03125, %v708_v14 }
 0x1dd   : > { %9609 = vst [vmem:[#allocation27_spill] sm:$0xff] %v6953_v60  ;;  %v2028_v41 = vpack.c.bf16 %v6953_v60, %v6950_v40  ;;  %v863_v27 = vpop.xlane.xlu1 %862  ;;  %v1151_v54 = vmul.f32 %v6572_v3, %v1115_v34  ;;  %v9610_v22 = vrot.slane %v6886_v46, 1  ;;  %v1022_v37 = vsub.f32 %v6474_v45, %v6868_v47 }
 0x1de   : > { %5871 = vrsqrt.f32 %v1058_v55  ;;  %v1060_v62 = vadd.f32 1e-05, %v996_v26  ;;  %v933_v4 = vmul.f32 %v6957_v61, %v6957_v61  ;;  %v1862_v53 = vrot.slane %v6950_v40, 1 }
 0x1df   : > { %v1885_v49 = vsel %vm1872_vm1, %v9610_v22, %v1859_v59  ;;  %2087 = vrot.lane.b32.xlu1 %v2028_v41, %s6173_s18  ;;  %v702_v20 = vpop.xlane.xlu0 %701  ;;  %v6975_v7 = vadd.f32 %v6581_v30, %v1151_v54  ;;  %v5866_v11 = vpop.eup %5865  ;;  %v899_v34 = vmul.f32 0.03125, %v863_v27  ;;  %v1120_v47 = vmul.f32 %v5864_v23, %v1024_v9 }
 0x1e0   : > { %v2042_v8 = vpack.c.bf16 %v1884_v32, %v1885_v49  ;;  %5873 = vrsqrt.f32 %v1060_v62  ;;  %v965_v51 = vsub.f32 %v901_v10, %v933_v4  ;;  %v6978_v14 = vmul.f32 0.03125, %v702_v20 }
 0x1e1   : > { %9611 = vst [vmem:[#allocation28_spill] sm:$0xff] %v6975_v7  ;;  %v1118_v55 = vmul.f32 %v5866_v11, %v1022_v37  ;;  %v2027_v59 = vpack.c.bf16 %v6975_v7, %v6941_v18  ;;  %v1861_v45 = vrot.slane %v6975_v7, 1  ;;  %v1025_v54 = vsub.f32 %v6486_v57, %v6891_v58 }
 0x1e2   : > { %v997_v26 = vmax.f32 %v965_v51, 0.0  ;;  %v931_v32 = vmul.f32 %v6978_v14, %v6978_v14  ;;  %v1156_v22 = vmul.f32 %v6572_v3, %v1120_v47  ;;  %v1396_v37 = vand.u32 63, %v1222_v56 }
 0x1e3   : > { %2131 = vrot.lane.b32.xlu1 %v2042_v8, %s6174_s24  ;;  %2085 = vrot.lane.b32.xlu0 %v2027_v59, %s6173_s18  ;;  %v1882_v10 = vsel %vm1872_vm1, %v1861_v45, %v1862_v53  ;;  %v1883_v41 = vsel %vm1872_vm1, %v1860_v52, %v1861_v45  ;;  %v1154_v27 = vmul.f32 %v6572_v3, %v1118_v55  ;;  %v1863_v51 = vrot.slane %v6953_v60, 1 }
 0x1e4   : > { %v1061_v23 = vadd.f32 1e-05, %v997_v26  ;;  %v963_v9 = vsub.f32 %v899_v34, %v931_v32  ;;  %v2043_v62 = vpack.c.bf16 %v1882_v10, %v1883_v41  ;;  %v1023_v57 = vsub.f32 %v6493_v1, %v6908_v24 }
 0x1e5   : > { %v5868_v4 = vpop.eup %5867  ;;  %v6996_v49 = vadd.f32 %v6581_v30, %v1154_v27  ;;  %v1026_v55 = vsub.f32 %v6506_v13, %v6922_v33  ;;  %v7007_v56 = vadd.f32 %v6581_v30, %v1156_v22  ;;  %vm7009_vm4 = vcmp.eq.s32.totalorder %v1396_v37, 63 }
 0x1e6   : > { %5875 = vrsqrt.f32 %v1061_v23  ;;  %v995_v20 = vmax.f32 %v963_v9, 0.0  ;;  %v1121_v8 = vmul.f32 %v5868_v4, %v1025_v54  ;;  %v1028_v41 = vsub.f32 %v6498_v5, %v6920_v44 }
 0x1e7   : > { %9612 = vst [vmem:[#allocation29_spill] sm:$0xff] %v6996_v49  ;;  %2133 = vrot.lane.b32.xlu0 %v2043_v62, %s6174_s24  ;;  %v1864_v52 = vrot.slane %v6996_v49, 1  ;;  %9613 = vst [vmem:[#allocation30_spill] sm:$0xff] %v7007_v56  ;;  %v1881_v54 = vsel %vm1872_vm1, %v1862_v53, %v1863_v51  ;;  %v1866_v23 = vrot.slane %v7007_v56, 1  ;;  %v1029_v5 = vsub.f32 %v6518_v29, %v6957_v61 }
 0x1e8   : > { %v1059_v58 = vadd.f32 1e-05, %v995_v20  ;;  %v1157_v11 = vmul.f32 %v6572_v3, %v1121_v8  ;;  %v1027_v61 = vsub.f32 %v6525_v39, %v6978_v14  ;;  %v1647_v39 = vrot.slane %v6619_v48, 7 }
 0x1e9   : > { %v5870_v34 = vpop.eup %5869  ;;  %v1880_v1 = vsel %vm1872_vm1, %v1863_v51, %v1864_v52 }
 0x1ea   : > { %5877 = vrsqrt.f32 %v1059_v58  ;;  %v7014_v45 = vadd.f32 %v6581_v30, %v1157_v11  ;;  %v1119_v24 = vmul.f32 %v5870_v34, %v1023_v57  ;;  %v1992_v10 = vsel %vm7009_vm4, 0.0, %v1880_v1 }
 0x1eb   : > { %v5872_v47 = vpop.eup %5871  ;;  %v2044_v62 = vpack.c.bf16 %v1992_v10, %v1881_v54  ;;  %v1230_v58 = vadd.s32 248, %v6268_v19  ;;  %v1651_v54 = vrot.slane %v6667_v21, 7  ;;  %vm4693_vm4 = vcmask 1047559  }
 0x1ec   : > { %9616 = vst [vmem:[#allocation31_spill] sm:$0xff] %v7014_v45  ;;  %v1122_v26 = vmul.f32 %v5872_v47, %v1026_v55  ;;  %v2030_v13 = vpack.c.bf16 %v7014_v45, %v7007_v56  ;;  %v1155_v33 = vmul.f32 %v6572_v3, %v1119_v24  ;;  %v1235_v55 = vand.u32 63, %v6268_v19 }
 0x1ed   : > { %v5874_v32 = vpop.eup %5873  ;;  %v1452_v59 = vand.u32 63, %v1230_v58 }
 0x1ee   : > { %2091 = vrot.lane.b32.xlu1 %v2030_v13, %s6173_s18  ;;  %v7027_v27 = vadd.f32 %v6581_v30, %v1155_v33  ;;  %v1158_v9 = vmul.f32 %v6572_v3, %v1122_v26  ;;  %v1124_v37 = vmul.f32 %v5874_v32, %v1028_v41  ;;  %v1867_v26 = vrot.slane %v7014_v45, 1 }
 0x1ef   : > { %vm7071_vm6 = vcmp.eq.s32.totalorder %v1235_v55, 0  ;;  %vm7075_vm7 = vcmp.eq.s32.totalorder %v1452_v59, 63 }
 0x1f0   : > { %9617 = vst [vmem:[#allocation32_spill] sm:$0xff] %v7027_v27  ;;  %v2029_v4 = vpack.c.bf16 %v7027_v27, %v6996_v49  ;;  %v1865_v22 = vrot.slane %v7027_v27, 1  ;;  %v7045_v57 = vadd.f32 %v6581_v30, %v1158_v9  ;;  %v1160_v29 = vmul.f32 %v6572_v3, %v1124_v37 }
 0x1f1   : > { %v1648_v9 = vrot.slane %v6623_v63, 7  ;;  %v1877_v37 = vsel %vm1872_vm1, %v1866_v23, %v1867_v26 }
 0x1f2   : > { %2135 = vrot.lane.b32.xlu1 %v2044_v62, %s6174_s24  ;;  %2089 = vrot.lane.b32.xlu0 %v2029_v4, %s6173_s18  ;;  %v1878_v44 = vsel %vm1872_vm1, %v1865_v22, %v1866_v23  ;;  %v1879_v53 = vsel %vm1872_vm1, %v1864_v52, %v1865_v22  ;;  %9618 = vst [vmem:[#allocation33_spill] sm:$0xff] %v7045_v57  ;;  %v1868_v52 = vrot.slane %v7045_v57, 1  ;;  %v9626_v4 = vrot.slane %v6619_v48, 1 }
 0x1f3   : > { %v5876_v20 = vpop.eup %5875  ;;  %v2045_v8 = vpack.c.bf16 %v1878_v44, %v1879_v53  ;;  %v7056_v1 = vadd.f32 %v6581_v30, %v1160_v29  ;;  %v1710_v23 = vsel %vm1679_vm5, %v1647_v39, %v1648_v9 }
 0x1f4   : > { %v1125_v11 = vmul.f32 %v5876_v20, %v1029_v5  ;;  %v1876_v10 = vsel %vm1872_vm1, %v1867_v26, %v1868_v52 }
 0x1f5   : > { %9619 = vst [vmem:[#allocation34_spill] sm:$0xff] %v7056_v1  ;;  %v1870_v5 = vrot.slane %v7056_v1, 1  ;;  %v2046_v44 = vpack.c.bf16 %v1876_v10, %v1877_v37 }
 0x1f6   : > { %2137 = vrot.lane.b32.xlu0 %v2045_v8, %s6174_s24  ;;  %v1161_v51 = vmul.f32 %v6572_v3, %v1125_v11 }
 0x1f7   : > { %v5878_v34 = vpop.eup %5877 }
 0x1f8   : > { %v7059_v24 = vadd.f32 %v6581_v30, %v1161_v51  ;;  %v1123_v47 = vmul.f32 %v5878_v34, %v1027_v61 }
 0x1fa   : > { %9620 = vst [vmem:[#allocation35_spill] sm:$0xff] %v7059_v24  ;;  %v2032_v14 = vpack.c.bf16 %v7059_v24, %v7056_v1  ;;  %v1159_v13 = vmul.f32 %v6572_v3, %v1123_v47  ;;  %v1678_v33 = vrot.slane %v7059_v24, 7  ;;  %v1871_v32 = vrot.slane %v7059_v24, 1 }
 0x1fc   : > { %2095 = vrot.lane.b32.xlu1 %v2032_v14, %s6173_s18  ;;  %v7082_v3 = vadd.f32 %v6581_v30, %v1159_v13  ;;  %v1711_v62 = vsel %vm1679_vm5, %v1678_v33, %v1647_v39  ;;  %v1904_v22 = vsel %vm1872_vm1, %v1871_v32, %v9626_v4  ;;  %v1873_v20 = vsel %vm1872_vm1, %v1870_v5, %v1871_v32 }
 0x1fd   : > { %v1776_v53 = vsel %vm7071_vm6, 0.0, %v1711_v62  ;;  %v2000_v8 = vsel %vm7075_vm7, 0.0, %v1904_v22  ;;  %v2068_v11 = vpop.permute.xlu1 %2067  ;;  %v1649_v14 = vrot.slane %v6601_v15, 7  ;;  %v1652_v32 = vrot.slane %v6705_v28, 7 }
 0x1fe   : > { %9625 = vst [vmem:[#allocation36_spill] sm:$0xff] %v7082_v3  ;;  %v2031_v30 = vpack.c.bf16 %v7082_v3, %v7045_v57  ;;  %v1869_v58 = vrot.slane %v7082_v3, 1  ;;  %v2001_v29 = vpack.c.bf16 %v1710_v23, %v1776_v53  ;;  %v2048_v55 = vpack.c.bf16 %v2000_v8, %v1873_v20 }
 0x1ff   : > { %v1709_v13 = vsel %vm1679_vm5, %v1648_v9, %v1649_v14  ;;  %v1706_v4 = vsel %vm1679_vm5, %v1651_v54, %v1652_v32  ;;  %v1653_v23 = vrot.slane %v6680_v25, 7 }
 0x200   : > { %2139 = vrot.lane.b32.xlu1 %v2046_v44, %s6174_s24  ;;  %2093 = vrot.lane.b32.xlu0 %v2031_v30, %s6173_s18  ;;  %v1874_v61 = vsel %vm1872_vm1, %v1869_v58, %v1870_v5  ;;  %v1875_v51 = vsel %vm1872_vm1, %v1868_v52, %v1869_v58  ;;  %v2066_v34 = vpop.permute.xlu0 %2065  ;;  %v1650_v52 = vrot.slane %v6604_v16, 7  ;;  %v1207_v58 = vadd.s32 64, %v6268_v19 }
 0x201   : > { %v2047_v59 = vpack.c.bf16 %v1874_v61, %v1875_v51  ;;  %v2147_v47 = vsel %vm403_vm0, %v2001_v29, %v2066_v34  ;;  %v1655_v61 = vrot.slane %v6731_v0, 7  ;;  %v1705_v51 = vsel %vm1679_vm5, %v1652_v32, %v1653_v23 }
 0x202   : > { %v1708_v41 = vsel %vm1679_vm5, %v1649_v14, %v1650_v52  ;;  %v1707_v9 = vsel %vm1679_vm5, %v1650_v52, %v1651_v54  ;;  %v1291_v29 = vand.u32 63, %v1207_v58  ;;  %v1656_v34 = vrot.slane %v6775_v36, 7 }
 0x203   : > { %v2002_v62 = vpack.c.bf16 %v1708_v41, %v1709_v13  ;;  %v2003_v30 = vpack.c.bf16 %v1706_v4, %v1707_v9  ;;  %vm4687_vm1 = vcmask 1044484  }
 0x204   : > { %2143 = vrot.lane.b32.xlu1 %v2048_v55, %s6174_s24  ;;  %2141 = vrot.lane.b32.xlu0 %v2047_v59, %s6174_s24  ;;  %v2114_v26 = vpop.permute.xlu1 %2113  ;;  %vm1623_vm10 = vcmp.eq.s32.totalorder %v1291_v29, 0 }
 0x205   : > { %v2195_v39 = vsel %vm2193_vm8, %v2147_v47, %v2114_v26  ;;  %v2150_v22 = vsel %vm403_vm0, %v2002_v62, %v2068_v11  ;;  %v1654_v11 = vrot.slane %v6683_v42, 7 }
 0x206   : > { %5698 = vmatprep.mubr.msk.bf16.mxu1 %vm2278_vm9, %v2195_v39  ;;  %v1702_v39 = vsel %vm1679_vm5, %v1655_v61, %v1656_v34 }
 0x207   : > { %v1704_v59 = vsel %vm1679_vm5, %v1653_v23, %v1654_v11  ;;  %v1703_v26 = vsel %vm1679_vm5, %v1654_v11, %v1655_v61 }
 0x208   : > { %v2004_v47 = vpack.c.bf16 %v1704_v59, %v1705_v51  ;;  %v1784_v41 = vsel %vm1623_vm10, 0.0, %v1703_v26  ;;  %v1215_v26 = vadd.s32 128, %v6268_v19 }
 0x209   : > { %v2005_v54 = vpack.c.bf16 %v1702_v39, %v1784_v41  ;;  %v1662_v39 = vrot.slane %v6818_v31, 7 }
 0x210   : > { %v2072_v10 = vpop.permute.xlu1 %2071 }
 0x211   : > { %v2156_v14 = vsel %vm403_vm0, %v2004_v47, %v2072_v10 }
 0x214   : > { %v2116_v37 = vpop.permute.xlu1 %2115 }
 0x215   : > { %v2070_v5 = vpop.permute.xlu0 %2069  ;;  %v2197_v44 = vsel %vm2193_vm8, %v2150_v22, %v2116_v37  ;;  %v1657_v37 = vrot.slane %v6751_v17, 7 }
 0x216   : > { %5699 = vmatmul.mubr.msk.bf16.vlgmr.msra.gmra.mxu1 %vm2278_vm9, %v2197_v44  ;;  %v2153_v53 = vsel %vm403_vm0, %v2003_v30, %v2070_v5  ;;  %v1658_v5 = vrot.slane %v6754_v12, 7  ;;  %v1660_v44 = vrot.slane %v6840_v43, 7 }
 0x217   : > { %v1701_v10 = vsel %vm1679_vm5, %v1656_v34, %v1657_v37 }
 0x218   : > { %v1700_v30 = vsel %vm1679_vm5, %v1657_v37, %v1658_v5 }
 0x219   : > { %v2118_v20 = vpop.permute.xlu0 %2117 }
 0x21a   : > { %v2199_v8 = vsel %vm2193_vm8, %v2153_v53, %v2118_v20  ;;  %v1659_v53 = vrot.slane %v6801_v38, 7  ;;  %v2006_v20 = vpack.c.bf16 %v1700_v30, %v1701_v10 }
 0x21b   : > { %5702 = vmatprep.mubr.msk.bf16.mxu1 %vm2278_vm9, %v2199_v8 }
 0x21c   : > { %v1698_v8 = vsel %vm1679_vm5, %v1659_v53, %v1660_v44  ;;  %v1699_v61 = vsel %vm1679_vm5, %v1658_v5, %v1659_v53 }
 0x21d   : > { %v2007_v51 = vpack.c.bf16 %v1698_v8, %v1699_v61 }
 0x220   : > { %v2076_v55 = vpop.permute.xlu1 %2075 }
 0x221   : > { %v2162_v58 = vsel %vm403_vm0, %v2006_v20, %v2076_v55  ;;  %v1661_v55 = vrot.slane %v6815_v6, 7 }
 0x224   : > { %v2120_v52 = vpop.permute.xlu1 %2119 }
 0x225   : > { %v2074_v13 = vpop.permute.xlu0 %2073  ;;  %v2201_v32 = vsel %vm2193_vm8, %v2156_v14, %v2120_v52  ;;  %v1347_v14 = vand.u32 63, %v1215_v26  ;;  %v1663_v52 = vrot.slane %v6866_v50, 7 }
 0x226   : > { %5703 = vmatmul.mubr.msk.bf16.gmra.mxu1 %vm2278_vm9, %v2201_v32  ;;  %v2159_v62 = vsel %vm403_vm0, %v2005_v54, %v2074_v13  ;;  %v1697_v13 = vsel %vm1679_vm5, %v1660_v44, %v1661_v55  ;;  %v1664_v32 = vrot.slane %v6912_v35, 7  ;;  %v1696_v54 = vsel %vm1679_vm5, %v1661_v55, %v1662_v39 }
 0x227   : > { %vm1631_vm11 = vcmp.eq.s32.totalorder %v1347_v14, 0 }
 0x229   : > { %v2122_v4 = vpop.permute.xlu0 %2121 }
 0x22a   : > { %v2203_v22 = vsel %vm2193_vm8, %v2159_v62, %v2122_v4  ;;  %v2008_v62 = vpack.c.bf16 %v1696_v54, %v1697_v13  ;;  %v1695_v4 = vsel %vm1679_vm5, %v1662_v39, %v1663_v52 }
 0x22b   : > { %5706 = vmatprep.mubr.msk.bf16.mxu1 %vm2278_vm9, %v2203_v22  ;;  %v1694_v22 = vsel %vm1679_vm5, %v1663_v52, %v1664_v32  ;;  %v1792_v30 = vsel %vm1631_vm11, 0.0, %v1695_v4  ;;  %v1223_v4 = vadd.s32 192, %v6268_v19 }
 0x22c   : > { %v2009_v53 = vpack.c.bf16 %v1694_v22, %v1792_v30  ;;  %v1670_v22 = vrot.slane %v6953_v60, 7 }
 0x230   : > { %v2080_v9 = vpop.permute.xlu1 %2079 }
 0x231   : > { %v2168_v37 = vsel %vm403_vm0, %v2008_v62, %v2080_v9 }
 0x234   : > { %v2124_v23 = vpop.permute.xlu1 %2123 }
 0x235   : > { %v2078_v11 = vpop.permute.xlu0 %2077  ;;  %v2205_v29 = vsel %vm2193_vm8, %v2162_v58, %v2124_v23  ;;  %v1665_v23 = vrot.slane %v6886_v46, 7 }
 0x236   : > { %5707 = vmatmul.mubr.msk.bf16.gmra.mxu1 %vm2278_vm9, %v2205_v29  ;;  %v2165_v34 = vsel %vm403_vm0, %v2007_v51, %v2078_v11  ;;  %v1666_v11 = vrot.slane %v6889_v2, 7  ;;  %v1668_v29 = vrot.slane %v6975_v7, 7 }
 0x237   : > { %v1693_v9 = vsel %vm1679_vm5, %v1664_v32, %v1665_v23 }
 0x238   : > { %v1692_v51 = vsel %vm1679_vm5, %v1665_v23, %v1666_v11 }
 0x239   : > { %v2126_v59 = vpop.permute.xlu0 %2125 }
 0x23a   : > { %v2207_v47 = vsel %vm2193_vm8, %v2165_v34, %v2126_v59  ;;  %v1667_v34 = vrot.slane %v6941_v18, 7  ;;  %v2010_v59 = vpack.c.bf16 %v1692_v51, %v1693_v9 }
 0x23b   : > { %5710 = vmatprep.mubr.msk.bf16.mxu1 %vm2278_vm9, %v2207_v47 }
 0x23c   : > { %v1690_v47 = vsel %vm1679_vm5, %v1667_v34, %v1668_v29  ;;  %v1691_v52 = vsel %vm1679_vm5, %v1666_v11, %v1667_v34 }
 0x23d   : > { %v2011_v13 = vpack.c.bf16 %v1690_v47, %v1691_v52 }
 0x240   : > { %v2084_v41 = vpop.permute.xlu1 %2083 }
 0x241   : > { %v2174_v26 = vsel %vm403_vm0, %v2010_v59, %v2084_v41  ;;  %v1669_v41 = vrot.slane %v6950_v40, 7 }
 0x244   : > { %v2128_v5 = vpop.permute.xlu1 %2127 }
 0x245   : > { %v2082_v10 = vpop.permute.xlu0 %2081  ;;  %v2209_v44 = vsel %vm2193_vm8, %v2168_v37, %v2128_v5  ;;  %v1403_v37 = vand.u32 63, %v1223_v4  ;;  %v1671_v5 = vrot.slane %v6996_v49, 7 }
 0x246   : > { %5711 = vmatmul.mubr.msk.bf16.gmra.mxu1 %vm2278_vm9, %v2209_v44  ;;  %v2171_v20 = vsel %vm403_vm0, %v2009_v53, %v2082_v10  ;;  %v1689_v10 = vsel %vm1679_vm5, %v1668_v29, %v1669_v41  ;;  %v1672_v44 = vrot.slane %v7027_v27, 7  ;;  %v1688_v53 = vsel %vm1679_vm5, %v1669_v41, %v1670_v22 }
 0x247   : > { %vm1639_vm12 = vcmp.eq.s32.totalorder %v1403_v37, 0  ;;  %v1677_v37 = vrot.slane %v7056_v1, 7 }
 0x249   : > { %v2130_v8 = vpop.permute.xlu0 %2129 }
 0x24a   : > { %v2211_v58 = vsel %vm2193_vm8, %v2171_v20, %v2130_v8  ;;  %v2012_v20 = vpack.c.bf16 %v1688_v53, %v1689_v10  ;;  %v1687_v8 = vsel %vm1679_vm5, %v1670_v22, %v1671_v5 }
 0x24b   : > { %5714 = vmatprep.mubr.msk.bf16.mxu1 %vm2278_vm9, %v2211_v58  ;;  %v1686_v58 = vsel %vm1679_vm5, %v1671_v5, %v1672_v44  ;;  %v1800_v51 = vsel %vm1639_vm12, 0.0, %v1687_v8 }
 0x24c   : > { %v2013_v34 = vpack.c.bf16 %v1686_v58, %v1800_v51  ;;  %v9443_v51 = vsub.s32 3, %v6268_v19 }
 0x251   : > { %v2088_v61 = vpop.permute.xlu1 %2087 }
 0x252   : > { %v2180_v23 = vsel %vm403_vm0, %v2012_v20, %v2088_v61 }
 0x255   : > { %v2132_v55 = vpop.permute.xlu1 %2131  ;;  %v2086_v39 = vpop.permute.xlu0 %2085 }
 0x256   : > { %v2213_v14 = vsel %vm2193_vm8, %v2174_v26, %v2132_v55  ;;  %v2177_v32 = vsel %vm403_vm0, %v2011_v13, %v2086_v39  ;;  %v1673_v55 = vrot.slane %v7007_v56, 7  ;;  %v1674_v39 = vrot.slane %v7014_v45, 7 }
 0x257   : > { %5715 = vmatmul.mubr.msk.bf16.gmra.mxu1 %vm2278_vm9, %v2213_v14  ;;  %v1676_v14 = vrot.slane %v7082_v3, 7 }
 0x258   : > { %v1685_v61 = vsel %vm1679_vm5, %v1672_v44, %v1673_v55  ;;  %v1684_v13 = vsel %vm1679_vm5, %v1673_v55, %v1674_v39 }
 0x259   : > { %v2134_v54 = vpop.permute.xlu0 %2133  ;;  %v1681_v53 = vsel %vm1679_vm5, %v1676_v14, %v1677_v37 }
 0x25a   : > { %v2215_v62 = vsel %vm2193_vm8, %v2177_v32, %v2134_v54  ;;  %v1675_v32 = vrot.slane %v7045_v57, 7  ;;  %v2014_v54 = vpack.c.bf16 %v1684_v13, %v1685_v61 }
 0x25b   : > { %5718 = vmatprep.mubr.msk.bf16.mxu1 %vm2278_vm9, %v2215_v62 }
 0x25c   : > { %v1682_v62 = vsel %vm1679_vm5, %v1675_v32, %v1676_v14  ;;  %v1683_v10 = vsel %vm1679_vm5, %v1674_v39, %v1675_v32 }
 0x25d   : > { %v2015_v44 = vpack.c.bf16 %v1682_v62, %v1683_v10 }
 0x260   : > { %v2092_v30 = vpop.permute.xlu1 %2091 }
 0x261   : > { %v2186_v4 = vsel %vm403_vm0, %v2014_v54, %v2092_v30  ;;  %v1680_v30 = vsel %vm1679_vm5, %v1677_v37, %v1678_v33 }
 0x264   : > { %v2136_v11 = vpop.permute.xlu1 %2135  ;;  %v2090_v9 = vpop.permute.xlu0 %2089 }
 0x265   : > { %v2217_v29 = vsel %vm2193_vm8, %v2180_v23, %v2136_v11  ;;  %v2183_v59 = vsel %vm403_vm0, %v2013_v34, %v2090_v9  ;;  %v2016_v23 = vpack.c.bf16 %v1680_v30, %v1681_v53  ;;  %v7260_v34 = vld [vmem:[%s9432_s4] sm:$0xff] }
 0x266   : > { %5719 = vmatmul.mubr.msk.bf16.gmra.mxu1 %vm2278_vm9, %v2217_v29  ;;  %v7265_v33 = vrot.slane %v7260_v34, %v9443_v51 }
 0x268   : > { %v2138_v47 = vpop.permute.xlu0 %2137 }
 0x269   : > { %v2219_v26 = vsel %vm2193_vm8, %v2183_v59, %v2138_v47 }
 0x26a   : > { %5722 = vmatprep.mubr.msk.bf16.mxu1 %vm2278_vm9, %v2219_v26 }
 0x26e   : > { %v2096_v52 = vpop.permute.xlu1 %2095 }
 0x26f   : > { %v2192_v9 = vsel %vm403_vm0, %v2016_v23, %v2096_v52 }
 0x272   : > { %v2140_v41 = vpop.permute.xlu1 %2139  ;;  %v2094_v22 = vpop.permute.xlu0 %2093 }
 0x273   : > { %v2221_v5 = vsel %vm2193_vm8, %v2186_v4, %v2140_v41  ;;  %v2189_v20 = vsel %vm403_vm0, %v2015_v44, %v2094_v22 }
 0x274   : > { %5723 = vmatmul.mubr.msk.bf16.gmra.mxu1 %vm2278_vm9, %v2221_v5 }
 0x276   : > { %v2142_v8 = vpop.permute.xlu0 %2141  ;;  %v2144_v11 = vpop.permute.xlu1 %2143 }
 0x277   : > { %v2223_v58 = vsel %vm2193_vm8, %v2189_v20, %v2142_v8  ;;  %v2225_v29 = vsel %vm2193_vm8, %v2192_v9, %v2144_v11 }
 0x278   : > { %5726 = vmatprep.mubr.msk.bf16.mxu1 %vm2278_vm9, %v2223_v58 }
 0x27c   : > { %5727 = vmatmul.mubr.msk.bf16.gmra.mxu1 %vm2278_vm9, %v2225_v29  ;;  %vm4979_vm9 = vcmask 130048  }
 0x2d6   : > { %v5700_v59 = vpop.f32.mrf.mxu1 }
 0x2d7   : > { %v7268_v47 = vadd.f32 %v5700_v59, %v7265_v33 }
 0x2d8   : > { %v2345_v26 = vpop.f32.mrf.mxu1 }
 0x2d9   : > { %9627 = vst [vmem:[#allocation37_spill] sm:$0xff] %v7268_v47  ;;  %3092 = vrot.lane.b32.xlu0 %v7268_v47, %s6175_s28  ;;  %v2478_v14 = vsel %vm403_vm0, %v7268_v47, 0.0  ;;  %v7282_v13 = vadd.f32 %v2345_v26, %v7265_v33  ;;  %v2602_v32 = vmul.f32 %v7268_v47, %v7268_v47 }
 0x2da   : > { %v5701_v55 = vpop.f32.mrf.mxu1 }
 0x2db   : > { %9629 = vst [vmem:[#allocation39_spill] sm:$0xff] %v7282_v13  ;;  %v2472_v62 = vsel %vm403_vm0, %v7282_v13, 0.0  ;;  %v2638_v4 = vsel %vm403_vm0, %v2602_v32, 0.0  ;;  %v7302_v20 = vadd.f32 %v5701_v55, %v7265_v33  ;;  %v2600_v8 = vmul.f32 %v7282_v13, %v7282_v13 }
 0x2dc   : > { %v2348_v39 = vpop.f32.mrf.mxu1 }
 0x2dd   : > { %v7273_v61 = vadd.f32 %v2348_v39, %v7265_v33  ;;  %9631 = vst [vmem:[#allocation41_spill] sm:$0xff] %v7302_v20  ;;  %v2481_v58 = vsel %vm403_vm0, %v7302_v20, 0.0  ;;  %v2632_v23 = vsel %vm403_vm0, %v2600_v8, 0.0  ;;  %v2603_v9 = vmul.f32 %v7302_v20, %v7302_v20 }
 0x2df   : > { %9628 = vst [vmem:[#allocation38_spill] sm:$0xff] %v7273_v61  ;;  %3090 = vrot.lane.b32.xlu1 %v7273_v61, %s6175_s28  ;;  %v2475_v52 = vsel %vm403_vm0, %v7273_v61, 0.0  ;;  %v2601_v54 = vmul.f32 %v7273_v61, %v7273_v61  ;;  %v2641_v59 = vsel %vm403_vm0, %v2603_v9, 0.0 }
 0x2e1   : > { %v2635_v22 = vsel %vm403_vm0, %v2601_v54, 0.0 }
 0x2e6   : > { %v5704_v41 = vpop.f32.mrf.mxu1 }
 0x2e8   : > { %v2361_v37 = vpop.f32.mrf.mxu1 }
 0x2ea   : > { %v5705_v5 = vpop.f32.mrf.mxu1 }
 0x2ec   : > { %v7296_v10 = vpop.f32.mrf.mxu1 }
 0x2f6   : > { %v5708_v44 = vpop.f32.mrf.mxu1 }
 0x2f7   : > { %v7299_v53 = vadd.f32 %v5708_v44, %v7265_v33 }
 0x2f8   : > { %2479 = vadd.xlane.f32.xlu0 %v2478_v14  ;;  %v7324_v26 = vpop.f32.mrf.mxu1  ;;  %v7332_v14 = vadd.f32 %v5704_v41, %v7265_v33  ;;  %v7349_v41 = vadd.f32 %v2361_v37, %v7265_v33 }
 0x2f9   : > { %9630 = vst [vmem:[#allocation40_spill] sm:$0xff] %v7299_v53  ;;  %v2502_v30 = vsel %vm403_vm0, %v7299_v53, 0.0  ;;  %v2610_v11 = vmul.f32 %v7299_v53, %v7299_v53 }
 0x2fa   : > { %v5709_v55 = vpop.f32.mrf.mxu1  ;;  %9633 = vst [vmem:[#allocation43_spill] sm:$0xff] %v7332_v14  ;;  %9635 = vst [vmem:[#allocation45_spill] sm:$0xff] %v7349_v41 }
 0x2fb   : > { %v2662_v29 = vsel %vm403_vm0, %v2610_v11, 0.0  ;;  %v7327_v39 = vadd.f32 %v5709_v55, %v7265_v33 }
 0x2fd   : > { %9632 = vst [vmem:[#allocation42_spill] sm:$0xff] %v7327_v39 }
 0x303   : > { %2476 = vadd.xlane.f32.xlu1 %v2475_v52  ;;  %v2505_v52 = vsel %vm403_vm0, %v7327_v39, 0.0 }
 0x30e   : > { %3088 = vrot.lane.b32.xlu0 %v7282_v13, %s6175_s28 }
 0x312   : > { %3348 = vrot.lane.b32.xlu0 %v2602_v32, %s6175_s28  ;;  %v2490_v32 = vsel %vm403_vm0, %v7332_v14, 0.0 }
 0x314   : > { %3346 = vrot.lane.b32.xlu1 %v2601_v54, %s6175_s28  ;;  %v2380_v54 = vpop.f32.mrf.mxu1 }
 0x331   : > { %2473 = vadd.xlane.f32.xlu0 %v2472_v62  ;;  %v7341_v62 = vadd.f32 %v2380_v54, %v7265_v33 }
 0x333   : > { %9634 = vst [vmem:[#allocation44_spill] sm:$0xff] %v7341_v62  ;;  %v2499_v44 = vsel %vm403_vm0, %v7341_v62, 0.0 }
 0x335   : > { %2639 = vadd.xlane.f32.xlu0 %v2638_v4  ;;  %v2611_v4 = vmul.f32 %v7327_v39, %v7327_v39 }
 0x338   : > { %2636 = vadd.xlane.f32.xlu1 %v2635_v22  ;;  %v2606_v22 = vmul.f32 %v7332_v14, %v7332_v14 }
 0x33a   : > { %v2650_v37 = vsel %vm403_vm0, %v2606_v22, 0.0 }
 0x349   : > { %3108 = vrot.lane.b32.xlu1 %v7299_v53, %s6175_s28 }
 0x34b   : > { %3094 = vrot.lane.b32.xlu0 %v7302_v20, %s6175_s28  ;;  %v7544_v7 = vpop.permute.xlu0 %3092 }
 0x34f   : > { %3344 = vrot.lane.b32.xlu0 %v2600_v8, %s6175_s28  ;;  %v2665_v8 = vsel %vm403_vm0, %v2611_v4, 0.0 }
 0x351   : > { %v7569_v18 = vpop.permute.xlu1 %3090 }
 0x36d   : > { %2503 = vadd.xlane.f32.xlu1 %v2502_v30  ;;  %v2484_v30 = vsel %vm403_vm0, %v7349_v41, 0.0 }
 0x36e   : > { %2482 = vadd.xlane.f32.xlu0 %v2481_v58  ;;  %v2609_v58 = vmul.f32 %v7341_v62, %v7341_v62 }
 0x372   : > { %2633 = vadd.xlane.f32.xlu0 %v2632_v23  ;;  %v5712_v23 = vpop.f32.mrf.mxu1 }
 0x374   : > { %v2393_v54 = vpop.f32.mrf.mxu1 }
 0x37e   : > { %3364 = vrot.lane.b32.xlu1 %v2610_v11, %s6175_s28  ;;  %v7366_v11 = vadd.f32 %v5712_v23, %v7265_v33  ;;  %v5713_v23 = vpop.f32.mrf.mxu1 }
 0x380   : > { %9636 = vst [vmem:[#allocation46_spill] sm:$0xff] %v7366_v11  ;;  %v2514_v55 = vsel %vm403_vm0, %v7366_v11, 0.0 }
 0x388   : > { %3350 = vrot.lane.b32.xlu0 %v2603_v9, %s6175_s28  ;;  %v2604_v9 = vmul.f32 %v7349_v41, %v7349_v41 }
 0x3a2   : > { %2663 = vadd.xlane.f32.xlu1 %v2662_v29  ;;  %v7374_v29 = vadd.f32 %v5705_v5, %v7265_v33  ;;  %v7385_v5 = vadd.f32 %v2393_v54, %v7265_v33  ;;  %v2396_v54 = vpop.f32.mrf.mxu1 }
 0x3a4   : > { %9637 = vst [vmem:[#allocation47_spill] sm:$0xff] %v7374_v29  ;;  %9638 = vst [vmem:[#allocation48_spill] sm:$0xff] %v7385_v5 }
 0x3a7   : > { %2642 = vadd.xlane.f32.xlu0 %v2641_v59  ;;  %v2659_v59 = vsel %vm403_vm0, %v2609_v58, 0.0 }
 0x3b3   : > { %3110 = vrot.lane.b32.xlu1 %v7327_v39, %s6175_s28 }
 0x3bd   : > { %3100 = vrot.lane.b32.xlu0 %v7332_v14, %s6175_s28 }
 0x3d7   : > { %2506 = vadd.xlane.f32.xlu1 %v2505_v52  ;;  %v2644_v52 = vsel %vm403_vm0, %v2604_v9, 0.0 }
 0x3dc   : > { %2491 = vadd.xlane.f32.xlu0 %v2490_v32  ;;  %v2493_v32 = vsel %vm403_vm0, %v7374_v29, 0.0 }
 0x3e8   : > { %3106 = vrot.lane.b32.xlu1 %v7341_v62, %s6175_s28 }
 0x3ec   : > { %3366 = vrot.lane.b32.xlu1 %v2611_v4, %s6175_s28  ;;  %v2614_v4 = vmul.f32 %v7366_v11, %v7366_v11 }
 0x3f2   : > { %3096 = vrot.lane.b32.xlu0 %v7349_v41, %s6175_s28 }
 0x3f6   : > { %3356 = vrot.lane.b32.xlu0 %v2606_v22, %s6175_s28  ;;  %v7394_v22 = vadd.f32 %v7296_v10, %v7265_v33 }
 0x3f8   : > { %9639 = vst [vmem:[#allocation49_spill] sm:$0xff] %v7394_v22 }
 0x410   : > { %2500 = vadd.xlane.f32.xlu1 %v2499_v44  ;;  %v2607_v44 = vmul.f32 %v7374_v29, %v7374_v29 }
 0x412   : > { %v2653_v10 = vsel %vm403_vm0, %v2607_v44, 0.0 }
 0x414   : > { %2666 = vadd.xlane.f32.xlu1 %v2665_v8  ;;  %v2508_v8 = vsel %vm403_vm0, %v7385_v5, 0.0 }
 0x415   : > { %2485 = vadd.xlane.f32.xlu0 %v2484_v30  ;;  %v2674_v30 = vsel %vm403_vm0, %v2614_v4, 0.0 }
 0x419   : > { %2651 = vadd.xlane.f32.xlu0 %v2650_v37  ;;  %v2487_v37 = vsel %vm403_vm0, %v7394_v22, 0.0 }
 0x425   : > { %3362 = vrot.lane.b32.xlu1 %v2609_v58, %s6175_s28  ;;  %v2612_v58 = vmul.f32 %v7385_v5, %v7385_v5 }
 0x429   : > { %3116 = vrot.lane.b32.xlu1 %v7366_v11, %s6175_s28 }
 0x42f   : > { %3352 = vrot.lane.b32.xlu0 %v2604_v9, %s6175_s28  ;;  %v7411_v9 = vadd.f32 %v5713_v23, %v7265_v33 }
 0x431   : > { %9640 = vst [vmem:[#allocation50_spill] sm:$0xff] %v7411_v9 }
 0x433   : > { %3102 = vrot.lane.b32.xlu0 %v7374_v29, %s6175_s28 }
 0x44d   : > { %2660 = vadd.xlane.f32.xlu1 %v2659_v59  ;;  %v2605_v59 = vmul.f32 %v7394_v22, %v7394_v22 }
 0x451   : > { %2515 = vadd.xlane.f32.xlu1 %v2514_v55  ;;  %v2668_v55 = vsel %vm403_vm0, %v2612_v58, 0.0 }
 0x452   : > { %2645 = vadd.xlane.f32.xlu0 %v2644_v52  ;;  %v2647_v52 = vsel %vm403_vm0, %v2605_v59, 0.0 }
 0x456   : > { %2494 = vadd.xlane.f32.xlu0 %v2493_v32  ;;  %v2517_v32 = vsel %vm403_vm0, %v7411_v9, 0.0 }
 0x462   : > { %3112 = vrot.lane.b32.xlu1 %v7385_v5, %s6175_s28 }
 0x466   : > { %3372 = vrot.lane.b32.xlu1 %v2614_v4, %s6175_s28  ;;  %v7423_v4 = vadd.f32 %v2396_v54, %v7265_v33 }
 0x468   : > { %9641 = vst [vmem:[#allocation51_spill] sm:$0xff] %v7423_v4 }
 0x46c   : > { %3098 = vrot.lane.b32.xlu0 %v7394_v22, %s6175_s28 }
 0x470   : > { %3358 = vrot.lane.b32.xlu0 %v2607_v44, %s6175_s28  ;;  %v7427_v44 = vadd.f32 %v7324_v26, %v7265_v33 }
 0x472   : > { %9642 = vst [vmem:[#allocation52_spill] sm:$0xff] %v7427_v44 }
 0x48a   : > { %2509 = vadd.xlane.f32.xlu1 %v2508_v8  ;;  %v2615_v8 = vmul.f32 %v7411_v9, %v7411_v9 }
 0x48c   : > { %v2677_v26 = vsel %vm403_vm0, %v2615_v8, 0.0 }
 0x48e   : > { %2675 = vadd.xlane.f32.xlu1 %v2674_v30  ;;  %v2496_v30 = vsel %vm403_vm0, %v7427_v44, 0.0 }
 0x48f   : > { %2488 = vadd.xlane.f32.xlu0 %v2487_v37  ;;  %v2511_v37 = vsel %vm403_vm0, %v7423_v4, 0.0 }
 0x493   : > { %2654 = vadd.xlane.f32.xlu0 %v2653_v10  ;;  %v2608_v10 = vmul.f32 %v7427_v44, %v7427_v44 }
 0x495   : > { %v2656_v23 = vsel %vm403_vm0, %v2608_v10, 0.0 }
 0x49f   : > { %3368 = vrot.lane.b32.xlu1 %v2612_v58, %s6175_s28  ;;  %v2613_v58 = vmul.f32 %v7423_v4, %v7423_v4 }
 0x4a3   : > { %3118 = vrot.lane.b32.xlu1 %v7411_v9, %s6175_s28 }
 0x4a9   : > { %3354 = vrot.lane.b32.xlu0 %v2605_v59, %s6175_s28  ;;  %v2671_v59 = vsel %vm403_vm0, %v2613_v58, 0.0 }
 0x4c7   : > { %2669 = vadd.xlane.f32.xlu1 %v2668_v55  ;;  %v5716_v55 = vpop.f32.mrf.mxu1 }
 0x4c8   : > { %2648 = vadd.xlane.f32.xlu0 %v2647_v52  ;;  %v7450_v54 = vadd.f32 %v5716_v55, %v7265_v33 }
 0x4c9   : > { %v2409_v52 = vpop.f32.mrf.mxu1 }
 0x4ca   : > { %9643 = vst [vmem:[#allocation53_spill] sm:$0xff] %v7450_v54 }
 0x4cb   : > { %2518 = vadd.xlane.f32.xlu1 %v2517_v32  ;;  %v5717_v32 = vpop.f32.mrf.mxu1 }
 0x4cc   : > { %v7484_v3 = vadd.f32 %v5717_v32, %v7265_v33 }
 0x4ce   : > { %9647 = vst [vmem:[#allocation57_spill] sm:$0xff] %v7484_v3 }
 0x4dc   : > { %3114 = vrot.lane.b32.xlu1 %v7423_v4, %s6175_s28 }
 0x4de   : > { %3104 = vrot.lane.b32.xlu0 %v7427_v44, %s6175_s28 }
 0x4e0   : > { %3374 = vrot.lane.b32.xlu1 %v2615_v8, %s6175_s28  ;;  %v2412_v8 = vpop.f32.mrf.mxu1 }
 0x4fd   : > { %2497 = vadd.xlane.f32.xlu0 %v2496_v30  ;;  %v7455_v30 = vadd.f32 %v2412_v8, %v7265_v33 }
 0x4ff   : > { %9644 = vst [vmem:[#allocation54_spill] sm:$0xff] %v7455_v30 }
 0x504   : > { %2512 = vadd.xlane.f32.xlu1 %v2511_v37  ;;  %v2526_v37 = vsel %vm403_vm0, %v7450_v54, 0.0 }
 0x508   : > { %2678 = vadd.xlane.f32.xlu1 %v2677_v26  ;;  %v2523_v26 = vsel %vm403_vm0, %v7455_v30, 0.0 }
 0x513   : > { %3360 = vrot.lane.b32.xlu0 %v2608_v10, %s6175_s28  ;;  %v7464_v10 = vadd.f32 %v2409_v52, %v7265_v33  ;;  %v5720_v52 = vpop.f32.mrf.mxu1 }
 0x514   : > { %v7514_v49 = vadd.f32 %v5720_v52, %v7265_v33 }
 0x515   : > { %9645 = vst [vmem:[#allocation55_spill] sm:$0xff] %v7464_v10 }
 0x516   : > { %9649 = vst [vmem:[#allocation59_spill] sm:$0xff] %v7514_v49 }
 0x519   : > { %3370 = vrot.lane.b32.xlu1 %v2613_v58, %s6175_s28  ;;  %v2618_v58 = vmul.f32 %v7450_v54, %v7450_v54 }
 0x51b   : > { %v2686_v55 = vsel %vm403_vm0, %v2618_v58, 0.0 }
 0x532   : > { %2657 = vadd.xlane.f32.xlu0 %v2656_v23  ;;  %v2617_v23 = vmul.f32 %v7455_v30, %v7455_v30 }
 0x534   : > { %v2683_v8 = vsel %vm403_vm0, %v2617_v23, 0.0 }
 0x53d   : > { %2672 = vadd.xlane.f32.xlu1 %v2671_v59  ;;  %v2520_v59 = vsel %vm403_vm0, %v7464_v10, 0.0 }
 0x548   : > { %3124 = vrot.lane.b32.xlu0 %v7450_v54, %s6175_s28 }
 0x54e   : > { %3122 = vrot.lane.b32.xlu1 %v7455_v30, %s6175_s28 }
 0x567   : > { %2527 = vadd.xlane.f32.xlu0 %v2526_v37  ;;  %v2425_v37 = vpop.f32.mrf.mxu1 }
 0x572   : > { %2524 = vadd.xlane.f32.xlu1 %v2523_v26  ;;  %v5721_v26 = vpop.f32.mrf.mxu1 }
 0x574   : > { %v7478_v51 = vpop.f32.mrf.mxu1 }
 0x576   : > { %v5724_v60 = vpop.f32.mrf.mxu1 }
 0x577   : > { %v7481_v24 = vadd.f32 %v5724_v60, %v7265_v33  ;;  %v2529_v60 = vsel %vm403_vm0, %v7484_v3, 0.0 }
 0x579   : > { %9646 = vst [vmem:[#allocation56_spill] sm:$0xff] %v7481_v24 }
 0x57d   : > { %3120 = vrot.lane.b32.xlu0 %v7464_v10, %s6175_s28 }
 0x581   : > { %3380 = vrot.lane.b32.xlu0 %v2618_v58, %s6175_s28  ;;  %v2616_v58 = vmul.f32 %v7464_v10, %v7464_v10 }
 0x583   : > { %3378 = vrot.lane.b32.xlu1 %v2617_v23, %s6175_s28  ;;  %v2550_v23 = vsel %vm403_vm0, %v7481_v24, 0.0  ;;  %v2680_v32 = vsel %vm403_vm0, %v2616_v58, 0.0 }
 0x5a0   : > { %2521 = vadd.xlane.f32.xlu0 %v2520_v59  ;;  %v2626_v59 = vmul.f32 %v7481_v24, %v7481_v24 }
 0x5a4   : > { %2687 = vadd.xlane.f32.xlu0 %v2686_v55  ;;  %v2619_v55 = vmul.f32 %v7484_v3, %v7484_v3 }
 0x5a7   : > { %2684 = vadd.xlane.f32.xlu1 %v2683_v8  ;;  %v2710_v8 = vsel %vm403_vm0, %v2626_v59, 0.0 }
 0x5b8   : > { %3140 = vrot.lane.b32.xlu1 %v7481_v24, %s6175_s28 }
 0x5ba   : > { %3126 = vrot.lane.b32.xlu0 %v7484_v3, %s6175_s28 }
 0x5be   : > { %3376 = vrot.lane.b32.xlu0 %v2616_v58, %s6175_s28 }
 0x5dc   : > { %2551 = vadd.xlane.f32.xlu1 %v2550_v23  ;;  %v2689_v23 = vsel %vm403_vm0, %v2619_v55, 0.0 }
 0x5dd   : > { %2530 = vadd.xlane.f32.xlu0 %v2529_v60  ;;  %v7506_v60 = vpop.f32.mrf.mxu1 }
 0x5df   : > { %v5725_v58 = vpop.f32.mrf.mxu1 }
 0x5e1   : > { %2681 = vadd.xlane.f32.xlu0 %v2680_v32  ;;  %v7509_v32 = vadd.f32 %v5725_v58, %v7265_v33  ;;  %v7531_v58 = vadd.f32 %v2425_v37, %v7265_v33 }
 0x5e3   : > { %9648 = vst [vmem:[#allocation58_spill] sm:$0xff] %v7509_v32  ;;  %v2627_v52 = vmul.f32 %v7509_v32, %v7509_v32  ;;  %9651 = vst [vmem:[#allocation61_spill] sm:$0xff] %v7531_v58  ;;  %v2532_v57 = vsel %vm403_vm0, %v7531_v58, 0.0 }
 0x5ed   : > { %3396 = vrot.lane.b32.xlu1 %v2626_v59, %s6175_s28  ;;  %v2553_v59 = vsel %vm403_vm0, %v7509_v32, 0.0 }
 0x5f7   : > { %3382 = vrot.lane.b32.xlu0 %v2619_v55, %s6175_s28  ;;  %v2538_v55 = vsel %vm403_vm0, %v7514_v49, 0.0 }
 0x611   : > { %2711 = vadd.xlane.f32.xlu1 %v2710_v8  ;;  %v2444_v8 = vpop.f32.mrf.mxu1 }
 0x613   : > { %v5728_v27 = vpop.f32.mrf.mxu1 }
 0x615   : > { %v2457_v56 = vpop.f32.mrf.mxu1 }
 0x616   : > { %2690 = vadd.xlane.f32.xlu0 %v2689_v23  ;;  %v7523_v23 = vadd.f32 %v2444_v8, %v7265_v33  ;;  %v2713_v8 = vsel %vm403_vm0, %v2627_v52, 0.0 }
 0x618   : > { %9650 = vst [vmem:[#allocation60_spill] sm:$0xff] %v7523_v23  ;;  %v2625_v1 = vmul.f32 %v7523_v23, %v7523_v23 }
 0x622   : > { %3142 = vrot.lane.b32.xlu1 %v7509_v32, %s6175_s28 }
 0x62c   : > { %3132 = vrot.lane.b32.xlu0 %v7514_v49, %s6175_s28 }
 0x646   : > { %2554 = vadd.xlane.f32.xlu1 %v2553_v59  ;;  %v2622_v59 = vmul.f32 %v7514_v49, %v7514_v49 }
 0x648   : > { %v2698_v37 = vsel %vm403_vm0, %v2622_v59, 0.0 }
 0x64b   : > { %2539 = vadd.xlane.f32.xlu0 %v2538_v55  ;;  %v2547_v55 = vsel %vm403_vm0, %v7523_v23, 0.0 }
 0x657   : > { %3138 = vrot.lane.b32.xlu1 %v7523_v23, %s6175_s28 }
 0x65b   : > { %3398 = vrot.lane.b32.xlu1 %v2627_v52, %s6175_s28  ;;  %v7554_v52 = vpop.xlane.xlu0 %2479 }
 0x661   : > { %3128 = vrot.lane.b32.xlu0 %v7531_v58, %s6175_s28 }
 0x665   : > { %3388 = vrot.lane.b32.xlu0 %v2622_v59, %s6175_s28  ;;  %v7560_v59 = vadd.f32 %v5721_v26, %v7265_v33 }
 0x667   : > { %9653 = vst [vmem:[#allocation63_spill] sm:$0xff] %v7560_v59  ;;  %v2541_v26 = vsel %vm403_vm0, %v7560_v59, 0.0 }
 0x67f   : > { %2548 = vadd.xlane.f32.xlu1 %v2547_v55  ;;  %v7550_v55 = vadd.f32 %v5728_v27, %v7265_v33  ;;  %v2707_v27 = vsel %vm403_vm0, %v2625_v1, 0.0 }
 0x681   : > { %9652 = vst [vmem:[#allocation62_spill] sm:$0xff] %v7550_v55 }
 0x683   : > { %2714 = vadd.xlane.f32.xlu1 %v2713_v8  ;;  %v7562_v8 = vpop.permute.xlu0 %3088 }
 0x684   : > { %2533 = vadd.xlane.f32.xlu0 %v2532_v57  ;;  %v2620_v57 = vmul.f32 %v7531_v58, %v7531_v58 }
 0x686   : > { %v2692_v40 = vsel %vm403_vm0, %v2620_v57, 0.0 }
 0x687   : > { %v7572_v45 = vpop.permute.xlu0 %3348 }
 0x688   : > { %2699 = vadd.xlane.f32.xlu0 %v2698_v37  ;;  %v2562_v37 = vsel %vm403_vm0, %v7550_v55, 0.0 }
 0x68b   : > { %v7576_v2 = vpop.xlane.xlu0 %2473 }
 0x694   : > { %3394 = vrot.lane.b32.xlu1 %v2625_v1, %s6175_s28  ;;  %v7579_v1 = vadd.f32 %v2457_v56, %v7265_v33  ;;  %v7600_v56 = vmul.f32 %v7560_v59, %v7560_v59 }
 0x696   : > { %9654 = vst [vmem:[#allocation64_spill] sm:$0xff] %v7579_v1 }
 0x698   : > { %3148 = vrot.lane.b32.xlu1 %v7550_v55, %s6175_s28 }
 0x69e   : > { %3384 = vrot.lane.b32.xlu0 %v2620_v57, %s6175_s28  ;;  %v2630_v57 = vmul.f32 %v7550_v55, %v7550_v55 }
 0x6a0   : > { %v2722_v46 = vsel %vm403_vm0, %v2630_v57, 0.0 }
 0x6a2   : > { %3134 = vrot.lane.b32.xlu0 %v7560_v59, %s6175_s28 }
 0x6bc   : > { %2708 = vadd.xlane.f32.xlu1 %v2707_v27  ;;  %v7581_v27 = vpop.xlane.xlu1 %2476 }
 0x6c0   : > { %2563 = vadd.xlane.f32.xlu1 %v2562_v37  ;;  %v7587_v37 = vpop.permute.xlu1 %3346 }
 0x6c1   : > { %2693 = vadd.xlane.f32.xlu0 %v2692_v40  ;;  %v7592_v40 = vadd.f32 %v7478_v51, %v7265_v33  ;;  %v2556_v51 = vsel %vm403_vm0, %v7579_v1, 0.0 }
 0x6c3   : > { %9655 = vst [vmem:[#allocation65_spill] sm:$0xff] %v7592_v40  ;;  %v2535_v0 = vsel %vm403_vm0, %v7592_v40, 0.0  ;;  %v2621_v25 = vmul.f32 %v7592_v40, %v7592_v40 }
 0x6c4   : > { %v7606_v35 = vpop.xlane.xlu1 %2636 }
 0x6c5   : > { %2542 = vadd.xlane.f32.xlu0 %v2541_v26  ;;  %v7594_v26 = vpop.xlane.xlu0 %2639  ;;  %v2695_v32 = vsel %vm403_vm0, %v2621_v25, 0.0 }
 0x6c8   : > { %v7611_v43 = vpop.permute.xlu1 %3108 }
 0x6c9   : > { %v7602_v50 = vpop.permute.xlu0 %3094 }
 0x6cc   : > { %v7617_v28 = vpop.xlane.xlu1 %2503 }
 0x6cd   : > { %v7615_v31 = vpop.permute.xlu0 %3344 }
 0x6d0   : > { %v7621_v6 = vpop.permute.xlu1 %3364 }
 0x6d1   : > { %3144 = vrot.lane.b32.xlu1 %v7579_v1, %s6175_s28  ;;  %v7619_v38 = vpop.xlane.xlu0 %2482 }
 0x6d5   : > { %3404 = vrot.lane.b32.xlu1 %v2630_v57, %s6175_s28  ;;  %v7623_v42 = vpop.xlane.xlu0 %2633  ;;  %v2628_v57 = vmul.f32 %v7579_v1, %v7579_v1 }
 0x6d7   : > { %v2716_v24 = vsel %vm403_vm0, %v2628_v57, 0.0 }
 0x6d9   : > { %v7630_v21 = vpop.permute.xlu0 %3350 }
 0x6db   : > { %3130 = vrot.lane.b32.xlu0 %v7592_v40, %s6175_s28 }
 0x6dd   : > { %v7641_v12 = vpop.xlane.xlu0 %2642 }
 0x6df   : > { %3390 = vrot.lane.b32.xlu0 %v7600_v56, %s6175_s28 }
 0x6e1   : > { %v7646_v17 = vpop.permute.xlu0 %3100 }
 0x6f9   : > { %2557 = vadd.xlane.f32.xlu1 %v2556_v51  ;;  %v7625_v51 = vpop.xlane.xlu1 %2663 }
 0x6fd   : > { %2723 = vadd.xlane.f32.xlu1 %v2722_v46  ;;  %v5729_v46 = vpop.f32.mrf.mxu1  ;;  %v7635_v36 = vpop.permute.xlu1 %3110 }
 0x6fe   : > { %2536 = vadd.xlane.f32.xlu0 %v2535_v0  ;;  %v7633_v0 = vadd.f32 %v5729_v46, %v7265_v33  ;;  %v7650_v46 = vpop.xlane.xlu0 %2491 }
 0x700   : > { %9656 = vst [vmem:[#allocation66_spill] sm:$0xff] %v7633_v0  ;;  %v2565_v10 = vsel %vm403_vm0, %v7633_v0, 0.0  ;;  %v7703_v44 = vmul.f32 %v7633_v0, %v7633_v0 }
 0x701   : > { %v7644_v16 = vpop.xlane.xlu1 %2506 }
 0x702   : > { %v7654_v15 = vpop.permute.xlu0 %3096 }
 0x705   : > { %v7648_v63 = vpop.permute.xlu1 %3106 }
 0x706   : > { %v7658_v55 = vpop.permute.xlu0 %3356 }
 0x709   : > { %v7652_v48 = vpop.permute.xlu1 %3366 }
 0x70a   : > { %v7662_v23 = vpop.xlane.xlu0 %2485 }
 0x70b   : > { %9657 = vst [vmem:[#allocation67_spill] sm:$0xff] %v7662_v23 }
 0x70d   : > { %v7656_v1 = vpop.xlane.xlu1 %2500 }
 0x70e   : > { %3400 = vrot.lane.b32.xlu1 %v2628_v57, %s6175_s28  ;;  %v7667_v58 = vpop.xlane.xlu0 %2651 }
 0x70f   : > { %9658 = vst [vmem:[#allocation68_spill] sm:$0xff] %v7667_v58 }
 0x711   : > { %v7660_v59 = vpop.xlane.xlu1 %2666 }
 0x712   : > { %3150 = vrot.lane.b32.xlu1 %v7633_v0, %s6175_s28  ;;  %v7672_v30 = vpop.permute.xlu0 %3352 }
 0x714   : > { %3386 = vrot.lane.b32.xlu0 %v2621_v25, %s6175_s28 }
 0x715   : > { %v7664_v40 = vpop.permute.xlu1 %3362 }
 0x716   : > { %v7678_v9 = vpop.permute.xlu0 %3102 }
 0x719   : > { %v7670_v3 = vpop.permute.xlu1 %3116 }
 0x71a   : > { %v7682_v25 = vpop.xlane.xlu0 %2645 }
 0x71b   : > { %9661 = vst [vmem:[#allocation71_spill] sm:$0xff] %v7682_v25 }
 0x71d   : > { %v7676_v4 = vpop.xlane.xlu1 %2660 }
 0x71e   : > { %9659 = vst [vmem:[#allocation69_spill] sm:$0xff] %v7676_v4  ;;  %v7693_v22 = vpop.xlane.xlu0 %2494 }
 0x71f   : > { %9664 = vst [vmem:[#allocation74_spill] sm:$0xff] %v7693_v22 }
 0x721   : > { %v7680_v49 = vpop.xlane.xlu1 %2515 }
 0x722   : > { %9660 = vst [vmem:[#allocation70_spill] sm:$0xff] %v7680_v49 }
 0x725   : > { %v7688_v57 = vpop.permute.xlu1 %3112 }
 0x733   : > { %2696 = vadd.xlane.f32.xlu0 %v2695_v32  ;;  %v2460_v32 = vpop.f32.mrf.mxu1 }
 0x734   : > { %v7691_v54 = vadd.f32 %v2460_v32, %v7265_v33 }
 0x736   : > { %2717 = vadd.xlane.f32.xlu1 %v2716_v24  ;;  %v7686_v24 = vadd.f32 %v7506_v60, %v7265_v33  ;;  %9663 = vst [vmem:[#allocation73_spill] sm:$0xff] %v7691_v54  ;;  %v7705_v60 = vpop.permute.xlu0 %3098  ;;  %v2629_v22 = vmul.f32 %v7691_v54, %v7691_v54 }
 0x738   : > { %9662 = vst [vmem:[#allocation72_spill] sm:$0xff] %v7686_v24  ;;  %v2544_v39 = vsel %vm403_vm0, %v7686_v24, 0.0 }
 0x73a   : > { %2566 = vadd.xlane.f32.xlu1 %v2565_v10  ;;  %v7699_v10 = vpop.permute.xlu1 %3372  ;;  %v7711_v32 = vpop.permute.xlu0 %3358 }
 0x73e   : > { %v7709_v33 = vpop.xlane.xlu1 %2509  ;;  %v7715_v29 = vpop.xlane.xlu0 %2488 }
 0x73f   : > { %9665 = vst [vmem:[#allocation75_spill] sm:$0xff] %v7709_v33  ;;  %9667 = vst [vmem:[#allocation77_spill] sm:$0xff] %v7715_v29  ;;  %v2559_v29 = vsel %vm403_vm0, %v7691_v54, 0.0 }
 0x742   : > { %v7713_v5 = vpop.xlane.xlu1 %2675  ;;  %v7719_v41 = vpop.xlane.xlu0 %2654 }
 0x743   : > { %9666 = vst [vmem:[#allocation76_spill] sm:$0xff] %v7713_v5  ;;  %9668 = vst [vmem:[#allocation78_spill] sm:$0xff] %v7719_v41 }
 0x746   : > { %v7717_v11 = vpop.permute.xlu1 %3368  ;;  %v7723_v0 = vpop.permute.xlu0 %3354 }
 0x749   : > { %3136 = vrot.lane.b32.xlu0 %v7686_v24, %s6175_s28 }
 0x74a   : > { %v7721_v62 = vpop.permute.xlu1 %3118  ;;  %v7729_v20 = vpop.xlane.xlu0 %2648 }
 0x74b   : > { %3146 = vrot.lane.b32.xlu1 %v7691_v54, %s6175_s28  ;;  %9670 = vst [vmem:[#allocation80_spill] sm:$0xff] %v7729_v20 }
 0x74e   : > { %v7725_v14 = vpop.xlane.xlu1 %2669  ;;  %v7733_v33 = vpop.permute.xlu0 %3104 }
 0x74f   : > { %3406 = vrot.lane.b32.xlu1 %v7703_v44, %s6175_s28  ;;  %9669 = vst [vmem:[#allocation79_spill] sm:$0xff] %v7725_v14 }
 0x752   : > { %v7731_v53 = vpop.xlane.xlu1 %2518  ;;  %v7739_v13 = vpop.xlane.xlu0 %2497 }
 0x753   : > { %9671 = vst [vmem:[#allocation81_spill] sm:$0xff] %v7731_v53  ;;  %9672 = vst [vmem:[#allocation82_spill] sm:$0xff] %v7739_v13 }
 0x756   : > { %v7737_v41 = vpop.permute.xlu1 %3114  ;;  %v7743_v14 = vpop.permute.xlu0 %3360 }
 0x75a   : > { %v7741_v61 = vpop.permute.xlu1 %3374  ;;  %v7749_v53 = vpop.xlane.xlu0 %2657 }
 0x75b   : > { %9674 = vst [vmem:[#allocation84_spill] sm:$0xff] %v7749_v53 }
 0x75e   : > { %v7747_v20 = vpop.xlane.xlu1 %2512  ;;  %v7756_v13 = vpop.permute.xlu0 %3124 }
 0x75f   : > { %9673 = vst [vmem:[#allocation83_spill] sm:$0xff] %v7747_v20 }
 0x762   : > { %v7754_v47 = vpop.xlane.xlu1 %2678 }
 0x763   : > { %9675 = vst [vmem:[#allocation85_spill] sm:$0xff] %v7754_v47 }
 0x766   : > { %v7761_v5 = vpop.permute.xlu1 %3370 }
 0x768   : > { %2545 = vadd.xlane.f32.xlu0 %v2544_v39  ;;  %v2624_v39 = vmul.f32 %v7686_v24, %v7686_v24 }
 0x76a   : > { %v7763_v24 = vpop.xlane.xlu1 %2672  ;;  %v2704_v47 = vsel %vm403_vm0, %v2624_v39, 0.0 }
 0x76b   : > { %9677 = vst [vmem:[#allocation87_spill] sm:$0xff] %v7763_v24 }
 0x76e   : > { %v7767_v53 = vpop.permute.xlu1 %3122 }
 0x772   : > { %v7771_v49 = vpop.xlane.xlu1 %2524 }
 0x773   : > { %2560 = vadd.xlane.f32.xlu1 %v2559_v29  ;;  %v7759_v29 = vpop.xlane.xlu0 %2527  ;;  %9678 = vst [vmem:[#allocation88_spill] sm:$0xff] %v7771_v49  ;;  %v3184_v49 = vsel %vm403_vm0, %v7562_v8, 0.0 }
 0x774   : > { %9676 = vst [vmem:[#allocation86_spill] sm:$0xff] %v7759_v29  ;;  %v3190_v29 = vsel %vm403_vm0, %v7544_v7, 0.0 }
 0x776   : > { %v7776_v4 = vpop.permute.xlu1 %3378 }
 0x777   : > { %v7765_v20 = vpop.permute.xlu0 %3120 }
 0x77a   : > { %v7782_v24 = vpop.xlane.xlu1 %2684 }
 0x77b   : > { %v7769_v25 = vpop.permute.xlu0 %3380 }
 0x77e   : > { %3392 = vrot.lane.b32.xlu0 %v2624_v39, %s6175_s28  ;;  %v2719_v39 = vsel %vm403_vm0, %v2629_v22, 0.0 }
 0x77f   : > { %v7773_v54 = vpop.xlane.xlu0 %2521 }
 0x780   : > { %9679 = vst [vmem:[#allocation89_spill] sm:$0xff] %v7773_v54  ;;  %v7788_v54 = vpop.permute.xlu1 %3140 }
 0x783   : > { %v7778_v23 = vpop.xlane.xlu0 %2687 }
 0x784   : > { %3402 = vrot.lane.b32.xlu1 %v2629_v22, %s6175_s28  ;;  %9680 = vst [vmem:[#allocation90_spill] sm:$0xff] %v7778_v23  ;;  %v7795_v7 = vpop.xlane.xlu1 %2551  ;;  %v3443_v22 = vsel %vm403_vm0, %v7587_v37, 0.0  ;;  %v3470_v37 = vsel %vm403_vm0, %v7621_v6, 0.0 }
 0x787   : > { %v7784_v58 = vpop.permute.xlu0 %3126 }
 0x78b   : > { %v7793_v23 = vpop.permute.xlu0 %3376 }
 0x78f   : > { %v7801_v8 = vpop.xlane.xlu0 %2530 }
 0x790   : > { %9681 = vst [vmem:[#allocation91_spill] sm:$0xff] %v7801_v8 }
 0x79d   : > { %2705 = vadd.xlane.f32.xlu0 %v2704_v47  ;;  %v3446_v47 = vsel %vm403_vm0, %v7572_v45, 0.0  ;;  %v3440_v45 = vsel %vm403_vm0, %v7615_v31, 0.0  ;;  %v3202_v31 = vsel %vm403_vm0, %v7646_v17, 0.0  ;;  %v3473_v17 = vsel %vm403_vm0, %v7652_v48, 0.0 }
 0x79e   : > { %v3226_v48 = vsel %vm403_vm0, %v7670_v3, 0.0  ;;  %v3482_v3 = vsel %vm403_vm0, %v7699_v10, 0.0  ;;  %v3229_v10 = vsel %vm403_vm0, %v7721_v62, 0.0  ;;  %v3485_v62 = vsel %vm403_vm0, %v7741_v61, 0.0 }
 0x79f   : > { %v3235_v61 = vsel %vm403_vm0, %v7767_v53, 0.0  ;;  %v3262_v53 = vsel %vm403_vm0, %v7788_v54, 0.0 }
 0x7a1   : > { %3191 = vadd.xlane.f32.xlu0 %v3190_v29  ;;  %v3187_v29 = vsel %vm403_vm0, %v7569_v18, 0.0  ;;  %v3214_v18 = vsel %vm403_vm0, %v7611_v43, 0.0  ;;  %v3217_v43 = vsel %vm403_vm0, %v7635_v36, 0.0  ;;  %v3467_v36 = vsel %vm403_vm0, %v7664_v40, 0.0 }
 0x7a2   : > { %v3220_v40 = vsel %vm403_vm0, %v7688_v57, 0.0  ;;  %v3476_v57 = vsel %vm403_vm0, %v7717_v11, 0.0  ;;  %v3223_v11 = vsel %vm403_vm0, %v7737_v41, 0.0  ;;  %v3479_v41 = vsel %vm403_vm0, %v7761_v5, 0.0 }
 0x7a3   : > { %v3491_v5 = vsel %vm403_vm0, %v7776_v4, 0.0 }
 0x7a5   : > { %3185 = vadd.xlane.f32.xlu0 %v3184_v49  ;;  %v3193_v49 = vsel %vm403_vm0, %v7602_v50, 0.0  ;;  %v3449_v50 = vsel %vm403_vm0, %v7630_v21, 0.0  ;;  %v3196_v21 = vsel %vm403_vm0, %v7654_v15, 0.0  ;;  %v3452_v15 = vsel %vm403_vm0, %v7672_v30, 0.0 }
 0x7a6   : > { %v3199_v30 = vsel %vm403_vm0, %v7705_v60, 0.0  ;;  %v3455_v60 = vsel %vm403_vm0, %v7723_v0, 0.0  ;;  %v3464_v0 = vsel %vm403_vm0, %v7743_v14, 0.0  ;;  %v3238_v14 = vsel %vm403_vm0, %v7756_v13, 0.0 }
 0x7a7   : > { %v3494_v13 = vsel %vm403_vm0, %v7769_v25, 0.0  ;;  %v3488_v25 = vsel %vm403_vm0, %v7793_v23, 0.0 }
 0x7a8   : > { %2720 = vadd.xlane.f32.xlu1 %v2719_v39  ;;  %v7807_v39 = vpop.permute.xlu1 %3396 }
 0x7a9   : > { %3447 = vadd.xlane.f32.xlu0 %v3446_v47  ;;  %v7809_v47 = vpop.xlane.xlu0 %2681  ;;  %v3518_v4 = vsel %vm403_vm0, %v7807_v39, 0.0  ;;  %v2725_v39 = vsel %vm403_vm0, %v7703_v44, 0.0  ;;  %v9540_v44 = vsub.s32 7, %v6268_v19 }
 0x7ac   : > { %3188 = vadd.xlane.f32.xlu1 %v3187_v29  ;;  %v7815_v29 = vpop.xlane.xlu1 %2711 }
 0x7ad   : > { %3194 = vadd.xlane.f32.xlu0 %v3193_v49  ;;  %9682 = vst [vmem:[#allocation92_spill] sm:$0xff] %v7815_v29  ;;  %v7821_v49 = vpop.permute.xlu0 %3382 }
 0x7b0   : > { %3444 = vadd.xlane.f32.xlu1 %v3443_v22  ;;  %v7823_v22 = vpop.permute.xlu1 %3142 }
 0x7b1   : > { %3441 = vadd.xlane.f32.xlu0 %v3440_v45  ;;  %v7829_v45 = vpop.xlane.xlu0 %2690  ;;  %v3265_v54 = vsel %vm403_vm0, %v7823_v22, 0.0 }
 0x7b2   : > { %9683 = vst [vmem:[#allocation93_spill] sm:$0xff] %v7829_v45 }
 0x7b4   : > { %3215 = vadd.xlane.f32.xlu1 %v3214_v18  ;;  %v7831_v6 = vpop.xlane.xlu1 %2554  ;;  %v3458_v18 = vsel %vm403_vm0, %v7658_v55, 0.0  ;;  %v3205_v55 = vsel %vm403_vm0, %v7678_v9, 0.0  ;;  %v3461_v9 = vsel %vm403_vm0, %v7711_v32, 0.0  ;;  %v3208_v32 = vsel %vm403_vm0, %v7733_v33, 0.0 }
 0x7b5   : > { %3450 = vadd.xlane.f32.xlu0 %v3449_v50  ;;  %9684 = vst [vmem:[#allocation94_spill] sm:$0xff] %v7831_v6  ;;  %v7837_v50 = vpop.permute.xlu0 %3132  ;;  %v3211_v33 = vsel %vm403_vm0, %v7648_v63, 0.0  ;;  %v3232_v63 = vsel %vm403_vm0, %v7765_v20, 0.0  ;;  %v3241_v20 = vsel %vm403_vm0, %v7784_v58, 0.0  ;;  %v3497_v58 = vsel %vm403_vm0, %v7821_v49, 0.0 }
 0x7b6   : > { %v3250_v23 = vsel %vm403_vm0, %v7837_v50, 0.0 }
 0x7b8   : > { %3471 = vadd.xlane.f32.xlu1 %v3470_v37  ;;  %v7843_v37 = vpop.permute.xlu1 %3138 }
 0x7b9   : > { %3203 = vadd.xlane.f32.xlu0 %v3202_v31  ;;  %v7845_v31 = vpop.xlane.xlu0 %2539 }
 0x7ba   : > { %9685 = vst [vmem:[#allocation95_spill] sm:$0xff] %v7845_v31 }
 0x7bc   : > { %3218 = vadd.xlane.f32.xlu1 %v3217_v43  ;;  %v7851_v43 = vpop.permute.xlu1 %3398 }
 0x7bd   : > { %3197 = vadd.xlane.f32.xlu0 %v3196_v21  ;;  %v7857_v21 = vpop.permute.xlu0 %3128 }
 0x7be   : > { %v3244_v22 = vsel %vm403_vm0, %v7857_v21, 0.0  ;;  %v3835_v21 = vrot.slane %v7260_v34, %v9540_v44  ;;  %v8015_v44 = vmul.f32 0.03125, %v7617_v28  ;;  %v2738_v28 = vmul.f32 0.03125, %v7625_v51 }
 0x7c0   : > { %3474 = vadd.xlane.f32.xlu1 %v3473_v17  ;;  %v7859_v17 = vpop.xlane.xlu1 %2548 }
 0x7c1   : > { %3459 = vadd.xlane.f32.xlu0 %v3458_v18  ;;  %9686 = vst [vmem:[#allocation96_spill] sm:$0xff] %v7859_v17  ;;  %v7865_v18 = vpop.permute.xlu0 %3388 }
 0x7c4   : > { %3468 = vadd.xlane.f32.xlu1 %v3467_v36  ;;  %v7871_v36 = vpop.xlane.xlu1 %2714 }
 0x7c5   : > { %3453 = vadd.xlane.f32.xlu0 %v3452_v15  ;;  %9687 = vst [vmem:[#allocation97_spill] sm:$0xff] %v7871_v36  ;;  %v7873_v15 = vpop.xlane.xlu0 %2533 }
 0x7c6   : > { %9688 = vst [vmem:[#allocation98_spill] sm:$0xff] %v7873_v15 }
 0x7c8   : > { %3227 = vadd.xlane.f32.xlu1 %v3226_v48  ;;  %v7879_v48 = vpop.permute.xlu1 %3394 }
 0x7c9   : > { %3206 = vadd.xlane.f32.xlu0 %v3205_v55  ;;  %v7885_v55 = vpop.xlane.xlu0 %2699 }
 0x7ca   : > { %9689 = vst [vmem:[#allocation99_spill] sm:$0xff] %v7885_v55 }
 0x7cc   : > { %3221 = vadd.xlane.f32.xlu1 %v3220_v40  ;;  %v7891_v40 = vpop.permute.xlu1 %3148 }
 0x7cd   : > { %3200 = vadd.xlane.f32.xlu0 %v3199_v30  ;;  %v3385_v30 = vpop.permute.xlu0 %3384 }
 0x7ce   : > { %v3500_v50 = vsel %vm403_vm0, %v3385_v30, 0.0 }
 0x7d0   : > { %3483 = vadd.xlane.f32.xlu1 %v3482_v3  ;;  %v7897_v3 = vpop.xlane.xlu1 %2708 }
 0x7d1   : > { %3462 = vadd.xlane.f32.xlu0 %v3461_v9  ;;  %9690 = vst [vmem:[#allocation100_spill] sm:$0xff] %v7897_v3  ;;  %v3135_v9 = vpop.permute.xlu0 %3134  ;;  %v9720_v3 = vld [vmem:[#allocation41_spill] sm:$0xff] }
 0x7d4   : > { %3477 = vadd.xlane.f32.xlu1 %v3476_v57  ;;  %v7903_v57 = vpop.xlane.xlu1 %2563 }
 0x7d5   : > { %3456 = vadd.xlane.f32.xlu0 %v3455_v60  ;;  %9691 = vst [vmem:[#allocation101_spill] sm:$0xff] %v7903_v57  ;;  %v7909_v60 = vpop.xlane.xlu0 %2693 }
 0x7d6   : > { %9692 = vst [vmem:[#allocation102_spill] sm:$0xff] %v7909_v60 }
 0x7d8   : > { %3230 = vadd.xlane.f32.xlu1 %v3229_v10  ;;  %v7915_v10 = vpop.permute.xlu1 %3144 }
 0x7d9   : > { %3209 = vadd.xlane.f32.xlu0 %v3208_v32  ;;  %v7917_v32 = vpop.xlane.xlu0 %2542 }
 0x7da   : > { %9693 = vst [vmem:[#allocation103_spill] sm:$0xff] %v7917_v32  ;;  %v3515_v32 = vsel %vm403_vm0, %v7879_v48, 0.0  ;;  %v2739_v48 = vmul.f32 0.03125, %v7660_v59  ;;  %v9704_v59 = vld [vmem:[#allocation68_spill] sm:$0xff] }
 0x7dc   : > { %3224 = vadd.xlane.f32.xlu1 %v3223_v11  ;;  %v7923_v11 = vpop.permute.xlu1 %3404 }
 0x7dd   : > { %3465 = vadd.xlane.f32.xlu0 %v3464_v0  ;;  %v3131_v0 = vpop.permute.xlu0 %3130 }
 0x7e0   : > { %3486 = vadd.xlane.f32.xlu1 %v3485_v62  ;;  %v7929_v62 = vpop.xlane.xlu1 %2557 }
 0x7e1   : > { %3212 = vadd.xlane.f32.xlu0 %v3211_v33  ;;  %9694 = vst [vmem:[#allocation104_spill] sm:$0xff] %v7929_v62  ;;  %v3391_v33 = vpop.permute.xlu0 %3390  ;;  %v9709_v62 = vld [vmem:[#allocation76_spill] sm:$0xff] }
 0x7e2   : > { %v2742_v57 = vmul.f32 0.03125, %v9709_v62 }
 0x7e4   : > { %3480 = vadd.xlane.f32.xlu1 %v3479_v41  ;;  %v7937_v41 = vpop.xlane.xlu1 %2723 }
 0x7e5   : > { %3239 = vadd.xlane.f32.xlu0 %v3238_v14  ;;  %9695 = vst [vmem:[#allocation105_spill] sm:$0xff] %v7937_v41  ;;  %v7939_v49 = vpop.xlane.xlu0 %2536  ;;  %v3506_v14 = vsel %vm403_vm0, %v7865_v18, 0.0  ;;  %v3247_v18 = vsel %vm403_vm0, %v3131_v0, 0.0 }
 0x7e6   : > { %9696 = vst [vmem:[#allocation106_spill] sm:$0xff] %v7939_v49 }
 0x7e8   : > { %3236 = vadd.xlane.f32.xlu1 %v3235_v61  ;;  %v7944_v61 = vpop.permute.xlu1 %3400 }
 0x7e9   : > { %3233 = vadd.xlane.f32.xlu0 %v3232_v63  ;;  %v3387_v63 = vpop.permute.xlu0 %3386 }
 0x7ec   : > { %3492 = vadd.xlane.f32.xlu1 %v3491_v5  ;;  %v3253_v5 = vsel %vm403_vm0, %v3135_v9, 0.0  ;;  %v3503_v9 = vsel %vm403_vm0, %v3387_v63, 0.0 }
 0x7ed   : > { %3495 = vadd.xlane.f32.xlu0 %v3494_v13  ;;  %v7951_v13 = vpop.permute.xlu1 %3150 }
 0x7f0   : > { %3263 = vadd.xlane.f32.xlu1 %v3262_v53  ;;  %v7953_v53 = vpop.xlane.xlu0 %2696 }
 0x7f1   : > { %3242 = vadd.xlane.f32.xlu0 %v3241_v20  ;;  %9697 = vst [vmem:[#allocation107_spill] sm:$0xff] %v7953_v53  ;;  %v7957_v20 = vpop.xlane.xlu1 %2717 }
 0x7f2   : > { %9698 = vst [vmem:[#allocation108_spill] sm:$0xff] %v7957_v20 }
 0x7f4   : > { %3519 = vadd.xlane.f32.xlu1 %v3518_v4  ;;  %v3137_v30 = vpop.permute.xlu0 %3136  ;;  %v3509_v4 = vsel %vm403_vm0, %v3391_v33, 0.0  ;;  %v2701_v33 = vsel %vm403_vm0, %v7600_v56, 0.0  ;;  %v7991_v56 = vmul.f32 0.03125, %v7581_v27  ;;  %v2728_v27 = vmul.f32 0.03125, %v7623_v42 }
 0x7f5   : > { %3489 = vadd.xlane.f32.xlu0 %v3488_v25  ;;  %v7960_v25 = vpop.xlane.xlu1 %2566 }
 0x7f6   : > { %9699 = vst [vmem:[#allocation109_spill] sm:$0xff] %v7960_v25 }
 0x7f8   : > { %3266 = vadd.xlane.f32.xlu1 %v3265_v54  ;;  %v7962_v34 = vpop.xlane.xlu0 %2545  ;;  %v3256_v54 = vsel %vm403_vm0, %v3137_v30, 0.0 }
 0x7f9   : > { %3498 = vadd.xlane.f32.xlu0 %v3497_v58  ;;  %9700 = vst [vmem:[#allocation110_spill] sm:$0xff] %v7962_v34  ;;  %v7966_v58 = vpop.permute.xlu1 %3146  ;;  %v9706_v34 = vld [vmem:[#allocation69_spill] sm:$0xff] }
 0x7fc   : > { %2726 = vadd.xlane.f32.xlu1 %v2725_v39  ;;  %v3393_v39 = vpop.permute.xlu0 %3392 }
 0x7fd   : > { %3251 = vadd.xlane.f32.xlu0 %v3250_v23  ;;  %v3512_v0 = vsel %vm403_vm0, %v3393_v39, 0.0  ;;  %v7969_v23 = vpop.permute.xlu1 %3406  ;;  %v9541_v39 = vsub.s32 6, %v6268_v19 }
 0x801   : > { %3245 = vadd.xlane.f32.xlu0 %v3244_v22 }
 0x805   : > { %3507 = vadd.xlane.f32.xlu0 %v3506_v14  ;;  %v7975_v14 = vpop.xlane.xlu1 %2560 }
 0x806   : > { %9702 = vst [vmem:[#allocation112_spill] sm:$0xff] %v7975_v14 }
 0x809   : > { %3501 = vadd.xlane.f32.xlu0 %v3500_v50  ;;  %v7979_v63 = vpop.permute.xlu1 %3402 }
 0x80d   : > { %3837 = vrot.lane.b32.xlu1 %v3835_v21, %s6173_s18  ;;  %3254 = vadd.xlane.f32.xlu0 %v3253_v5  ;;  %v3259_v5 = vsel %vm403_vm0, %v7843_v37, 0.0  ;;  %v2729_v37 = vmul.f32 0.03125, %v7606_v35 }
 0x811   : > { %3248 = vadd.xlane.f32.xlu0 %v3247_v18  ;;  %v7986_v18 = vmul.f32 0.03125, %v7554_v52  ;;  %v3521_v52 = vsel %vm403_vm0, %v7851_v43, 0.0  ;;  %v8020_v43 = vld [vmem:[%s9432_s4] sm:$0xff] }
 0x812   : > { %v3795_v42 = vrot.slane %v8020_v43, %v9541_v39 }
 0x815   : > { %3510 = vadd.xlane.f32.xlu0 %v3509_v4 }
 0x819   : > { %3504 = vadd.xlane.f32.xlu0 %v3503_v9  ;;  %v7996_v9 = vmul.f32 0.03125, %v7576_v2 }
 0x81d   : > { %3257 = vadd.xlane.f32.xlu0 %v3256_v54  ;;  %v2730_v54 = vmul.f32 0.03125, %v7594_v26  ;;  %v2760_v26 = vmul.f32 %v7996_v9, %v7996_v9 }
 0x821   : > { %3513 = vadd.xlane.f32.xlu0 %v3512_v0  ;;  %v2762_v0 = vmul.f32 %v7986_v18, %v7986_v18 }
 0x823   : > { %v2794_v35 = vsub.f32 %v2730_v54, %v2762_v0  ;;  %v2792_v54 = vsub.f32 %v2728_v27, %v2760_v26  ;;  %v8032_v0 = vmul.f32 0.03125, %v7644_v16  ;;  %v3274_v27 = vsel %vm403_vm0, %v7891_v40, 0.0 }
 0x825   : > { %2702 = vadd.xlane.f32.xlu0 %v2701_v33  ;;  %v2761_v33 = vmul.f32 %v7991_v56, %v7991_v56  ;;  %v2826_v14 = vmax.f32 %v2794_v35, 0.0  ;;  %v2734_v35 = vmul.f32 0.03125, %v9704_v59 }
 0x826   : > { %v7973_v22 = vpop.xlane.xlu0 %2705 }
 0x827   : > { %9701 = vst [vmem:[#allocation111_spill] sm:$0xff] %v7973_v22  ;;  %v2731_v22 = vmul.f32 0.03125, %v7641_v12  ;;  %v2890_v53 = vadd.f32 1e-05, %v2826_v14 }
 0x829   : > { %5879 = vrsqrt.f32 %v2890_v53 }
 0x82a   : > { %v7977_v50 = vpop.xlane.xlu0 %3191 }
 0x82e   : > { %v7981_v21 = vpop.xlane.xlu0 %3185 }
 0x831   : > { %3260 = vadd.xlane.f32.xlu1 %v3259_v5  ;;  %v7988_v30 = vpop.xlane.xlu1 %2720 }
 0x832   : > { %9703 = vst [vmem:[#allocation113_spill] sm:$0xff] %v7988_v30  ;;  %v7993_v4 = vpop.xlane.xlu0 %3447  ;;  %v8026_v30 = vmul.f32 0.03125, %v7619_v38  ;;  %v8040_v38 = vmul.f32 0.03125, %v7650_v46  ;;  %v2771_v46 = vmul.f32 %v8032_v0, %v8032_v0 }
 0x834   : > { %v2763_v16 = vmul.f32 %v8026_v30, %v8026_v30  ;;  %v2766_v40 = vmul.f32 %v8040_v38, %v8040_v38 }
 0x835   : > { %3522 = vadd.xlane.f32.xlu1 %v3521_v52  ;;  %v8008_v2 = vpop.xlane.xlu1 %3188  ;;  %v2793_v52 = vsub.f32 %v2729_v37, %v2761_v33  ;;  %v2770_v37 = vmul.f32 %v8015_v44, %v8015_v44  ;;  %v2824_v33 = vmax.f32 %v2792_v54, 0.0  ;;  %v2803_v54 = vsub.f32 %v2739_v48, %v2771_v46 }
 0x836   : > { %v8010_v5 = vpop.xlane.xlu0 %3194  ;;  %v2798_v41 = vsub.f32 %v2734_v35, %v2766_v40 }
 0x837   : > { %v2825_v51 = vmax.f32 %v2793_v52, 0.0  ;;  %v2802_v26 = vsub.f32 %v2738_v28, %v2770_v37  ;;  %v9705_v52 = vld [vmem:[#allocation67_spill] sm:$0xff]  ;;  %v9707_v37 = vld [vmem:[#allocation70_spill] sm:$0xff] }
 0x838   : > { %v8057_v39 = vmul.f32 0.03125, %v9705_v52  ;;  %v8067_v49 = vmul.f32 0.03125, %v9707_v37  ;;  %v2830_v35 = vmax.f32 %v2798_v41, 0.0 }
 0x839   : > { %3516 = vadd.xlane.f32.xlu1 %v3515_v32  ;;  %v8047_v32 = vmul.f32 0.03125, %v7656_v1  ;;  %v8049_v12 = vpop.xlane.xlu1 %3444  ;;  %v2737_v1 = vmul.f32 0.03125, %v9706_v34  ;;  %v2889_v59 = vadd.f32 1e-05, %v2825_v51  ;;  %v2888_v34 = vadd.f32 1e-05, %v2824_v33 }
 0x83a   : > { %v8035_v25 = vpop.xlane.xlu0 %3441  ;;  %v2834_v52 = vmax.f32 %v2802_v26, 0.0  ;;  %v2764_v48 = vmul.f32 %v8057_v39, %v8057_v39  ;;  %v3530_v33 = vsel %vm403_vm0, %v7923_v11, 0.0 }
 0x83b   : > { %3797 = vrot.lane.b32.xlu0 %v3795_v42, %s6173_s18  ;;  %v2795_v42 = vsub.f32 %v2731_v22, %v2763_v16  ;;  %v2769_v28 = vmul.f32 %v8047_v32, %v8047_v32  ;;  %v3268_v16 = vsel %vm403_vm0, %v7915_v10, 0.0  ;;  %v2774_v10 = vmul.f32 %v8067_v49, %v8067_v49 }
 0x83c   : > { %5881 = vrsqrt.f32 %v2889_v59  ;;  %v2898_v26 = vadd.f32 1e-05, %v2834_v52 }
 0x83d   : > { %3275 = vadd.xlane.f32.xlu1 %v3274_v27  ;;  %v9708_v27 = vld [vmem:[#allocation71_spill] sm:$0xff]  ;;  %v2827_v14 = vmax.f32 %v2795_v42, 0.0  ;;  %v2801_v46 = vsub.f32 %v2737_v1, %v2769_v28  ;;  %v8075_v60 = vpop.xlane.xlu1 %3215  ;;  %5883 = vrsqrt.f32 %v2888_v34  ;;  %v2806_v1 = vsub.f32 %v2742_v57, %v2774_v10  ;;  %v9710_v10 = vld [vmem:[#allocation37_spill] sm:$0xff] }
 0x83e   : > { %v8060_v20 = vpop.xlane.xlu0 %3450  ;;  %v2732_v22 = vmul.f32 0.03125, %v9708_v27  ;;  %v2835_v27 = vmax.f32 %v2803_v54, 0.0  ;;  %5885 = vrsqrt.f32 %v2898_v26  ;;  %v3277_v57 = vsel %vm403_vm0, %v7951_v13, 0.0 }
 0x83f   : > { %v2891_v42 = vadd.f32 1e-05, %v2827_v14  ;;  %v2833_v62 = vmax.f32 %v2801_v46, 0.0  ;;  %v2838_v41 = vmax.f32 %v2806_v1, 0.0  ;;  %v5880_v46 = vpop.eup %5879 }
 0x840   : > { %v2796_v51 = vsub.f32 %v2732_v22, %v2764_v48  ;;  %v2899_v28 = vadd.f32 1e-05, %v2835_v27  ;;  %v3524_v22 = vsel %vm403_vm0, %v7944_v61, 0.0  ;;  %v9542_v48 = vsub.s32 4, %v6268_v19 }
 0x841   : > { %3269 = vadd.xlane.f32.xlu1 %v3268_v16  ;;  %v8085_v54 = vpop.xlane.xlu1 %3471  ;;  %v2894_v16 = vadd.f32 1e-05, %v2830_v35  ;;  %5887 = vrsqrt.f32 %v2891_v42  ;;  %v2897_v11 = vadd.f32 1e-05, %v2833_v62  ;;  %v2902_v52 = vadd.f32 1e-05, %v2838_v41 }
 0x842   : > { %v8077_v37 = vpop.xlane.xlu0 %3203  ;;  %v2828_v53 = vmax.f32 %v2796_v51, 0.0  ;;  %5889 = vrsqrt.f32 %v2899_v28  ;;  %v3271_v27 = vsel %vm403_vm0, %v7966_v58, 0.0  ;;  %v2858_v51 = vsub.f32 %v9710_v10, %v7986_v18  ;;  %v9712_v62 = vld [vmem:[#allocation38_spill] sm:$0xff] }
 0x843   : > { %5891 = vrsqrt.f32 %v2894_v16  ;;  %v2857_v1 = vsub.f32 %v9712_v62, %v7991_v56  ;;  %v8112_v28 = vrot.slane %v8020_v43, %v9542_v48  ;;  %v9545_v18 = vsub.s32 5, %v6268_v19  ;;  %v9715_v16 = vld [vmem:[#allocation78_spill] sm:$0xff] }
 0x844   : > { %v2892_v34 = vadd.f32 1e-05, %v2828_v53  ;;  %5893 = vrsqrt.f32 %v2897_v11  ;;  %v2954_v58 = vmul.f32 %v5880_v46, %v2858_v51  ;;  %v9714_v53 = vld [vmem:[#allocation39_spill] sm:$0xff]  ;;  %v2735_v11 = vmul.f32 0.03125, %v9715_v16  ;;  %v9721_v19 = vld [vmem:[#allocation42_spill] sm:$0xff] }
 0x845   : > { %3531 = vadd.xlane.f32.xlu1 %v3530_v33  ;;  %v8093_v14 = vpop.xlane.xlu1 %3218  ;;  %v9711_v33 = vld [vmem:[#allocation74_spill] sm:$0xff]  ;;  %9713 = vst [vmem:[#allocation68_spill] sm:$0xff] %v8112_v28  ;;  %v9716_v46 = vld [vmem:[#allocation75_spill] sm:$0xff]  ;;  %v8133_v48 = vrot.slane %v8020_v43, %v9545_v18  ;;  %v2867_v55 = vsub.f32 %v9721_v19, %v8032_v0  ;;  %v9724_v19 = vld [vmem:[#allocation45_spill] sm:$0xff] }
 0x846   : > { %v8083_v40 = vpop.xlane.xlu0 %3197  ;;  %5895 = vrsqrt.f32 %v2892_v34  ;;  %v8103_v26 = vmul.f32 0.03125, %v9711_v33  ;;  %v3533_v34 = vsel %vm403_vm0, %v7969_v23, 0.0  ;;  %v8125_v51 = vmul.f32 0.03125, %v9716_v46 }
 0x847   : > { %5897 = vrsqrt.f32 %v2902_v52  ;;  %v2990_v16 = vmul.f32 %v8112_v28, %v2954_v58  ;;  %9717 = vst [vmem:[#allocation67_spill] sm:$0xff] %v8133_v48  ;;  %v3527_v46 = vsel %vm403_vm0, %v7979_v63, 0.0  ;;  %v2859_v58 = vsub.f32 %v9720_v3, %v8026_v30 }
 0x849   : > { %3525 = vadd.xlane.f32.xlu1 %v3524_v22  ;;  %v5882_v13 = vpop.eup %5881  ;;  %v2856_v22 = vsub.f32 %v9714_v53, %v7996_v9  ;;  %v8118_v41 = vpop.xlane.xlu1 %3474  ;;  %v3026_v0 = vadd.f32 %v8133_v48, %v2990_v16 }
 0x84a   : > { %v8089_v59 = vpop.xlane.xlu0 %3459  ;;  %v5884_v42 = vpop.eup %5883 }
 0x84b   : > { %v5886_v56 = vpop.eup %5885  ;;  %v2952_v52 = vmul.f32 %v5884_v42, %v2856_v22  ;;  %v9719_v22 = vld [vmem:[#allocation79_spill] sm:$0xff] }
 0x84d   : > { %3278 = vadd.xlane.f32.xlu1 %v3277_v57  ;;  %v2953_v57 = vmul.f32 %v5882_v13, %v2857_v1  ;;  %v9718_v13 = vld [vmem:[#allocation40_spill] sm:$0xff]  ;;  %v2988_v18 = vmul.f32 %v8112_v28, %v2952_v52 }
 0x84e   : > { %v8095_v61 = vpop.xlane.xlu0 %3453  ;;  %v5888_v9 = vpop.eup %5887  ;;  %v2866_v42 = vsub.f32 %v9718_v13, %v8015_v44  ;;  %v2772_v44 = vmul.f32 %v8125_v51, %v8125_v51 }
 0x84f   : > { %v5890_v23 = vpop.eup %5889  ;;  %v2989_v15 = vmul.f32 %v8112_v28, %v2953_v57  ;;  %v2955_v57 = vmul.f32 %v5888_v9, %v2859_v58  ;;  %v2860_v9 = vsub.f32 %v9724_v19, %v8057_v39 }
 0x850   : > { %v5892_v43 = vpop.eup %5891  ;;  %v2962_v36 = vmul.f32 %v5886_v56, %v2866_v42  ;;  %v2963_v17 = vmul.f32 %v5890_v23, %v2867_v55  ;;  %v3024_v55 = vadd.f32 %v8133_v48, %v2988_v18  ;;  %v5539_v23 = vmul.f32 -1.442695, %v3026_v0 }
 0x851   : > { %3272 = vadd.xlane.f32.xlu1 %v3271_v27  ;;  %v2767_v27 = vmul.f32 %v8103_v26, %v8103_v26  ;;  %v5894_v63 = vpop.eup %5893  ;;  %v3025_v45 = vadd.f32 %v8133_v48, %v2989_v15  ;;  %v2991_v16 = vmul.f32 %v8112_v28, %v2955_v57 }
 0x852   : > { %v8105_v35 = vpop.xlane.xlu0 %3206  ;;  %v2998_v29 = vmul.f32 %v8112_v28, %v2962_v36  ;;  %5899 = vpow2.f32 %v5539_v23 }
 0x853   : > { %v2799_v1 = vsub.f32 %v2735_v11, %v2767_v27  ;;  %v8148_v11 = vpop.xlane.xlu1 %3468  ;;  %v5896_v42 = vpop.eup %5895  ;;  %v5538_v39 = vmul.f32 -1.442695, %v3025_v45 }
 0x854   : > { %v2956_v15 = vmul.f32 %v5896_v42, %v2860_v9  ;;  %v3034_v57 = vadd.f32 %v8133_v48, %v2998_v29 }
 0x855   : > { %3534 = vadd.xlane.f32.xlu1 %v3533_v34  ;;  %v2740_v34 = vmul.f32 0.03125, %v9719_v22  ;;  %v9722_v22 = vld [vmem:[#allocation43_spill] sm:$0xff]  ;;  %v2831_v52 = vmax.f32 %v2799_v1, 0.0  ;;  %v9725_v1 = vld [vmem:[#allocation46_spill] sm:$0xff] }
 0x856   : > { %v8127_v33 = vpop.xlane.xlu0 %3200  ;;  %v2862_v30 = vsub.f32 %v9722_v22, %v8040_v38  ;;  %v5898_v38 = vpop.eup %5897  ;;  %v2992_v0 = vmul.f32 %v8112_v28, %v2956_v15  ;;  %v5547_v29 = vmul.f32 -1.442695, %v3034_v57 }
 0x857   : > { %v2804_v56 = vsub.f32 %v2740_v34, %v2772_v44  ;;  %v2870_v34 = vsub.f32 %v9725_v1, %v8067_v49  ;;  %v8168_v44 = vpop.xlane.xlu1 %3227  ;;  %v3027_v49 = vadd.f32 %v8133_v48, %v2991_v16 }
 0x858   : > { %v2958_v6 = vmul.f32 %v5892_v43, %v2862_v30  ;;  %v2895_v43 = vadd.f32 1e-05, %v2831_v52 }
 0x859   : > { %3528 = vadd.xlane.f32.xlu1 %v3527_v46  ;;  %v9723_v46 = vld [vmem:[#allocation44_spill] sm:$0xff]  ;;  %v2836_v36 = vmax.f32 %v2804_v56, 0.0  ;;  %v2966_v18 = vmul.f32 %v5898_v38, %v2870_v34  ;;  %v5540_v16 = vmul.f32 -1.442695, %v3027_v49 }
 0x85a   : > { %v8150_v27 = vpop.xlane.xlu0 %3462  ;;  %v2865_v31 = vsub.f32 %v9723_v46, %v8047_v32  ;;  %v2999_v32 = vmul.f32 %v8112_v28, %v2963_v17  ;;  %v5537_v46 = vmul.f32 -1.442695, %v3024_v55  ;;  %5901 = vrsqrt.f32 %v2895_v43 }
 0x85b   : > { %v2900_v52 = vadd.f32 1e-05, %v2836_v36  ;;  %5903 = vpow2.f32 %v5538_v39  ;;  %v8180_v42 = vpop.xlane.xlu1 %3221 }
 0x85c   : > { %v2961_v58 = vmul.f32 %v5894_v63, %v2865_v31  ;;  %v2994_v31 = vmul.f32 %v8112_v28, %v2958_v6  ;;  %v3035_v56 = vadd.f32 %v8133_v48, %v2999_v32  ;;  %v3002_v6 = vmul.f32 %v8112_v28, %v2966_v18 }
 0x85d   : > { %5905 = vpow2.f32 %v5537_v46  ;;  %v3028_v32 = vadd.f32 %v8133_v48, %v2992_v0 }
 0x85e   : > { %v8161_v13 = vpop.xlane.xlu0 %3456  ;;  %v2997_v63 = vmul.f32 %v8112_v28, %v2961_v58  ;;  %v3030_v45 = vadd.f32 %v8133_v48, %v2994_v31  ;;  %5907 = vrsqrt.f32 %v2900_v52  ;;  %v5548_v23 = vmul.f32 -1.442695, %v3035_v56  ;;  %v9726_v56 = vld [vmem:[#allocation47_spill] sm:$0xff] }
 0x85f   : > { %5909 = vpow2.f32 %v5547_v29  ;;  %v3038_v46 = vadd.f32 %v8133_v48, %v3002_v6  ;;  %v8189_v39 = vpop.xlane.xlu1 %3483  ;;  %v5900_v49 = vpop.eup %5899 }
 0x860   : > { %v3033_v58 = vadd.f32 %v8133_v48, %v2997_v63  ;;  %v5543_v15 = vmul.f32 -1.442695, %v3030_v45  ;;  %5911 = vpow2.f32 %v5540_v16  ;;  %v5541_v63 = vmul.f32 -1.442695, %v3028_v32 }
 0x861   : > { %5913 = vpow2.f32 %v5548_v23  ;;  %v5551_v57 = vmul.f32 -1.442695, %v3038_v46  ;;  %v2863_v45 = vsub.f32 %v9726_v56, %v8103_v26  ;;  %v3970_v32 = vadd.f32 1.0, %v5900_v49  ;;  %v9730_v46 = vld [vmem:[#allocation80_spill] sm:$0xff] }
 0x862   : > { %v3210_v30 = vpop.xlane.xlu0 %3209  ;;  %v5546_v36 = vmul.f32 -1.442695, %v3033_v58  ;;  %5915 = vpow2.f32 %v5543_v15  ;;  %v9729_v15 = vld [vmem:[#allocation48_spill] sm:$0xff]  ;;  %v2733_v26 = vmul.f32 0.03125, %v9730_v46 }
 0x863   : > { %v8173_v17 = vmul.f32 0.03125, %v3210_v30  ;;  %v8193_v6 = vpop.xlane.xlu1 %3477 }
 0x864   : > { %5917 = vpow2.f32 %v5546_v36  ;;  %v2868_v36 = vsub.f32 %v9729_v15, %v8125_v51 }
 0x865   : > { %v3576_v55 = vmul.f32 %v8173_v17, %v8173_v17 }
 0x866   : > { %v3466_v9 = vpop.xlane.xlu0 %3465 }
 0x867   : > { %v3544_v38 = vmul.f32 0.03125, %v3466_v9  ;;  %v5902_v0 = vpop.eup %5901  ;;  %v8213_v51 = vpop.xlane.xlu1 %3230 }
 0x868   : > { %v5904_v52 = vpop.eup %5903  ;;  %v2959_v16 = vmul.f32 %v5902_v0, %v2863_v45 }
 0x869   : > { %v3608_v34 = vsub.f32 %v3544_v38, %v3576_v55  ;;  %v9728_v55 = vld [vmem:[#allocation77_spill] sm:$0xff] }
 0x86a   : > { %v8186_v43 = vpop.xlane.xlu0 %3212  ;;  %v5906_v29 = vpop.eup %5905  ;;  %v8200_v38 = vmul.f32 0.03125, %v9728_v55  ;;  %v2995_v0 = vmul.f32 %v8112_v28, %v2959_v16  ;;  %v9734_v16 = vld [vmem:[#allocation82_spill] sm:$0xff] }
 0x86b   : > { %v3640_v31 = vmax.f32 %v3608_v34, 0.0  ;;  %v5908_v23 = vpop.eup %5907  ;;  %v3969_v34 = vadd.f32 1.0, %v5904_v52 }
 0x86c   : > { %v2765_v49 = vmul.f32 %v8200_v38, %v8200_v38  ;;  %v2964_v52 = vmul.f32 %v5908_v23, %v2868_v36  ;;  %v8221_v23 = vmul.f32 0.03125, %v9734_v16  ;;  %v8230_v16 = vpop.xlane.xlu1 %3224 }
 0x86d   : > { %v3704_v18 = vadd.f32 1e-05, %v3640_v31 }
 0x86e   : > { %v3240_v30 = vpop.xlane.xlu0 %3239  ;;  %v2797_v1 = vsub.f32 %v2733_v26, %v2765_v49  ;;  %9735 = vst [vmem:[#allocation71_spill] sm:$0xff] %v8221_v23  ;;  %v9737_v49 = vld [vmem:[#allocation84_spill] sm:$0xff] }
 0x86f   : > { %5919 = vrsqrt.f32 %v3704_v18  ;;  %v8197_v58 = vmul.f32 0.03125, %v3240_v30  ;;  %v5910_v18 = vpop.eup %5909 }
 0x870   : > { %5921 = vpow2.f32 %v5541_v63  ;;  %v3968_v63 = vadd.f32 1.0, %v5906_v29  ;;  %v5912_v56 = vpop.eup %5911  ;;  %v9732_v29 = vld [vmem:[#allocation85_spill] sm:$0xff] }
 0x871   : > { %5923 = vpow2.f32 %v5551_v57  ;;  %v3586_v30 = vmul.f32 %v8197_v58, %v8197_v58  ;;  %v5914_v45 = vpop.eup %5913  ;;  %v2743_v46 = vmul.f32 0.03125, %v9732_v29 }
 0x872   : > { %v8195_v9 = vpop.xlane.xlu0 %3233  ;;  %5925 = vrcp.f32 %v3970_v32  ;;  %v9736_v32 = vld [vmem:[#allocation52_spill] sm:$0xff]  ;;  %v3979_v26 = vadd.f32 1.0, %v5914_v45 }
 0x873   : > { %9727 = vst [vmem:[#allocation69_spill] sm:$0xff] %v8195_v9  ;;  %v9731_v9 = vld [vmem:[#allocation81_spill] sm:$0xff]  ;;  %5927 = vrcp.f32 %v3969_v34  ;;  %v3672_v36 = vsub.f32 %v9736_v32, %v8173_v17  ;;  %v3000_v34 = vmul.f32 %v8112_v28, %v2964_v52  ;;  %v2829_v32 = vmax.f32 %v2797_v1, 0.0 }
 0x874   : > { %v8206_v57 = vmul.f32 0.03125, %v9731_v9  ;;  %v5916_v9 = vpop.eup %5915  ;;  %5929 = vrcp.f32 %v3968_v63 }
 0x875   : > { %v5918_v22 = vpop.eup %5917  ;;  %v3974_v17 = vadd.f32 1.0, %v5916_v9  ;;  %v3036_v52 = vadd.f32 %v8133_v48, %v3000_v34 }
 0x876   : > { %v3496_v31 = vpop.xlane.xlu0 %3495  ;;  %v2775_v3 = vmul.f32 %v8206_v57, %v8206_v57 }
 0x877   : > { %v3554_v55 = vmul.f32 0.03125, %v3496_v31  ;;  %v3978_v31 = vadd.f32 1.0, %v5910_v18 }
 0x878   : > { %v2807_v18 = vsub.f32 %v2743_v46, %v2775_v3 }
 0x879   : > { %v3618_v15 = vsub.f32 %v3554_v55, %v3586_v30  ;;  %v3971_v30 = vadd.f32 1.0, %v5912_v56  ;;  %v3031_v55 = vadd.f32 %v8133_v48, %v2995_v0  ;;  %5931 = vrcp.f32 %v3978_v31 }
 0x87a   : > { %v8216_v19 = vpop.xlane.xlu0 %3242  ;;  %v2768_v56 = vmul.f32 %v8221_v23, %v8221_v23  ;;  %v3977_v0 = vadd.f32 1.0, %v5918_v22  ;;  %v2893_v31 = vadd.f32 1e-05, %v2829_v32  ;;  %v8246_v22 = vpop.xlane.xlu1 %3486  ;;  %v9744_v32 = vld [vmem:[#allocation86_spill] sm:$0xff] }
 0x87b   : > { %9733 = vst [vmem:[#allocation70_spill] sm:$0xff] %v8216_v19  ;;  %v3650_v62 = vmax.f32 %v3618_v15, 0.0  ;;  %v2736_v19 = vmul.f32 0.03125, %v9737_v49  ;;  %v5544_v46 = vmul.f32 -1.442695, %v3031_v55 }
 0x87c   : > { %v5920_v29 = vpop.eup %5919 }
 0x87d   : > { %v5922_v63 = vpop.eup %5921  ;;  %v3714_v53 = vadd.f32 1e-05, %v3650_v62  ;;  %v8228_v10 = vmul.f32 %v5920_v29, %v3672_v36  ;;  %v2839_v62 = vmax.f32 %v2807_v18, 0.0  ;;  %v2800_v45 = vsub.f32 %v2736_v19, %v2768_v56  ;;  %v9739_v29 = vld [vmem:[#allocation83_spill] sm:$0xff] }
 0x87e   : > { %v8232_v8 = vpop.xlane.xlu0 %3489  ;;  %v5924_v15 = vpop.eup %5923  ;;  %v3972_v3 = vadd.f32 1.0, %v5922_v63  ;;  %v8238_v36 = vmul.f32 0.03125, %v7977_v50  ;;  %v8243_v49 = vmul.f32 0.03125, %v9739_v29  ;;  %v5549_v19 = vmul.f32 -1.442695, %v3036_v52  ;;  %v9748_v29 = vld [vmem:[#allocation90_spill] sm:$0xff] }
 0x87f   : > { %9738 = vst [vmem:[#allocation76_spill] sm:$0xff] %v8228_v10  ;;  %5933 = vrsqrt.f32 %v3714_v53  ;;  %v3982_v1 = vadd.f32 1.0, %v5924_v15  ;;  %v3538_v53 = vmul.f32 0.03125, %v7993_v4  ;;  %v8248_v34 = vpop.eup %5925  ;;  %v2832_v50 = vmax.f32 %v2800_v45, 0.0 }
 0x880   : > { %5935 = vrcp.f32 %v3971_v30  ;;  %9740 = vst [vmem:[#allocation74_spill] sm:$0xff] %v8243_v49  ;;  %9741 = vst [vmem:[#allocation78_spill] sm:$0xff] %v8248_v34  ;;  %v2903_v30 = vadd.f32 1e-05, %v2839_v62  ;;  %v8253_v63 = vpop.eup %5927  ;;  %v8256_v18 = vmul.f32 0.03125, %v9744_v32  ;;  %v3570_v4 = vmul.f32 %v8238_v36, %v8238_v36 }
 0x881   : > { %5937 = vrcp.f32 %v3979_v26  ;;  %v9742_v26 = vld [vmem:[#allocation87_spill] sm:$0xff]  ;;  %9743 = vst [vmem:[#allocation75_spill] sm:$0xff] %v8253_v63  ;;  %v8260_v15 = vpop.eup %5929  ;;  %v8264_v56 = vmul.f32 %v8243_v49, %v8243_v49  ;;  %v8272_v62 = vmul.f32 0.03125, %v7981_v21  ;;  %v8287_v21 = vmul.f32 0.03125, %v8010_v5 }
 0x882   : > { %v8240_v9 = vpop.xlane.xlu0 %3498  ;;  %5939 = vrcp.f32 %v3974_v17  ;;  %v8251_v55 = vmul.f32 0.03125, %v9742_v26  ;;  %9745 = vst [vmem:[#allocation79_spill] sm:$0xff] %v8256_v18  ;;  %9746 = vst [vmem:[#allocation77_spill] sm:$0xff] %v8260_v15  ;;  %v3602_v45 = vsub.f32 %v3538_v53, %v3570_v4  ;;  %v8284_v26 = vmul.f32 0.03125, %v9748_v29  ;;  %v9751_v4 = vld [vmem:[#allocation53_spill] sm:$0xff] }
 0x883   : > { %5941 = vrcp.f32 %v3977_v0  ;;  %v8267_v0 = vmul.f32 0.03125, %v8008_v2  ;;  %v8281_v2 = vmul.f32 %v8256_v18, %v8256_v18  ;;  %v3536_v53 = vmul.f32 0.03125, %v8035_v25 }
 0x884   : > { %5943 = vrcp.f32 %v3972_v3  ;;  %v9747_v3 = vld [vmem:[#allocation49_spill] sm:$0xff]  ;;  %v8299_v32 = vmul.f32 0.03125, %v8075_v60  ;;  %v3682_v29 = vsub.f32 %v9751_v4, %v8197_v58  ;;  %v3568_v25 = vmul.f32 %v8272_v62, %v8272_v62 }
 0x885   : > { %5945 = vpow2.f32 %v5544_v46  ;;  %v8274_v46 = vadd.f32 1e-05, %v2832_v50  ;;  %v3539_v63 = vmul.f32 0.03125, %v8060_v20  ;;  %v3546_v60 = vmul.f32 0.03125, %v8085_v54 }
 0x886   : > { %v3252_v17 = vpop.xlane.xlu0 %3251  ;;  %5947 = vrcp.f32 %v3982_v1  ;;  %v8294_v50 = vpop.eup %5931  ;;  %v3634_v1 = vmax.f32 %v3602_v45, 0.0  ;;  %v8315_v18 = vmul.f32 0.03125, %v8077_v37  ;;  %v3571_v45 = vmul.f32 %v8287_v21, %v8287_v21 }
 0x887   : > { %5949 = vrsqrt.f32 %v2893_v31  ;;  %v3537_v31 = vmul.f32 0.03125, %v8049_v12  ;;  %9750 = vst [vmem:[#allocation81_spill] sm:$0xff] %v8294_v50  ;;  %v3569_v12 = vmul.f32 %v8267_v0, %v8267_v0  ;;  %v8303_v52 = vmul.f32 0.03125, %v3252_v17 }
 0x888   : > { %5951 = vpow2.f32 %v5549_v19  ;;  %v8290_v19 = vpop.xlane.xlu1 %3480  ;;  %v8309_v50 = vmul.f32 0.03125, %v8093_v14  ;;  %v3600_v4 = vsub.f32 %v3536_v53, %v3568_v25  ;;  %v8324_v20 = vmul.f32 0.03125, %v8083_v40 }
 0x889   : > { %5953 = vrsqrt.f32 %v2903_v30  ;;  %v3601_v34 = vsub.f32 %v3537_v31, %v3569_v12  ;;  %v3547_v14 = vmul.f32 0.03125, %v8118_v41  ;;  %v3578_v37 = vmul.f32 %v8299_v32, %v8299_v32 }
 0x88a   : > { %v8292_v30 = vpop.xlane.xlu0 %3245  ;;  %v3542_v54 = vmul.f32 0.03125, %v8089_v59  ;;  %v3590_v12 = vmul.f32 %v8303_v52, %v8303_v52  ;;  %v3603_v53 = vsub.f32 %v3539_v63, %v3571_v45  ;;  %v3579_v40 = vmul.f32 %v8309_v50, %v8309_v50 }
 0x88b   : > { %9749 = vst [vmem:[#allocation80_spill] sm:$0xff] %v8292_v30  ;;  %v3540_v41 = vmul.f32 0.03125, %v8095_v61  ;;  %v8340_v25 = vmul.f32 0.03125, %v8168_v44  ;;  %v3633_v59 = vmax.f32 %v3601_v34, 0.0  ;;  %v3610_v48 = vsub.f32 %v3546_v60, %v3578_v37 }
 0x88c   : > { %v5934_v5 = vpop.eup %5933  ;;  %v3572_v63 = vmul.f32 %v8324_v20, %v8324_v20  ;;  %v3611_v45 = vsub.f32 %v3547_v14, %v3579_v40  ;;  %v8353_v61 = vmul.f32 0.03125, %v8105_v35  ;;  %v3550_v44 = vmul.f32 0.03125, %v8189_v39  ;;  %v9762_v40 = vld [vmem:[#allocation88_spill] sm:$0xff] }
 0x88d   : > { %v8311_v15 = vpop.eup %5935  ;;  %v8317_v58 = vmul.f32 %v5934_v5, %v3682_v29  ;;  %v3698_v34 = vadd.f32 1e-05, %v3634_v1  ;;  %v3632_v60 = vmax.f32 %v3600_v4, 0.0  ;;  %v3582_v10 = vmul.f32 %v8340_v25, %v8340_v25 }
 0x88e   : > { %9752 = vst [vmem:[#allocation85_spill] sm:$0xff] %v8311_v15  ;;  %v8319_v17 = vpop.eup %5937  ;;  %v3508_v15 = vpop.xlane.xlu0 %3507  ;;  %v3543_v14 = vmul.f32 0.03125, %v8150_v27  ;;  %v8366_v39 = vmul.f32 0.03125, %v9762_v40  ;;  %v3642_v30 = vmax.f32 %v3610_v48, 0.0  ;;  %v3643_v4 = vmax.f32 %v3611_v45, 0.0 }
 0x88f   : > { %9753 = vst [vmem:[#allocation82_spill] sm:$0xff] %v8317_v58  ;;  %9754 = vst [vmem:[#allocation84_spill] sm:$0xff] %v8319_v17  ;;  %v8327_v31 = vpop.eup %5939  ;;  %v3558_v29 = vmul.f32 0.03125, %v3508_v15  ;;  %v3574_v15 = vmul.f32 %v8315_v18, %v8315_v18  ;;  %v3541_v40 = vmul.f32 0.03125, %v8161_v13 }
 0x890   : > { %9755 = vst [vmem:[#allocation83_spill] sm:$0xff] %v8327_v31  ;;  %v8334_v5 = vpop.eup %5941  ;;  %v8342_v31 = vpop.xlane.xlu1 %3236  ;;  %9763 = vst [vmem:[#allocation88_spill] sm:$0xff] %v8366_v39 }
 0x891   : > { %9756 = vst [vmem:[#allocation87_spill] sm:$0xff] %v8334_v5  ;;  %v8344_v17 = vpop.eup %5943  ;;  %v3622_v49 = vsub.f32 %v3558_v29, %v3590_v12  ;;  %v3606_v37 = vsub.f32 %v3542_v54, %v3574_v15  ;;  %v3635_v29 = vmax.f32 %v3603_v53, 0.0  ;;  %v8373_v54 = vmul.f32 0.03125, %v8127_v33 }
 0x892   : > { %9757 = vst [vmem:[#allocation86_spill] sm:$0xff] %v8344_v17  ;;  %v8348_v5 = vpop.eup %5945  ;;  %v8356_v23 = vpop.xlane.xlu0 %3501  ;;  %v3614_v53 = vsub.f32 %v3550_v44, %v3582_v10  ;;  %v2810_v15 = vsub.f32 %v8284_v26, %v8281_v2  ;;  %v3706_v33 = vadd.f32 1e-05, %v3642_v30  ;;  %v8384_v10 = vmul.f32 0.03125, %v8186_v43 }
 0x893   : > { %9758 = vst [vmem:[#allocation49_spill] sm:$0xff] %v8348_v5  ;;  %9759 = vst [vmem:[#allocation90_spill] sm:$0xff] %v8356_v23  ;;  %v8358_v17 = vpop.eup %5947  ;;  %v3654_v58 = vmax.f32 %v3622_v49, 0.0  ;;  %v3604_v5 = vsub.f32 %v3540_v41, %v3572_v63  ;;  %v3697_v23 = vadd.f32 1e-05, %v3633_v59  ;;  %v3575_v49 = vmul.f32 %v8353_v61, %v8353_v61 }
 0x894   : > { %9760 = vst [vmem:[#allocation114_spill] sm:$0xff] %v8358_v17  ;;  %v5950_v12 = vpop.eup %5949  ;;  %v8375_v41 = vpop.xlane.xlu1 %3492  ;;  %v3696_v59 = vadd.f32 1e-05, %v3632_v60  ;;  %v3638_v48 = vmax.f32 %v3606_v37, 0.0  ;;  %v3707_v44 = vadd.f32 1e-05, %v3643_v4  ;;  %v3573_v2 = vmul.f32 %v8373_v54, %v8373_v54 }
 0x895   : > { %v8363_v35 = vpop.eup %5951  ;;  %v3718_v17 = vadd.f32 1e-05, %v3654_v58  ;;  %v3699_v58 = vadd.f32 1e-05, %v3635_v29  ;;  %v3636_v63 = vmax.f32 %v3604_v5, 0.0  ;;  %v3607_v45 = vsub.f32 %v3543_v14, %v3575_v49  ;;  %v9765_v37 = vld [vmem:[#allocation89_spill] sm:$0xff] }
 0x896   : > { %9761 = vst [vmem:[#allocation115_spill] sm:$0xff] %v8363_v35  ;;  %v8368_v1 = vpop.eup %5953  ;;  %v8377_v27 = vpop.xlane.xlu0 %3254  ;;  %v2745_v35 = vmul.f32 0.03125, %v7782_v24  ;;  %v3646_v26 = vmax.f32 %v3614_v53, 0.0  ;;  %v2777_v24 = vmul.f32 %v8366_v39, %v8366_v39  ;;  %v3702_v13 = vadd.f32 1e-05, %v3638_v48 }
 0x897   : > { %5955 = vrsqrt.f32 %v3718_v17  ;;  %v9764_v17 = vsub.f32 %v8251_v55, %v8264_v56  ;;  %v3700_v43 = vadd.f32 1e-05, %v3636_v63  ;;  %v3639_v30 = vmax.f32 %v3607_v45, 0.0 }
 0x898   : > { %5957 = vrsqrt.f32 %v3698_v34  ;;  %v8395_v34 = vpop.xlane.xlu1 %3263  ;;  %v8398_v29 = vmul.f32 0.03125, %v9765_v37  ;;  %v2842_v14 = vmax.f32 %v2810_v15, 0.0  ;;  %v3577_v55 = vmul.f32 %v8384_v10, %v8384_v10 }
 0x899   : > { %5959 = vrsqrt.f32 %v3697_v23  ;;  %v2837_v5 = vmax.f32 %v9764_v17, 0.0  ;;  %v3605_v23 = vsub.f32 %v3541_v40, %v3573_v2  ;;  %v2809_v56 = vsub.f32 %v2745_v35, %v2777_v24  ;;  %v9770_v24 = vld [vmem:[#allocation50_spill] sm:$0xff] }
 0x89a   : > { %v8388_v60 = vpop.xlane.xlu0 %3248  ;;  %5961 = vrsqrt.f32 %v3696_v59  ;;  %9766 = vst [vmem:[#allocation89_spill] sm:$0xff] %v8398_v29  ;;  %v8403_v4 = vmul.f32 0.03125, %v8180_v42  ;;  %v3710_v49 = vadd.f32 1e-05, %v3646_v26  ;;  %v9767_v59 = vsub.f32 %v9747_v3, %v8200_v38  ;;  %v9769_v26 = vld [vmem:[#allocation59_spill] sm:$0xff] }
 0x89b   : > { %5963 = vrsqrt.f32 %v3699_v58  ;;  %v2744_v58 = vmul.f32 0.03125, %v7809_v47  ;;  %v3545_v15 = vmul.f32 0.03125, %v8148_v11  ;;  %v3703_v63 = vadd.f32 1e-05, %v3639_v30 }
 0x89c   : > { %5965 = vrsqrt.f32 %v3706_v33  ;;  %v2957_v48 = vmul.f32 %v5950_v12, %v9767_v59  ;;  %v3548_v35 = vmul.f32 0.03125, %v8193_v6  ;;  %v3637_v45 = vmax.f32 %v3605_v23, 0.0  ;;  %v8418_v12 = vpop.xlane.xlu1 %3519 }
 0x89d   : > { %5967 = vrsqrt.f32 %v3707_v44  ;;  %v2901_v42 = vadd.f32 1e-05, %v2837_v5  ;;  %v2776_v40 = vmul.f32 %v8398_v29, %v8398_v29  ;;  %v3609_v33 = vsub.f32 %v3545_v15, %v3577_v55  ;;  %v9772_v15 = vld [vmem:[#allocation37_spill] sm:$0xff] }
 0x89e   : > { %v8405_v53 = vpop.xlane.xlu0 %3510  ;;  %5969 = vrsqrt.f32 %v3702_v13  ;;  %v2906_v44 = vadd.f32 1e-05, %v2842_v14  ;;  %v2841_v38 = vmax.f32 %v2809_v56, 0.0  ;;  %v3580_v47 = vmul.f32 %v8403_v4, %v8403_v4  ;;  %v9776_v13 = vld [vmem:[#allocation40_spill] sm:$0xff] }
 0x89f   : > { %5971 = vrsqrt.f32 %v3700_v43  ;;  %v8423_v6 = vmul.f32 0.03125, %v7795_v7  ;;  %v2808_v2 = vsub.f32 %v2744_v58, %v2776_v40  ;;  %v3686_v17 = vsub.f32 %v9769_v26, %v8303_v52  ;;  %v9771_v52 = vld [vmem:[#allocation91_spill] sm:$0xff] }
 0x8a0   : > { %5973 = vrsqrt.f32 %v8274_v46  ;;  %v8426_v46 = vmul.f32 0.03125, %v8213_v51  ;;  %v3612_v43 = vsub.f32 %v3548_v35, %v3580_v47  ;;  %v3701_v30 = vadd.f32 1e-05, %v3637_v45  ;;  %v9773_v45 = vld [vmem:[#allocation39_spill] sm:$0xff]  ;;  %v9774_v47 = vld [vmem:[#allocation38_spill] sm:$0xff] }
 0x8a1   : > { %5975 = vrsqrt.f32 %v3710_v49  ;;  %9768 = vst [vmem:[#allocation116_spill] sm:$0xff] %v8423_v6  ;;  %v3551_v23 = vmul.f32 0.03125, %v8246_v22  ;;  %v3641_v37 = vmax.f32 %v3609_v33, 0.0  ;;  %v8436_v51 = vmul.f32 %v8112_v28, %v2957_v48 }
 0x8a2   : > { %v8420_v11 = vpop.xlane.xlu0 %3504  ;;  %5977 = vrsqrt.f32 %v3703_v63  ;;  %v8438_v55 = vadd.f32 1e-05, %v2841_v38  ;;  %v8441_v56 = vmul.f32 0.03125, %v9771_v52  ;;  %v8447_v58 = vmul.f32 %v8423_v6, %v8423_v6 }
 0x8a3   : > { %5979 = vrsqrt.f32 %v2901_v42  ;;  %v8449_v22 = vmax.f32 %v2808_v2, 0.0  ;;  %v3666_v63 = vsub.f32 %v9772_v15, %v8238_v36  ;;  %v3583_v48 = vmul.f32 %v8426_v46, %v8426_v46  ;;  %v9775_v36 = vld [vmem:[#allocation41_spill] sm:$0xff] }
 0x8a4   : > { %v5956_v5 = vpop.eup %5955  ;;  %5981 = vrsqrt.f32 %v2906_v44  ;;  %v3664_v42 = vsub.f32 %v9773_v45, %v8272_v62  ;;  %v3644_v40 = vmax.f32 %v3612_v43, 0.0  ;;  %v8458_v33 = vmul.f32 0.03125, %v8230_v16  ;;  %v8460_v44 = vpop.xlane.xlu1 %3266  ;;  %v9777_v43 = vld [vmem:[#allocation43_spill] sm:$0xff]  ;;  %v9778_v16 = vld [vmem:[#allocation42_spill] sm:$0xff] }
 0x8a5   : > { %v8433_v7 = vmul.f32 %v5956_v5, %v3686_v17  ;;  %v5958_v14 = vpop.eup %5957  ;;  %5983 = vrsqrt.f32 %v3701_v30  ;;  %v3665_v2 = vsub.f32 %v9774_v47, %v8267_v0  ;;  %v3667_v17 = vsub.f32 %v9775_v36, %v8287_v21  ;;  %v9779_v47 = vld [vmem:[#allocation45_spill] sm:$0xff] }
 0x8a6   : > { %v8443_v49 = vpop.xlane.xlu0 %3257  ;;  %v5960_v59 = vpop.eup %5959  ;;  %v3615_v5 = vsub.f32 %v3551_v23, %v3583_v48  ;;  %v3705_v52 = vadd.f32 1e-05, %v3641_v37  ;;  %v3674_v62 = vsub.f32 %v9776_v13, %v8299_v32  ;;  %v3670_v30 = vsub.f32 %v9777_v43, %v8315_v18  ;;  %v9780_v32 = vld [vmem:[#allocation46_spill] sm:$0xff]  ;;  %v9781_v18 = vld [vmem:[#allocation47_spill] sm:$0xff] }
 0x8a7   : > { %v5962_v35 = vpop.eup %5961  ;;  %v3675_v45 = vsub.f32 %v9778_v16, %v8309_v50  ;;  %v3549_v26 = vmul.f32 0.03125, %v8290_v19  ;;  %v3668_v21 = vsub.f32 %v9779_v47, %v8324_v20  ;;  %v3762_v23 = vmul.f32 %v5958_v14, %v3666_v63  ;;  %v9782_v20 = vld [vmem:[#allocation69_spill] sm:$0xff] }
 0x8a8   : > { %v5964_v38 = vpop.eup %5963  ;;  %v3760_v37 = vmul.f32 %v5962_v35, %v3664_v42  ;;  %v3761_v48 = vmul.f32 %v5960_v59, %v3665_v2  ;;  %v3678_v13 = vsub.f32 %v9780_v32, %v8340_v25  ;;  %v3671_v43 = vsub.f32 %v9781_v18, %v8353_v61  ;;  %v9783_v25 = vld [vmem:[#allocation48_spill] sm:$0xff]  ;;  %v8493_v61 = vpop.xlane.xlu1 %2726  ;;  %v9784_v18 = vld [vmem:[#allocation70_spill] sm:$0xff] }
 0x8a9   : > { %v5966_v15 = vpop.eup %5965  ;;  %v3708_v29 = vadd.f32 1e-05, %v3644_v40  ;;  %v3581_v19 = vmul.f32 %v8458_v33, %v8458_v33  ;;  %v3647_v16 = vmax.f32 %v3615_v5, 0.0  ;;  %5985 = vrsqrt.f32 %v3705_v52 }
 0x8aa   : > { %v8473_v6 = vpop.xlane.xlu0 %3513  ;;  %v5968_v0 = vpop.eup %5967  ;;  %v8484_v39 = vmul.f32 0.03125, %v8342_v31  ;;  %v8487_v14 = vmul.f32 0.03125, %v9782_v20  ;;  %v3763_v40 = vmul.f32 %v5964_v38, %v3667_v17  ;;  %v3770_v2 = vmul.f32 %v5966_v15, %v3674_v62  ;;  %v9785_v38 = vld [vmem:[#allocation44_spill] sm:$0xff] }
 0x8ab   : > { %v5970_v36 = vpop.eup %5969  ;;  %v3613_v35 = vsub.f32 %v3549_v26, %v3581_v19  ;;  %v3669_v31 = vsub.f32 %v9747_v3, %v8373_v54  ;;  %v3553_v52 = vmul.f32 0.03125, %v8375_v41  ;;  %v3552_v47 = vmul.f32 0.03125, %v8232_v8 }
 0x8ac   : > { %v5972_v50 = vpop.eup %5971  ;;  %v8501_v32 = vmul.f32 %v5968_v0, %v3675_v45  ;;  %5987 = vrsqrt.f32 %v3708_v29  ;;  %v8504_v20 = vmul.f32 0.03125, %v9784_v18  ;;  %v3766_v26 = vmul.f32 %v5970_v36, %v3670_v30 }
 0x8ad   : > { %v8489_v59 = vpop.eup %5973  ;;  %v3764_v19 = vmul.f32 %v5972_v50, %v3668_v21  ;;  %v3711_v28 = vadd.f32 1e-05, %v3647_v16  ;;  %v3673_v17 = vsub.f32 %v9785_v38, %v8384_v10  ;;  %v3585_v3 = vmul.f32 %v8484_v39, %v8484_v39  ;;  %v8529_v16 = vpop.permute.xlu1 %3837 }
 0x8ae   : > { %v8495_v42 = vpop.xlane.xlu0 %2702  ;;  %v5976_v5 = vpop.eup %5975  ;;  %v3584_v54 = vmul.f32 %v8487_v14, %v8487_v14  ;;  %v3645_v41 = vmax.f32 %v3613_v35, 0.0  ;;  %v8515_v29 = vmul.f32 0.03125, %v8395_v34  ;;  %v3555_v15 = vmul.f32 0.03125, %v8240_v9  ;;  %v9786_v9 = vld [vmem:[#allocation80_spill] sm:$0xff] }
 0x8af   : > { %v5978_v63 = vpop.eup %5977  ;;  %v8520_v30 = vmul.f32 %v5976_v5, %v3678_v13  ;;  %v3617_v10 = vsub.f32 %v3553_v52, %v3585_v3  ;;  %v3587_v50 = vmul.f32 %v8504_v20, %v8504_v20  ;;  %v3562_v34 = vmul.f32 0.03125, %v8418_v12  ;;  %v9787_v12 = vld [vmem:[#allocation90_spill] sm:$0xff] }
 0x8b0   : > { %v8512_v8 = vpop.eup %5979  ;;  %v3616_v0 = vsub.f32 %v3552_v47, %v3584_v54  ;;  %v8532_v35 = vmul.f32 0.03125, %v9786_v9  ;;  %v3767_v13 = vmul.f32 %v5978_v63, %v3671_v43  ;;  %v3594_v47 = vmul.f32 %v8515_v29, %v8515_v29 }
 0x8b1   : > { %v8522_v45 = vpop.eup %5981  ;;  %v3619_v38 = vsub.f32 %v3555_v15, %v3587_v50  ;;  %v3556_v3 = vmul.f32 0.03125, %v9787_v12  ;;  %v8542_v54 = vmul.f32 0.03125, %v8388_v60  ;;  %5989 = vrsqrt.f32 %v3711_v28 }
 0x8b2   : > { %v8518_v62 = vpop.permute.xlu0 %3797  ;;  %v5984_v5 = vpop.eup %5983  ;;  %v3709_v43 = vadd.f32 1e-05, %v3645_v41  ;;  %v3649_v63 = vmax.f32 %v3617_v10, 0.0  ;;  %v3648_v9 = vmax.f32 %v3616_v0, 0.0 }
 0x8b3   : > { %v3802_v21 = vmul.f32 %v8518_v62, %v3762_v23  ;;  %v3800_v36 = vmul.f32 %v8518_v62, %v3760_v37  ;;  %v3803_v23 = vmul.f32 %v8518_v62, %v3763_v40  ;;  %v3801_v37 = vmul.f32 %v8518_v62, %v3761_v48 }
 0x8b4   : > { %v3626_v40 = vsub.f32 %v3562_v34, %v3594_v47  ;;  %v3588_v48 = vmul.f32 %v8532_v35, %v8532_v35  ;;  %v3765_v15 = vmul.f32 %v5984_v5, %v3669_v31  ;;  %v3806_v28 = vmul.f32 %v8518_v62, %v3766_v26 }
 0x8b5   : > { %v3842_v18 = vadd.f32 %v8529_v16, %v3802_v21  ;;  %v3840_v52 = vadd.f32 %v8529_v16, %v3800_v36  ;;  %v3557_v21 = vmul.f32 0.03125, %v8420_v11  ;;  %v3843_v36 = vadd.f32 %v8529_v16, %v3803_v23 }
 0x8b6   : > { %v3841_v60 = vadd.f32 %v8529_v16, %v3801_v37  ;;  %v3810_v41 = vmul.f32 %v8518_v62, %v3770_v2  ;;  %v5986_v10 = vpop.eup %5985  ;;  %v3651_v0 = vmax.f32 %v3619_v38, 0.0  ;;  %v3620_v50 = vsub.f32 %v3556_v3, %v3588_v48 }
 0x8b7   : > { %4100 = vrot.lane.b32.xlu0 %v3842_v18, %s6175_s28  ;;  %4096 = vrot.lane.b32.xlu1 %v3840_v52, %s6175_s28  ;;  %v3589_v34 = vmul.f32 %v8542_v54, %v8542_v54  ;;  %v8556_v18 = vmul.f32 0.03125, %v8443_v49  ;;  %5991 = vrsqrt.f32 %v3709_v43  ;;  %v3713_v11 = vadd.f32 1e-05, %v3649_v63 }
 0x8b8   : > { %v3712_v31 = vadd.f32 1e-05, %v3648_v9  ;;  %v8559_v5 = vmul.f32 0.03125, %v8460_v44  ;;  %v3658_v2 = vmax.f32 %v3626_v40, 0.0  ;;  %v3560_v23 = vmul.f32 0.03125, %v8473_v6 }
 0x8b9   : > { %v3621_v26 = vsub.f32 %v3557_v21, %v3589_v34  ;;  %v3804_v37 = vmul.f32 %v8518_v62, %v3764_v19  ;;  %v5988_v47 = vpop.eup %5987  ;;  %v3769_v49 = vmul.f32 %v5986_v10, %v3673_v17  ;;  %v3846_v38 = vadd.f32 %v8529_v16, %v3806_v28 }
 0x8ba   : > { %v3261_v52 = vpop.xlane.xlu1 %3260  ;;  %v3850_v12 = vadd.f32 %v8529_v16, %v3810_v41  ;;  %v3811_v44 = vmul.f32 %v8518_v62, %v8501_v32  ;;  %v3715_v3 = vadd.f32 1e-05, %v3651_v0  ;;  %v3652_v43 = vmax.f32 %v3620_v50, 0.0 }
 0x8bb   : > { %4102 = vrot.lane.b32.xlu0 %v3843_v36, %s6175_s28  ;;  %4098 = vrot.lane.b32.xlu1 %v3841_v60, %s6175_s28  ;;  %v8570_v63 = vmul.f32 0.03125, %v8377_v27  ;;  %v3592_v9 = vmul.f32 %v8556_v18, %v8556_v18  ;;  %5993 = vrsqrt.f32 %v3712_v31  ;;  %v3595_v19 = vmul.f32 %v8559_v5, %v8559_v5 }
 0x8bc   : > { %v8576_v17 = vmul.f32 0.03125, %v3261_v52  ;;  %5995 = vrsqrt.f32 %v3713_v11  ;;  %v3653_v32 = vmax.f32 %v3621_v26, 0.0  ;;  %v3844_v27 = vadd.f32 %v8529_v16, %v3804_v37 }
 0x8bd   : > { %v3624_v48 = vsub.f32 %v3560_v23, %v3592_v9  ;;  %v3851_v36 = vadd.f32 %v8529_v16, %v3811_v44  ;;  %v3807_v60 = vmul.f32 %v8518_v62, %v3767_v13  ;;  %v3809_v28 = vmul.f32 %v8518_v62, %v3769_v49 }
 0x8be   : > { %v3523_v6 = vpop.xlane.xlu1 %3522  ;;  %v3722_v41 = vadd.f32 1e-05, %v3658_v2  ;;  %5997 = vrsqrt.f32 %v3715_v3  ;;  %v3716_v10 = vadd.f32 1e-05, %v3652_v43  ;;  %v3591_v0 = vmul.f32 %v8570_v63, %v8570_v63  ;;  %v5990_v13 = vpop.eup %5989  ;;  %v9788_v3 = vld [vmem:[#allocation92_spill] sm:$0xff] }
 0x8bf   : > { %v3563_v40 = vmul.f32 0.03125, %v3523_v6  ;;  %4108 = vrot.lane.b32.xlu0 %v3846_v38, %s6175_s28  ;;  %4116 = vrot.lane.b32.xlu1 %v3850_v12, %s6175_s28  ;;  %v3559_v34 = vmul.f32 0.03125, %v8405_v53  ;;  %v3593_v52 = vmul.f32 %v8576_v17, %v8576_v17  ;;  %v3717_v26 = vadd.f32 1e-05, %v3653_v32 }
 0x8c0   : > { %v3656_v2 = vmax.f32 %v3624_v48, 0.0  ;;  %v3805_v23 = vmul.f32 %v8518_v62, %v3765_v15  ;;  %v3814_v37 = vmul.f32 %v8518_v62, %v8520_v30  ;;  %v3847_v53 = vadd.f32 %v8529_v16, %v3807_v60  ;;  %v9790_v48 = vld [vmem:[#allocation76_spill] sm:$0xff]  ;;  %v9791_v60 = vld [vmem:[#allocation93_spill] sm:$0xff] }
 0x8c1   : > { %v3627_v21 = vsub.f32 %v3563_v40, %v3595_v19  ;;  %v3849_v12 = vadd.f32 %v8529_v16, %v3809_v28  ;;  %v2904_v44 = vadd.f32 1e-05, %v8449_v22  ;;  %v2754_v43 = vmul.f32 0.03125, %v9788_v3 }
 0x8c2   : > { %v3517_v50 = vpop.xlane.xlu1 %3516  ;;  %5999 = vrsqrt.f32 %v3716_v10  ;;  %v9789_v6 = vsub.f32 %v9783_v25, %v8403_v4  ;;  %v3679_v15 = vsub.f32 %v9770_v24, %v8426_v46  ;;  %v3623_v30 = vsub.f32 %v3559_v34, %v3591_v0  ;;  %v9792_v10 = vld [vmem:[#allocation51_spill] sm:$0xff] }
 0x8c3   : > { %v3659_v11 = vmax.f32 %v3627_v21, 0.0  ;;  %v3561_v31 = vmul.f32 0.03125, %v3517_v50  ;;  %4104 = vrot.lane.b32.xlu0 %v3844_v27, %s6175_s28  ;;  %4118 = vrot.lane.b32.xlu1 %v3851_v36, %s6175_s28  ;;  %6001 = vrsqrt.f32 %v3722_v41  ;;  %v3720_v22 = vadd.f32 1e-05, %v3656_v2 }
 0x8c4   : > { %v3772_v19 = vmul.f32 %v5988_v47, %v9789_v6  ;;  %v5992_v32 = vpop.eup %5991  ;;  %6003 = vrsqrt.f32 %v3717_v26  ;;  %v3808_v27 = vmul.f32 %v8518_v62, %v9790_v48  ;;  %v3845_v25 = vadd.f32 %v8529_v16, %v3805_v23 }
 0x8c5   : > { %v3723_v49 = vadd.f32 1e-05, %v3659_v11  ;;  %v3625_v38 = vsub.f32 %v3561_v31, %v3593_v52  ;;  %v3854_v46 = vadd.f32 %v8529_v16, %v3814_v37  ;;  %v2779_v47 = vmul.f32 %v8441_v56, %v8441_v56  ;;  %v9793_v52 = vld [vmem:[#allocation55_spill] sm:$0xff] }
 0x8c6   : > { %v3276_v9 = vpop.xlane.xlu1 %3275  ;;  %v3812_v21 = vmul.f32 %v8518_v62, %v3772_v19  ;;  %v2818_v36 = vsub.f32 %v2754_v43, %v8447_v58  ;;  %v2747_v28 = vmul.f32 0.03125, %v9791_v60  ;;  %v3677_v0 = vsub.f32 %v9792_v10, %v8458_v33  ;;  %v9794_v58 = vld [vmem:[#allocation82_spill] sm:$0xff]  ;;  %v9798_v60 = vld [vmem:[#allocation56_spill] sm:$0xff] }
 0x8c7   : > { %v3657_v40 = vmax.f32 %v3625_v38, 0.0  ;;  %4110 = vrot.lane.b32.xlu0 %v3847_v53, %s6175_s28  ;;  %4114 = vrot.lane.b32.xlu1 %v3849_v12, %s6175_s28  ;;  %6005 = vrsqrt.f32 %v3723_v49  ;;  %v8617_v50 = vmul.f32 0.03125, %v3276_v9  ;;  %v3775_v34 = vmul.f32 %v5990_v13, %v3679_v15  ;;  %v9795_v38 = vld [vmem:[#allocation94_spill] sm:$0xff] }
 0x8c8   : > { %6007 = vrsqrt.f32 %v8438_v55  ;;  %v5994_v55 = vpop.eup %5993  ;;  %v3680_v11 = vsub.f32 %v9793_v52, %v8487_v14  ;;  %v3655_v31 = vmax.f32 %v3623_v30, 0.0  ;;  %v3818_v26 = vmul.f32 %v8518_v62, %v9794_v58  ;;  %v9796_v19 = vld [vmem:[#allocation54_spill] sm:$0xff]  ;;  %v9797_v30 = vld [vmem:[#allocation57_spill] sm:$0xff] }
 0x8c9   : > { %v3721_v4 = vadd.f32 1e-05, %v3657_v40  ;;  %6009 = vrsqrt.f32 %v2904_v44  ;;  %v5996_v2 = vpop.eup %5995  ;;  %v3848_v33 = vadd.f32 %v8529_v16, %v3808_v27  ;;  %v3852_v23 = vadd.f32 %v8529_v16, %v3812_v21 }
 0x8ca   : > { %v3270_v41 = vpop.xlane.xlu1 %3269  ;;  %6011 = vrsqrt.f32 %v3720_v22  ;;  %v3815_v37 = vmul.f32 %v8518_v62, %v3775_v34  ;;  %v8628_v49 = vmax.f32 %v2818_v36, 0.0  ;;  %v2811_v13 = vsub.f32 %v2747_v28, %v2779_v47 }
 0x8cb   : > { %4106 = vrot.lane.b32.xlu0 %v3845_v25, %s6175_s28  ;;  %4124 = vrot.lane.b32.xlu1 %v3854_v46, %s6175_s28  ;;  %6013 = vrsqrt.f32 %v3721_v4  ;;  %v8631_v53 = vmul.f32 0.03125, %v9795_v38  ;;  %v3773_v12 = vmul.f32 %v5992_v32, %v3677_v0  ;;  %v5998_v44 = vpop.eup %5997  ;;  %v3598_v3 = vmul.f32 %v8617_v50, %v8617_v50  ;;  %v9800_v38 = vld [vmem:[#allocation95_spill] sm:$0xff] }
 0x8cc   : > { %v8635_v43 = vmul.f32 0.03125, %v3270_v41  ;;  %v3776_v6 = vmul.f32 %v5994_v55, %v3680_v11  ;;  %v3681_v15 = vsub.f32 %v9796_v19, %v8484_v39  ;;  %v3683_v40 = vsub.f32 %v9797_v30, %v8504_v20  ;;  %v9799_v11 = vld [vmem:[#allocation61_spill] sm:$0xff] }
 0x8cd   : > { %v3719_v22 = vadd.f32 1e-05, %v3655_v31  ;;  %v3858_v32 = vadd.f32 %v8529_v16, %v3818_v26  ;;  %v3855_v27 = vadd.f32 %v8529_v16, %v3815_v37  ;;  %v3813_v4 = vmul.f32 %v8518_v62, %v3773_v12  ;;  %v9801_v12 = vld [vmem:[#allocation96_spill] sm:$0xff] }
 0x8ce   : > { %v3532_v14 = vpop.xlane.xlu1 %3531  ;;  %v3816_v21 = vmul.f32 %v8518_v62, %v3776_v6  ;;  %v8647_v25 = vmax.f32 %v2811_v13, 0.0  ;;  %v8651_v46 = vmul.f32 %v8631_v53, %v8631_v53  ;;  %v3779_v47 = vmul.f32 %v5998_v44, %v3683_v40  ;;  %v9803_v40 = vld [vmem:[#allocation65_spill] sm:$0xff] }
 0x8cf   : > { %v3566_v9 = vmul.f32 0.03125, %v3532_v14  ;;  %4112 = vrot.lane.b32.xlu0 %v3848_v33, %s6175_s28  ;;  %4120 = vrot.lane.b32.xlu1 %v3852_v23, %s6175_s28  ;;  %v3777_v36 = vmul.f32 %v5996_v2, %v3681_v15  ;;  %v6000_v20 = vpop.eup %5999  ;;  %v3690_v28 = vsub.f32 %v9798_v60, %v8515_v29  ;;  %v3596_v41 = vmul.f32 %v8635_v43, %v8635_v43 }
 0x8d0   : > { %v6002_v55 = vpop.eup %6001  ;;  %v3684_v31 = vsub.f32 %v9799_v11, %v8532_v35  ;;  %6015 = vrsqrt.f32 %v3719_v22  ;;  %v3819_v58 = vmul.f32 %v8518_v62, %v3779_v47  ;;  %v3856_v23 = vadd.f32 %v8529_v16, %v3816_v21  ;;  %v9802_v35 = vld [vmem:[#allocation58_spill] sm:$0xff]  ;;  %v9804_v21 = vld [vmem:[#allocation97_spill] sm:$0xff] }
 0x8d1   : > { %v3630_v48 = vsub.f32 %v3566_v9, %v3598_v3  ;;  %v3817_v26 = vmul.f32 %v8518_v62, %v3777_v36  ;;  %v6004_v2 = vpop.eup %6003  ;;  %v3853_v37 = vadd.f32 %v8529_v16, %v3813_v4  ;;  %v8666_v14 = vmul.f32 0.03125, %v9800_v38  ;;  %v9808_v38 = vld [vmem:[#allocation60_spill] sm:$0xff] }
 0x8d2   : > { %v3526_v39 = vpop.xlane.xlu1 %3525  ;;  %v8669_v44 = vmul.f32 0.03125, %v9801_v12  ;;  %v3691_v3 = vsub.f32 %v9802_v35, %v8559_v5  ;;  %v3780_v6 = vmul.f32 %v6000_v20, %v3684_v31  ;;  %v3685_v22 = vsub.f32 %v9803_v40, %v8542_v54  ;;  %v9818_v40 = vld [vmem:[#allocation64_spill] sm:$0xff] }
 0x8d3   : > { %v3662_v0 = vmax.f32 %v3630_v48, 0.0  ;;  %v3564_v34 = vmul.f32 0.03125, %v3526_v39  ;;  %4132 = vrot.lane.b32.xlu0 %v3858_v32, %s6175_s28  ;;  %4126 = vrot.lane.b32.xlu1 %v3855_v27, %s6175_s28  ;;  %v3786_v48 = vmul.f32 %v6002_v55, %v3690_v28  ;;  %v2755_v4 = vmul.f32 0.03125, %v9804_v21  ;;  %v9805_v55 = vld [vmem:[#allocation99_spill] sm:$0xff] }
 0x8d4   : > { %v6006_v13 = vpop.eup %6005  ;;  %v3859_v5 = vadd.f32 %v8529_v16, %v3819_v58  ;;  %v3857_v39 = vadd.f32 %v8529_v16, %v3817_v26  ;;  %v3820_v47 = vmul.f32 %v8518_v62, %v3780_v6  ;;  %v2782_v28 = vmul.f32 %v8666_v14, %v8666_v14  ;;  %v9807_v58 = vld [vmem:[#allocation72_spill] sm:$0xff] }
 0x8d5   : > { %v3726_v29 = vadd.f32 1e-05, %v3662_v0  ;;  %v3628_v33 = vsub.f32 %v3564_v34, %v3596_v41  ;;  %v8673_v15 = vpop.eup %6007  ;;  %v3826_v54 = vmul.f32 %v8518_v62, %v3786_v48  ;;  %v3781_v41 = vmul.f32 %v6004_v2, %v3685_v22 }
 0x8d6   : > { %v3279_v9 = vpop.xlane.xlu1 %3278  ;;  %v8679_v27 = vpop.eup %6009  ;;  %v3787_v0 = vmul.f32 %v6006_v13, %v3691_v3  ;;  %v2750_v31 = vmul.f32 0.03125, %v9805_v55  ;;  %v3689_v12 = vsub.f32 %v9808_v38, %v8576_v17  ;;  %v2819_v13 = vsub.f32 %v2755_v4, %v8651_v46  ;;  %v9809_v3 = vld [vmem:[#allocation98_spill] sm:$0xff] }
 0x8d7   : > { %6017 = vrsqrt.f32 %v3726_v29  ;;  %v3660_v32 = vmax.f32 %v3628_v33, 0.0  ;;  %4128 = vrot.lane.b32.xlu0 %v3856_v23, %s6175_s28  ;;  %4122 = vrot.lane.b32.xlu1 %v3853_v37, %s6175_s28  ;;  %v6012_v36 = vpop.eup %6011  ;;  %v9806_v29 = vld [vmem:[#allocation100_spill] sm:$0xff]  ;;  %v3688_v23 = vsub.f32 %v9807_v58, %v8556_v18  ;;  %v2785_v37 = vmul.f32 %v8669_v44, %v8669_v44  ;;  %v9817_v58 = vld [vmem:[#allocation107_spill] sm:$0xff] }
 0x8d8   : > { %v6014_v34 = vpop.eup %6013  ;;  %v2753_v33 = vmul.f32 0.03125, %v9806_v29  ;;  %v8696_v2 = vmul.f32 0.03125, %v3279_v9  ;;  %v8702_v6 = vmul.f32 0.03125, %v9809_v3  ;;  %v3860_v18 = vadd.f32 %v8529_v16, %v3820_v47 }
 0x8d9   : > { %v3724_v20 = vadd.f32 1e-05, %v3660_v32  ;;  %v3784_v22 = vmul.f32 %v6012_v36, %v3688_v23  ;;  %v3866_v32 = vadd.f32 %v8529_v16, %v3826_v54  ;;  %v3821_v48 = vmul.f32 %v8518_v62, %v3781_v41 }
 0x8da   : > { %v3273_v26 = vpop.xlane.xlu1 %3272  ;;  %v3827_v17 = vmul.f32 %v8518_v62, %v3787_v0  ;;  %v3785_v9 = vmul.f32 %v6014_v34, %v3689_v12  ;;  %v8709_v21 = vadd.f32 1e-05, %v8628_v49  ;;  %v8713_v55 = vadd.f32 1e-05, %v8647_v25  ;;  %v9811_v0 = vld [vmem:[#allocation101_spill] sm:$0xff] }
 0x8db   : > { %6019 = vrsqrt.f32 %v3724_v20  ;;  %4134 = vrot.lane.b32.xlu0 %v3859_v5, %s6175_s28  ;;  %4130 = vrot.lane.b32.xlu1 %v3857_v39, %s6175_s28  ;;  %v2814_v5 = vsub.f32 %v2750_v31, %v2782_v28  ;;  %v2817_v39 = vsub.f32 %v2753_v33, %v2785_v37  ;;  %v9810_v20 = vld [vmem:[#allocation102_spill] sm:$0xff]  ;;  %v3599_v47 = vmul.f32 %v8696_v2, %v8696_v2 }
 0x8dc   : > { %v2748_v46 = vmul.f32 0.03125, %v9810_v20  ;;  %v8717_v36 = vmul.f32 0.03125, %v3273_v26  ;;  %v8721_v49 = vmax.f32 %v2819_v13, 0.0  ;;  %v2780_v41 = vmul.f32 %v8702_v6, %v8702_v6  ;;  %v9812_v13 = vld [vmem:[#allocation63_spill] sm:$0xff] }
 0x8dd   : > { %v8726_v34 = vmul.f32 0.03125, %v9811_v0  ;;  %v3824_v25 = vmul.f32 %v8518_v62, %v3784_v22  ;;  %v6016_v28 = vpop.eup %6015  ;;  %v3861_v29 = vadd.f32 %v8529_v16, %v3821_v48  ;;  %v3867_v33 = vadd.f32 %v8529_v16, %v3827_v17  ;;  %v9814_v0 = vld [vmem:[#allocation104_spill] sm:$0xff] }
 0x8de   : > { %v3535_v4 = vpop.xlane.xlu1 %3534  ;;  %v3825_v23 = vmul.f32 %v8518_v62, %v3785_v9  ;;  %v2846_v26 = vmax.f32 %v2814_v5, 0.0  ;;  %v8732_v37 = vmax.f32 %v2817_v39, 0.0  ;;  %v2812_v12 = vsub.f32 %v2748_v46, %v2780_v41 }
 0x8df   : > { %v3567_v54 = vmul.f32 0.03125, %v3535_v4  ;;  %4136 = vrot.lane.b32.xlu0 %v3860_v18, %s6175_s28  ;;  %4148 = vrot.lane.b32.xlu1 %v3866_v32, %s6175_s28  ;;  %v3687_v3 = vsub.f32 %v9812_v13, %v8570_v63  ;;  %v9813_v32 = vld [vmem:[#allocation62_spill] sm:$0xff]  ;;  %v3597_v22 = vmul.f32 %v8717_v36, %v8717_v36  ;;  %v2790_v9 = vmul.f32 %v8726_v34, %v8726_v34 }
 0x8e0   : > { %v3694_v20 = vsub.f32 %v9813_v32, %v8617_v50  ;;  %v3864_v5 = vadd.f32 %v8529_v16, %v3824_v25  ;;  %v3822_v63 = vmul.f32 %v8518_v62, %v8433_v7  ;;  %v2844_v41 = vmax.f32 %v2812_v12, 0.0 }
 0x8e1   : > { %v3631_v31 = vsub.f32 %v3567_v54, %v3599_v47  ;;  %v3783_v39 = vmul.f32 %v6016_v28, %v3687_v3  ;;  %v3865_v47 = vadd.f32 %v8529_v16, %v3825_v23  ;;  %v2749_v25 = vmul.f32 0.03125, %v9817_v58  ;;  %v9819_v3 = vld [vmem:[#allocation108_spill] sm:$0xff] }
 0x8e2   : > { %v3529_v18 = vpop.xlane.xlu1 %3528  ;;  %v3692_v7 = vsub.f32 %v9818_v40, %v8635_v43 }
 0x8e3   : > { %v3663_v4 = vmax.f32 %v3631_v31, 0.0  ;;  %v3565_v48 = vmul.f32 0.03125, %v3529_v18  ;;  %4138 = vrot.lane.b32.xlu0 %v3861_v29, %s6175_s28  ;;  %4150 = vrot.lane.b32.xlu1 %v3867_v33, %s6175_s28  ;;  %v8749_v31 = vmul.f32 0.03125, %v9814_v0  ;;  %v9815_v29 = vld [vmem:[#allocation105_spill] sm:$0xff]  ;;  %v9816_v18 = vld [vmem:[#allocation106_spill] sm:$0xff]  ;;  %v3823_v58 = vmul.f32 %v8518_v62, %v3783_v39  ;;  %v9821_v0 = vld [vmem:[#allocation112_spill] sm:$0xff] }
 0x8e4   : > { %v6018_v17 = vpop.eup %6017  ;;  %v2758_v33 = vmul.f32 0.03125, %v9815_v29  ;;  %v8753_v13 = vmul.f32 0.03125, %v9816_v18  ;;  %v8773_v29 = vmul.f32 0.03125, %v9821_v0  ;;  %v9822_v18 = vld [vmem:[#allocation109_spill] sm:$0xff]  ;;  %v2759_v0 = vmul.f32 0.03125, %v8493_v61 }
 0x8e5   : > { %v3727_v50 = vadd.f32 1e-05, %v3663_v4  ;;  %v3629_v46 = vsub.f32 %v3565_v48, %v3597_v22  ;;  %v3790_v54 = vmul.f32 %v6018_v17, %v3694_v20  ;;  %v2756_v20 = vmul.f32 0.03125, %v9819_v3  ;;  %v9820_v22 = vld [vmem:[#allocation110_spill] sm:$0xff] }
 0x8e6   : > { %v8763_v4 = vmul.f32 0.03125, %v9820_v22  ;;  %v3862_v48 = vadd.f32 %v8529_v16, %v3822_v63  ;;  %v8776_v3 = vmul.f32 0.03125, %v9822_v18  ;;  %v9823_v63 = vld [vmem:[#allocation111_spill] sm:$0xff]  ;;  %v2751_v18 = vmul.f32 0.03125, %v8495_v42 }
 0x8e7   : > { %v3661_v28 = vmax.f32 %v3629_v46, 0.0  ;;  %4144 = vrot.lane.b32.xlu0 %v3864_v5, %s6175_s28  ;;  %4146 = vrot.lane.b32.xlu1 %v3865_v47, %s6175_s28  ;;  %v3830_v23 = vmul.f32 %v8518_v62, %v3790_v54  ;;  %6021 = vrsqrt.f32 %v3727_v50  ;;  %v2788_v5 = vmul.f32 %v8749_v31, %v8749_v31 }
 0x8e8   : > { %v6020_v12 = vpop.eup %6019  ;;  %v2822_v47 = vsub.f32 %v2758_v33, %v2790_v9  ;;  %v2781_v54 = vmul.f32 %v8753_v13, %v8753_v13  ;;  %v2752_v39 = vmul.f32 0.03125, %v9823_v63  ;;  %v2784_v22 = vmul.f32 %v8763_v4, %v8763_v4 }
 0x8e9   : > { %v3725_v17 = vadd.f32 1e-05, %v3661_v28  ;;  %v3870_v43 = vadd.f32 %v8529_v16, %v3830_v23  ;;  %v3788_v46 = vmul.f32 %v6020_v12, %v3692_v7  ;;  %v9824_v7 = vld [vmem:[#allocation103_spill] sm:$0xff]  ;;  %v2820_v28 = vsub.f32 %v2756_v20, %v2788_v5  ;;  %v9825_v23 = vld [vmem:[#allocation113_spill] sm:$0xff] }
 0x8ea   : > { %v8783_v9 = vmul.f32 0.03125, %v9824_v7  ;;  %v2813_v33 = vsub.f32 %v2749_v25, %v2781_v54  ;;  %v2757_v12 = vmul.f32 0.03125, %v9825_v23  ;;  %v2789_v25 = vmul.f32 %v8773_v29, %v8773_v29 }
 0x8eb   : > { %6023 = vrsqrt.f32 %v3725_v17  ;;  %4140 = vrot.lane.b32.xlu0 %v3862_v48, %s6175_s28  ;;  %4156 = vrot.lane.b32.xlu1 %v3870_v43, %s6175_s28  ;;  %v3828_v50 = vmul.f32 %v8518_v62, %v3788_v46  ;;  %v3863_v17 = vadd.f32 %v8529_v16, %v3823_v58  ;;  %v2915_v43 = vadd.f32 1e-05, %v8721_v49 }
 0x8ec   : > { %6025 = vrsqrt.f32 %v8709_v21  ;;  %v2854_v46 = vmax.f32 %v2822_v47, 0.0  ;;  %v2910_v20 = vadd.f32 1e-05, %v2846_v26  ;;  %v2791_v5 = vmul.f32 %v8776_v3, %v8776_v3 }
 0x8ed   : > { %v3868_v48 = vadd.f32 %v8529_v16, %v3828_v50  ;;  %v2816_v54 = vsub.f32 %v2752_v39, %v2784_v22  ;;  %6027 = vrsqrt.f32 %v8713_v55  ;;  %v2913_v61 = vadd.f32 1e-05, %v8732_v37  ;;  %v9826_v50 = vld [vmem:[#allocation71_spill] sm:$0xff]  ;;  %v9827_v39 = vld [vmem:[#allocation52_spill] sm:$0xff]  ;;  %v9829_v22 = vld [vmem:[#allocation74_spill] sm:$0xff] }
 0x8ee   : > { %v2845_v21 = vmax.f32 %v2813_v33, 0.0  ;;  %v2821_v49 = vsub.f32 %v2757_v12, %v2789_v25  ;;  %v2908_v58 = vadd.f32 1e-05, %v2844_v41  ;;  %v2783_v26 = vmul.f32 %v8783_v9, %v8783_v9 }
 0x8ef   : > { %4142 = vrot.lane.b32.xlu0 %v3863_v17, %s6175_s28  ;;  %4152 = vrot.lane.b32.xlu1 %v3868_v48, %s6175_s28  ;;  %v2852_v47 = vmax.f32 %v2820_v28, 0.0  ;;  %v2823_v63 = vsub.f32 %v2759_v0, %v2791_v5  ;;  %v2864_v7 = vsub.f32 %v9827_v39, %v9826_v50  ;;  %v9828_v42 = vsub.f32 %v9770_v24, %v8206_v57  ;;  %v9830_v57 = vld [vmem:[#allocation67_spill] sm:$0xff] }
 0x8f0   : > { %6029 = vrsqrt.f32 %v2915_v43  ;;  %v2918_v55 = vadd.f32 1e-05, %v2854_v46  ;;  %v2869_v37 = vsub.f32 %v9792_v10, %v9829_v22  ;;  %v2848_v41 = vmax.f32 %v2816_v54, 0.0  ;;  %v9831_v43 = vld [vmem:[#allocation68_spill] sm:$0xff]  ;;  %v9832_v10 = vld [vmem:[#allocation79_spill] sm:$0xff] }
 0x8f1   : > { %v2967_v23 = vmul.f32 %v8368_v1, %v9828_v42  ;;  %6031 = vrsqrt.f32 %v2910_v20  ;;  %v2815_v33 = vsub.f32 %v2751_v18, %v2783_v26  ;;  %v2960_v12 = vmul.f32 %v8489_v59, %v2864_v7  ;;  %v9833_v20 = vld [vmem:[#allocation53_spill] sm:$0xff]  ;;  %v9834_v18 = vld [vmem:[#allocation66_spill] sm:$0xff]  ;;  %v9837_v22 = vld [vmem:[#allocation88_spill] sm:$0xff] }
 0x8f2   : > { %6033 = vrsqrt.f32 %v2913_v61  ;;  %v2909_v28 = vadd.f32 1e-05, %v2845_v21  ;;  %v2853_v0 = vmax.f32 %v2821_v49, 0.0  ;;  %v2916_v17 = vadd.f32 1e-05, %v2852_v47  ;;  %v9835_v21 = vld [vmem:[#allocation73_spill] sm:$0xff] }
 0x8f3   : > { %6035 = vrsqrt.f32 %v2908_v58  ;;  %v2855_v48 = vmax.f32 %v2823_v63, 0.0  ;;  %v3029_v24 = vadd.f32 %v9830_v57, %v8436_v51  ;;  %v3003_v46 = vmul.f32 %v9831_v43, %v2967_v23  ;;  %v5813_v51 = vld [vmem:[%s9431_s3 + $0x8] sm:$0xff]   ;;  %v9836_v7 = vld [vmem:[#allocation49_spill] sm:$0xff] }
 0x8f4   : > { %v6022_v1 = vpop.eup %6021  ;;  %v2965_v25 = vmul.f32 %v8512_v8, %v2869_v37  ;;  %v2874_v5 = vsub.f32 %v9833_v20, %v9832_v10  ;;  %6037 = vrsqrt.f32 %v2918_v55  ;;  %v2912_v54 = vadd.f32 1e-05, %v2848_v41  ;;  %5730 = vmatprep.subr.bf16.mxu0 %v5813_v51 }
 0x8f5   : > { %v2847_v59 = vmax.f32 %v2815_v33, 0.0  ;;  %v3695_v61 = vsub.f32 %v9834_v18, %v8696_v2  ;;  %v3693_v49 = vsub.f32 %v9835_v21, %v8717_v36  ;;  %v2996_v26 = vmul.f32 %v9831_v43, %v2960_v12  ;;  %5731 = vmatpush3.bf16.msra.mxu0 %v5813_v51  ;;  %v9838_v33 = vld [vmem:[#allocation89_spill] sm:$0xff] }
 0x8f6   : > { %v2970_v8 = vmul.f32 %v8522_v45, %v2874_v5  ;;  %6039 = vrsqrt.f32 %v2909_v28  ;;  %v2917_v47 = vadd.f32 1e-05, %v2853_v0  ;;  %v2919_v63 = vadd.f32 1e-05, %v2855_v48 }
 0x8f7   : > { %6041 = vrsqrt.f32 %v2916_v17  ;;  %v3791_v39 = vmul.f32 %v6022_v1, %v3695_v61  ;;  %v3001_v2 = vmul.f32 %v9831_v43, %v2965_v25  ;;  %v3975_v36 = vadd.f32 1.0, %v9836_v7  ;;  %v9839_v1 = vld [vmem:[#allocation116_spill] sm:$0xff] }
 0x8f8   : > { %v6024_v58 = vpop.eup %6023  ;;  %v5542_v42 = vmul.f32 -1.442695, %v3029_v24  ;;  %v3039_v23 = vadd.f32 %v9830_v57, %v3003_v46  ;;  %v2873_v37 = vsub.f32 %v9796_v19, %v9837_v22  ;;  %6043 = vrsqrt.f32 %v2912_v54  ;;  %v9842_v22 = vld [vmem:[#allocation65_spill] sm:$0xff] }
 0x8f9   : > { %v3789_v50 = vmul.f32 %v6024_v58, %v3693_v49  ;;  %v6026_v55 = vpop.eup %6025  ;;  %v2911_v45 = vadd.f32 1e-05, %v2847_v59  ;;  %v2872_v12 = vsub.f32 %v9793_v52, %v9838_v33  ;;  %v3006_v28 = vmul.f32 %v9831_v43, %v2970_v8  ;;  %v9840_v52 = vld [vmem:[#allocation115_spill] sm:$0xff] }
 0x8fa   : > { %6045 = vrsqrt.f32 %v2917_v47  ;;  %v3032_v0 = vadd.f32 %v9830_v57, %v2996_v26  ;;  %v6028_v17 = vpop.eup %6027  ;;  %v2969_v48 = vmul.f32 %v8673_v15, %v2873_v37  ;;  %v3831_v19 = vmul.f32 %v8518_v62, %v3791_v39 }
 0x8fb   : > { %v3829_v41 = vmul.f32 %v8518_v62, %v3789_v50  ;;  %6047 = vrsqrt.f32 %v2919_v63  ;;  %v2882_v46 = vsub.f32 %v9798_v60, %v9839_v1  ;;  %v2968_v25 = vmul.f32 %v8679_v27, %v2872_v12  ;;  %v9841_v63 = vld [vmem:[#allocation59_spill] sm:$0xff] }
 0x8fc   : > { %6049 = vrcp.f32 %v3975_v36  ;;  %v3980_v10 = vadd.f32 1.0, %v9840_v52  ;;  %v5552_v5 = vmul.f32 -1.442695, %v3039_v23  ;;  %v3037_v15 = vadd.f32 %v9830_v57, %v3001_v2 }
 0x8fd   : > { %v3869_v24 = vadd.f32 %v8529_v16, %v3829_v41  ;;  %v6030_v20 = vpop.eup %6029  ;;  %6051 = vrsqrt.f32 %v2911_v45  ;;  %v2875_v59 = vsub.f32 %v9797_v30, %v8441_v56  ;;  %v2978_v62 = vmul.f32 %v6026_v55, %v2882_v46 }
 0x8fe   : > { %v6032_v54 = vpop.eup %6031  ;;  %6053 = vpow2.f32 %v5542_v42  ;;  %v3042_v60 = vadd.f32 %v9830_v57, %v3006_v28  ;;  %v3005_v27 = vmul.f32 %v9831_v43, %v2969_v48  ;;  %v2883_v49 = vsub.f32 %v9802_v35, %v8631_v53 }
 0x8ff   : > { %4154 = vrot.lane.b32.xlu1 %v3869_v24, %s6175_s28  ;;  %v6034_v61 = vpop.eup %6033  ;;  %v3871_v51 = vadd.f32 %v8529_v16, %v3831_v19  ;;  %v5545_v58 = vmul.f32 -1.442695, %v3032_v0  ;;  %v3004_v8 = vmul.f32 %v9831_v43, %v2968_v25  ;;  %v2971_v47 = vmul.f32 %v6028_v17, %v2875_v59  ;;  %v9843_v17 = vld [vmem:[#allocation72_spill] sm:$0xff] }
 0x900   : > { %v6036_v26 = vpop.eup %6035  ;;  %v2878_v56 = vsub.f32 %v9841_v63, %v8666_v14  ;;  %6055 = vrcp.f32 %v3980_v10  ;;  %v2881_v50 = vsub.f32 %v9808_v38, %v8669_v44  ;;  %v2979_v39 = vmul.f32 %v6030_v20, %v2883_v49 }
 0x901   : > { %v6038_v30 = vpop.eup %6037  ;;  %6057 = vpow2.f32 %v5552_v5  ;;  %v5550_v53 = vmul.f32 -1.442695, %v3037_v15  ;;  %v3014_v16 = vmul.f32 %v9831_v43, %v2978_v62  ;;  %v2876_v35 = vsub.f32 %v9799_v11, %v8702_v6  ;;  %v9844_v62 = vld [vmem:[#allocation63_spill] sm:$0xff] }
 0x902   : > { %v2974_v2 = vmul.f32 %v6032_v54, %v2878_v56  ;;  %v5555_v7 = vmul.f32 -1.442695, %v3042_v60  ;;  %v2977_v42 = vmul.f32 %v6034_v61, %v2881_v50  ;;  %v2886_v14 = vsub.f32 %v9813_v32, %v8726_v34 }
 0x903   : > { %4158 = vrot.lane.b32.xlu1 %v3871_v51, %s6175_s28  ;;  %v6040_v36 = vpop.eup %6039  ;;  %6059 = vpow2.f32 %v5545_v58  ;;  %v3041_v44 = vadd.f32 %v9830_v57, %v3005_v27  ;;  %v3007_v23 = vmul.f32 %v9831_v43, %v2971_v47  ;;  %v2972_v55 = vmul.f32 %v6036_v26, %v2876_v35 }
 0x904   : > { %v6042_v38 = vpop.eup %6041  ;;  %v2877_v37 = vsub.f32 %v9842_v22, %v8753_v13  ;;  %v3040_v45 = vadd.f32 %v9830_v57, %v3004_v8  ;;  %v3015_v11 = vmul.f32 %v9831_v43, %v2979_v39  ;;  %v2884_v6 = vsub.f32 %v9818_v40, %v8749_v31 }
 0x905   : > { %v2982_v41 = vmul.f32 %v6038_v30, %v2886_v14  ;;  %6061 = vpow2.f32 %v5550_v53  ;;  %v6044_v34 = vpop.eup %6043  ;;  %v3010_v32 = vmul.f32 %v9831_v43, %v2974_v2  ;;  %v3050_v12 = vadd.f32 %v9830_v57, %v3014_v16 }
 0x906   : > { %v2973_v33 = vmul.f32 %v6040_v36, %v2877_v37  ;;  %6063 = vpow2.f32 %v5555_v7  ;;  %v3013_v0 = vmul.f32 %v9831_v43, %v2977_v42  ;;  %v2980_v13 = vmul.f32 %v6042_v38, %v2884_v6 }
 0x907   : > { %v6046_v28 = vpop.eup %6045  ;;  %v2880_v48 = vsub.f32 %v9843_v17, %v8763_v4  ;;  %v5554_v24 = vmul.f32 -1.442695, %v3041_v44  ;;  %v3008_v40 = vmul.f32 %v9831_v43, %v2972_v55  ;;  %v2885_v31 = vsub.f32 %v9835_v21, %v8773_v29  ;;  %v5814_v55 = vld [vmem:[%s9431_s3] sm:$0xff]  }
 0x908   : > { %v6048_v19 = vpop.eup %6047  ;;  %v5553_v1 = vmul.f32 -1.442695, %v3040_v45  ;;  %v3043_v46 = vadd.f32 %v9830_v57, %v3007_v23  ;;  %v3018_v52 = vmul.f32 %v9831_v43, %v2982_v41  ;;  %v2887_v10 = vsub.f32 %v9834_v18, %v8776_v3  ;;  %5732 = vmatprep.subr.bf16.mxu0 %v5814_v55 }
 0x909   : > { %v8882_v25 = vpop.eup %6049  ;;  %v2976_v20 = vmul.f32 %v6044_v34, %v2880_v48  ;;  %v3051_v4 = vadd.f32 %v9830_v57, %v3015_v11  ;;  %v3009_v15 = vmul.f32 %v9831_v43, %v2973_v33  ;;  %v2981_v54 = vmul.f32 %v6046_v28, %v2885_v31  ;;  %5733 = vmatpush3.bf16.msra.mxu0 %v5814_v55  ;;  %v9855_v55 = vld [vmem:[#allocation14_spill] sm:$0xff] }
 0x90a   : > { %v6052_v5 = vpop.eup %6051  ;;  %v5563_v59 = vmul.f32 -1.442695, %v3050_v12  ;;  %v3046_v29 = vadd.f32 %v9830_v57, %v3010_v32  ;;  %v2879_v60 = vsub.f32 %v9844_v62, %v8783_v9  ;;  %v3016_v61 = vmul.f32 %v9831_v43, %v2980_v13 }
 0x90b   : > { %v6054_v21 = vpop.eup %6053  ;;  %v2983_v27 = vmul.f32 %v6048_v19, %v2887_v10  ;;  %v3049_v49 = vadd.f32 %v9830_v57, %v3013_v0  ;;  %v5556_v3 = vmul.f32 -1.442695, %v3043_v46  ;;  %6065 = vpow2.f32 %v5554_v24 }
 0x90c   : > { %v3044_v18 = vadd.f32 %v9830_v57, %v3008_v40  ;;  %v3012_v58 = vmul.f32 %v9831_v43, %v2976_v20  ;;  %v2975_v26 = vmul.f32 %v6052_v5, %v2879_v60  ;;  %v5564_v8 = vmul.f32 -1.442695, %v3051_v4  ;;  %v9845_v20 = vld [vmem:[#allocation78_spill] sm:$0xff] }
 0x90d   : > { %v8895_v51 = vpop.eup %6055  ;;  %v3054_v47 = vadd.f32 %v9830_v57, %v3018_v52  ;;  %v3017_v9 = vmul.f32 %v9831_v43, %v2981_v54  ;;  %6067 = vpow2.f32 %v5553_v1  ;;  %v3045_v56 = vadd.f32 %v9830_v57, %v3009_v15  ;;  %v9846_v54 = vld [vmem:[#allocation77_spill] sm:$0xff] }
 0x90e   : > { %v6058_v63 = vpop.eup %6057  ;;  %v5559_v30 = vmul.f32 -1.442695, %v3046_v29  ;;  %v3019_v50 = vmul.f32 %v9831_v43, %v2983_v27  ;;  %6069 = vpow2.f32 %v5563_v59  ;;  %v5562_v39 = vmul.f32 -1.442695, %v3049_v49  ;;  %v9847_v29 = vld [vmem:[#allocation75_spill] sm:$0xff] }
 0x90f   : > { %v3052_v53 = vadd.f32 %v9830_v57, %v3016_v61  ;;  %6071 = vpow2.f32 %v5556_v3  ;;  %v5557_v35 = vmul.f32 -1.442695, %v3044_v18  ;;  %v3011_v2 = vmul.f32 %v9831_v43, %v2975_v26  ;;  %v9848_v61 = vld [vmem:[#allocation81_spill] sm:$0xff]  ;;  %v9850_v26 = vld [vmem:[#allocation84_spill] sm:$0xff] }
 0x910   : > { %v6060_v16 = vpop.eup %6059  ;;  %6073 = vpow2.f32 %v5564_v8  ;;  %v3048_v7 = vadd.f32 %v9830_v57, %v3012_v58  ;;  %v5567_v36 = vmul.f32 -1.442695, %v3054_v47  ;;  %v5558_v14 = vmul.f32 -1.442695, %v3045_v56  ;;  %v9849_v18 = vld [vmem:[#allocation85_spill] sm:$0xff] }
 0x911   : > { %6075 = vpow2.f32 %v5559_v30  ;;  %v3053_v44 = vadd.f32 %v9830_v57, %v3017_v9  ;;  %v5565_v23 = vmul.f32 -1.442695, %v3052_v53  ;;  %v3055_v22 = vadd.f32 %v9830_v57, %v3019_v50  ;;  %v9851_v9 = vld [vmem:[#allocation5_spill] sm:$0xff]  ;;  %v9852_v30 = vld [vmem:[#allocation83_spill] sm:$0xff] }
 0x912   : > { %v6062_v42 = vpop.eup %6061  ;;  %6077 = vpow2.f32 %v5562_v39  ;;  %v3973_v37 = vadd.f32 1.0, %v6054_v21  ;;  %v5561_v43 = vmul.f32 -1.442695, %v3048_v7  ;;  %v3047_v45 = vadd.f32 %v9830_v57, %v3011_v2 }
 0x913   : > { %v6064_v38 = vpop.eup %6063  ;;  %6079 = vpow2.f32 %v5557_v35  ;;  %v5566_v11 = vmul.f32 -1.442695, %v3053_v44  ;;  %v5568_v6 = vmul.f32 -1.442695, %v3055_v22  ;;  %v3983_v41 = vadd.f32 1.0, %v6058_v63  ;;  %v9853_v35 = vld [vmem:[#allocation7_spill] sm:$0xff] }
 0x914   : > { %6081 = vpow2.f32 %v5567_v36  ;;  %v5560_v32 = vmul.f32 -1.442695, %v3047_v45  ;;  %v3976_v33 = vadd.f32 1.0, %v6060_v16  ;;  %v3981_v28 = vadd.f32 1.0, %v6062_v42  ;;  %v9854_v36 = vld [vmem:[#allocation8_spill] sm:$0xff] }
 0x915   : > { %6083 = vpow2.f32 %v5558_v14  ;;  %v3986_v13 = vadd.f32 1.0, %v6064_v38  ;;  %v4226_v4 = vsub.f32 1.0, %v9845_v20  ;;  %v4224_v59 = vsub.f32 1.0, %v9846_v54 }
 0x916   : > { %6085 = vpow2.f32 %v5565_v23  ;;  %v4225_v21 = vsub.f32 1.0, %v9847_v29  ;;  %v4234_v27 = vsub.f32 1.0, %v9848_v61  ;;  %v4227_v58 = vsub.f32 1.0, %v9849_v18 }
 0x917   : > { %6087 = vrcp.f32 %v3973_v37  ;;  %v4235_v8 = vsub.f32 1.0, %v9850_v26  ;;  %v4258_v56 = vmul.f32 %v4226_v4, %v9851_v9  ;;  %v4230_v50 = vsub.f32 1.0, %v9852_v30  ;;  %v9860_v4 = vld [vmem:[#allocation86_spill] sm:$0xff] }
 0x918   : > { %v6066_v34 = vpop.eup %6065  ;;  %6089 = vpow2.f32 %v5561_v43  ;;  %v4256_v2 = vmul.f32 %v4224_v59, %v9853_v35  ;;  %v4257_v42 = vmul.f32 %v4225_v21, %v9854_v36  ;;  %v8926_v22 = vmul.f32 %v4234_v27, %v9855_v55  ;;  %v9856_v43 = vld [vmem:[#allocation6_spill] sm:$0xff]  ;;  %v9864_v35 = vld [vmem:[#allocation9_spill] sm:$0xff] }
 0x919   : > { %6091 = vpow2.f32 %v5566_v11  ;;  %v3985_v17 = vadd.f32 1.0, %v6066_v34  ;;  %v4259_v45 = vmul.f32 %v4227_v58, %v9856_v43  ;;  %v9857_v11 = vld [vmem:[#allocation15_spill] sm:$0xff]  ;;  %v4231_v21 = vsub.f32 1.0, %v8882_v25  ;;  %v9868_v55 = vld [vmem:[#allocation17_spill] sm:$0xff] }
 0x91a   : > { %v6068_v12 = vpop.eup %6067  ;;  %6093 = vpow2.f32 %v5568_v6  ;;  %v8932_v6 = vmul.f32 %v4235_v8, %v9857_v11  ;;  %v4236_v27 = vsub.f32 1.0, %v8895_v51 }
 0x91b   : > { %v6070_v0 = vpop.eup %6069  ;;  %6095 = vrcp.f32 %v3983_v41  ;;  %v3984_v24 = vadd.f32 1.0, %v6068_v12  ;;  %v9858_v12 = vld [vmem:[#allocation10_spill] sm:$0xff] }
 0x91c   : > { %v6072_v57 = vpop.eup %6071  ;;  %6097 = vpow2.f32 %v5560_v32  ;;  %v3994_v40 = vadd.f32 1.0, %v6070_v0  ;;  %v8979_v43 = vmul.f32 %v4236_v27, %v9868_v55  ;;  %v9879_v55 = vld [vmem:[#allocation24_spill] sm:$0xff] }
 0x91d   : > { %v6074_v48 = vpop.eup %6073  ;;  %6099 = vrcp.f32 %v3976_v33  ;;  %v3987_v1 = vadd.f32 1.0, %v6072_v57 }
 0x91e   : > { %v6076_v19 = vpop.eup %6075  ;;  %6101 = vrcp.f32 %v3981_v28  ;;  %v3995_v52 = vadd.f32 1.0, %v6074_v48  ;;  %v8935_v28 = vmul.f32 %v4230_v50, %v9858_v12 }
 0x91f   : > { %v6078_v31 = vpop.eup %6077  ;;  %6103 = vrcp.f32 %v3986_v13  ;;  %v3990_v5 = vadd.f32 1.0, %v6076_v19 }
 0x920   : > { %v6080_v46 = vpop.eup %6079  ;;  %6105 = vrcp.f32 %v3985_v17  ;;  %v3993_v62 = vadd.f32 1.0, %v6078_v31  ;;  %v9859_v17 = vld [vmem:[#allocation87_spill] sm:$0xff] }
 0x921   : > { %v6082_v10 = vpop.eup %6081  ;;  %6107 = vrcp.f32 %v3984_v24  ;;  %v3988_v49 = vadd.f32 1.0, %v6080_v46  ;;  %v4233_v48 = vsub.f32 1.0, %v9859_v17 }
 0x922   : > { %v6084_v15 = vpop.eup %6083  ;;  %6109 = vrcp.f32 %v3994_v40  ;;  %v3998_v47 = vadd.f32 1.0, %v6082_v10 }
 0x923   : > { %v6086_v60 = vpop.eup %6085  ;;  %6111 = vrcp.f32 %v3987_v1  ;;  %v3989_v39 = vadd.f32 1.0, %v6084_v15 }
 0x924   : > { %v8915_v3 = vpop.eup %6087  ;;  %6113 = vrcp.f32 %v3995_v52  ;;  %v3996_v14 = vadd.f32 1.0, %v6086_v60 }
 0x925   : > { %v6090_v63 = vpop.eup %6089  ;;  %6115 = vrcp.f32 %v3990_v5  ;;  %v4228_v5 = vsub.f32 1.0, %v9860_v4  ;;  %v4229_v8 = vsub.f32 1.0, %v8915_v3 }
 0x926   : > { %v6092_v53 = vpop.eup %6091  ;;  %6117 = vrcp.f32 %v3993_v62  ;;  %v3992_v41 = vadd.f32 1.0, %v6090_v63  ;;  %v9861_v62 = vld [vmem:[#allocation114_spill] sm:$0xff] }
 0x927   : > { %v6094_v44 = vpop.eup %6093  ;;  %6119 = vrcp.f32 %v3988_v49  ;;  %v3997_v24 = vadd.f32 1.0, %v6092_v53  ;;  %v4238_v60 = vsub.f32 1.0, %v9861_v62 }
 0x928   : > { %v8928_v37 = vpop.eup %6095  ;;  %6121 = vrcp.f32 %v3998_v47  ;;  %v3999_v19 = vadd.f32 1.0, %v6094_v44 }
 0x929   : > { %v4101_v16 = vpop.permute.xlu0 %4100  ;;  %v4097_v7 = vpop.permute.xlu1 %4096  ;;  %6123 = vrcp.f32 %v3989_v39  ;;  %v4239_v47 = vsub.f32 1.0, %v8928_v37 }
 0x92a   : > { %v4194_v38 = vmul.f32 %v9845_v20, %v4101_v16  ;;  %v4192_v23 = vmul.f32 %v9846_v54, %v4097_v7  ;;  %v6098_v34 = vpop.eup %6097  ;;  %6125 = vrcp.f32 %v3996_v14  ;;  %v9866_v14 = vld [vmem:[#allocation11_spill] sm:$0xff] }
 0x92b   : > { %v8937_v0 = vpop.eup %6099  ;;  %6127 = vrcp.f32 %v3992_v41  ;;  %v3991_v15 = vadd.f32 1.0, %v6098_v34  ;;  %v8973_v44 = vmul.f32 %v4231_v21, %v9866_v14 }
 0x92c   : > { %v4290_v32 = vadd.f32 %v4258_v56, %v4194_v38  ;;  %v4288_v33 = vadd.f32 %v4256_v2, %v4192_v23  ;;  %v8940_v40 = vpop.eup %6101  ;;  %6129 = vrcp.f32 %v3997_v24  ;;  %v9863_v56 = vld [vmem:[#allocation16_spill] sm:$0xff]  ;;  %v4232_v39 = vsub.f32 1.0, %v8937_v0  ;;  %v9867_v38 = vld [vmem:[#allocation18_spill] sm:$0xff] }
 0x92d   : > { %v4103_v13 = vpop.permute.xlu0 %4102  ;;  %v4099_v57 = vpop.permute.xlu1 %4098  ;;  %v8961_v50 = vmul.f32 %v4233_v48, %v9863_v56  ;;  %6131 = vrcp.f32 %v3999_v19  ;;  %v8967_v2 = vmul.f32 %v4228_v5, %v9864_v35  ;;  %v4237_v7 = vsub.f32 1.0, %v8940_v40  ;;  %v9877_v56 = vld [vmem:[#allocation22_spill] sm:$0xff] }
 0x92e   : > { %v4334_v31 = vsel %vm403_vm0, %v4290_v32, 0.0  ;;  %v4320_v1 = vsel %vm403_vm0, %v4288_v33, 0.0  ;;  %v4195_v46 = vmul.f32 %v9849_v18, %v4103_v13  ;;  %v4193_v52 = vmul.f32 %v9847_v29, %v4099_v57  ;;  %v8946_v10 = vpop.eup %6103  ;;  %v9870_v32 = vld [vmem:[#allocation12_spill] sm:$0xff]  ;;  %v9871_v13 = vld [vmem:[#allocation19_spill] sm:$0xff] }
 0x92f   : > { %v4335_v20 = vrot.slane %v4334_v31, 4  ;;  %v8949_v54 = vpop.eup %6105  ;;  %v4321_v59 = vrot.slane %v4320_v1, 4  ;;  %6133 = vrcp.f32 %v3991_v15  ;;  %v8976_v23 = vmul.f32 %v4238_v60, %v9867_v38  ;;  %v9875_v15 = vld [vmem:[#allocation20_spill] sm:$0xff] }
 0x930   : > { %v8954_v49 = vpop.eup %6107  ;;  %v4289_v18 = vadd.f32 %v4257_v42, %v4193_v52  ;;  %v4291_v9 = vadd.f32 %v4259_v45, %v4195_v46  ;;  %v8985_v33 = vmul.f32 %v4229_v8, %v9870_v32  ;;  %v4242_v12 = vsub.f32 1.0, %v8946_v10 }
 0x931   : > { %v4109_v29 = vpop.permute.xlu0 %4108  ;;  %v4117_v58 = vpop.permute.xlu1 %4116  ;;  %v4336_v16 = vadd.f32 %v4335_v20, %v4334_v31  ;;  %v4322_v42 = vadd.f32 %v4321_v59, %v4320_v1  ;;  %v8989_v57 = vmul.f32 %v4239_v47, %v9871_v13  ;;  %v9873_v31 = vld [vmem:[#allocation13_spill] sm:$0xff]  ;;  %v4241_v46 = vsub.f32 1.0, %v8949_v54 }
 0x932   : > { %v8958_v63 = vpop.eup %6109  ;;  %v4327_v11 = vsel %vm403_vm0, %v4289_v18, 0.0  ;;  %v4341_v24 = vsel %vm403_vm0, %v4291_v9, 0.0  ;;  %v4198_v19 = vmul.f32 %v9852_v30, %v4109_v29  ;;  %v8996_v1 = vmul.f32 %v4232_v39, %v9873_v31 }
 0x933   : > { %9862 = vst [vmem:[#allocation50_spill] sm:$0xff] %v8958_v63  ;;  %v8964_v53 = vpop.eup %6111  ;;  %v4337_v20 = vrot.slane %v4336_v16, 2  ;;  %v4240_v5 = vsub.f32 1.0, %v8954_v49  ;;  %v9003_v59 = vmul.f32 %v4237_v7, %v9875_v15  ;;  %v4250_v21 = vsub.f32 1.0, %v8958_v63  ;;  %v9880_v15 = vld [vmem:[#allocation21_spill] sm:$0xff] }
 0x934   : > { %v8970_v36 = vpop.eup %6113  ;;  %v4323_v27 = vrot.slane %v4322_v42, 2  ;;  %v4328_v18 = vrot.slane %v4327_v11, 4  ;;  %v4202_v30 = vmul.f32 %v9848_v61, %v4117_v58  ;;  %v4243_v29 = vsub.f32 1.0, %v8964_v53 }
 0x935   : > { %9865 = vst [vmem:[#allocation91_spill] sm:$0xff] %v8970_v36  ;;  %v8981_v45 = vpop.eup %6115  ;;  %v4105_v41 = vpop.permute.xlu0 %4104  ;;  %v4342_v47 = vrot.slane %v4341_v24, 4  ;;  %v9013_v39 = vmul.f32 %v4242_v12, %v9877_v56  ;;  %v4251_v35 = vsub.f32 1.0, %v8970_v36  ;;  %v4294_v38 = vadd.f32 %v8935_v28, %v4198_v19  ;;  %v9881_v56 = vld [vmem:[#allocation30_spill] sm:$0xff] }
 0x936   : > { %9869 = vst [vmem:[#allocation37_spill] sm:$0xff] %v8981_v45  ;;  %v4119_v34 = vpop.permute.xlu1 %4118  ;;  %v8991_v48 = vpop.eup %6117  ;;  %v4246_v7 = vsub.f32 1.0, %v8981_v45  ;;  %v9021_v32 = vmul.f32 %v4241_v46, %v9879_v55  ;;  %v4338_v13 = vadd.f32 %v4337_v20, %v4336_v16  ;;  %v9026_v12 = vmul.f32 %v4240_v5, %v9880_v15  ;;  %v9883_v55 = vld [vmem:[#allocation23_spill] sm:$0xff]  ;;  %v9886_v15 = vld [vmem:[#allocation26_spill] sm:$0xff] }
 0x937   : > { %9872 = vst [vmem:[#allocation39_spill] sm:$0xff] %v8991_v48  ;;  %v8999_v52 = vpop.eup %6119  ;;  %v4249_v58 = vsub.f32 1.0, %v8991_v48  ;;  %v9029_v36 = vmul.f32 %v4250_v21, %v9881_v56  ;;  %v4324_v28 = vadd.f32 %v4323_v27, %v4322_v42  ;;  %v4329_v19 = vadd.f32 %v4328_v18, %v4327_v11  ;;  %v9884_v20 = vld [vmem:[#allocation31_spill] sm:$0xff]  ;;  %v9888_v11 = vld [vmem:[#allocation25_spill] sm:$0xff]  ;;  %v9889_v27 = vld [vmem:[#allocation32_spill] sm:$0xff] }
 0x938   : > { %9874 = vst [vmem:[#allocation38_spill] sm:$0xff] %v8999_v52  ;;  %v9006_v60 = vpop.eup %6121  ;;  %v4244_v61 = vsub.f32 1.0, %v8999_v52  ;;  %v4298_v46 = vadd.f32 %v8926_v22, %v4202_v30  ;;  %v9036_v52 = vmul.f32 %v4243_v29, %v9883_v55  ;;  %v4343_v48 = vadd.f32 %v4342_v47, %v4341_v24 }
 0x939   : > { %9876 = vst [vmem:[#allocation41_spill] sm:$0xff] %v9006_v60  ;;  %v9010_v8 = vpop.eup %6123  ;;  %v4111_v9 = vpop.permute.xlu0 %4110  ;;  %v4254_v45 = vsub.f32 1.0, %v9006_v60  ;;  %v9040_v5 = vmul.f32 %v4251_v35, %v9884_v20  ;;  %v9043_v21 = vmul.f32 %v4246_v7, %v9886_v15  ;;  %v4362_v60 = vsel %vm403_vm0, %v4294_v38, 0.0  ;;  %v9892_v35 = vld [vmem:[#allocation34_spill] sm:$0xff] }
 0x93a   : > { %v9017_v14 = vpop.eup %6125  ;;  %v4115_v31 = vpop.permute.xlu1 %4114  ;;  %v4245_v16 = vsub.f32 1.0, %v9010_v8  ;;  %v4196_v42 = vmul.f32 %v9860_v4, %v4105_v41  ;;  %v9050_v22 = vmul.f32 %v4244_v61, %v9888_v11  ;;  %v9053_v18 = vmul.f32 %v4249_v58, %v9889_v27 }
 0x93b   : > { %9878 = vst [vmem:[#allocation40_spill] sm:$0xff] %v9017_v14  ;;  %v9032_v63 = vpop.eup %6127  ;;  %9885 = vst [vmem:[#allocation42_spill] sm:$0xff] %v9040_v5  ;;  %v4339_v30 = vrot.slane %v4338_v13, 1  ;;  %v9059_v7 = vmul.f32 %v4254_v45, %v9892_v35  ;;  %v4252_v55 = vsub.f32 1.0, %v9017_v14  ;;  %v4325_v4 = vrot.slane %v4324_v28, 1 }
 0x93c   : > { %9882 = vst [vmem:[#allocation43_spill] sm:$0xff] %v9032_v63  ;;  %9887 = vst [vmem:[#allocation45_spill] sm:$0xff] %v9043_v21  ;;  %v9045_v56 = vpop.eup %6129  ;;  %v4248_v47 = vsub.f32 1.0, %v9032_v63  ;;  %v4330_v41 = vrot.slane %v4329_v19, 2  ;;  %v4390_v61 = vsel %vm403_vm0, %v4298_v46, 0.0  ;;  %v4203_v58 = vmul.f32 %v9850_v26, %v4119_v34  ;;  %v9894_v21 = vld [vmem:[#allocation28_spill] sm:$0xff] }
 0x93d   : > { %9890 = vst [vmem:[#allocation46_spill] sm:$0xff] %v9053_v18  ;;  %v9055_v24 = vpop.eup %6131  ;;  %v4107_v29 = vpop.permute.xlu0 %4106  ;;  %9893 = vst [vmem:[#allocation69_spill] sm:$0xff] %v9059_v7  ;;  %v4344_v20 = vrot.slane %v4343_v48, 2  ;;  %v4363_v15 = vrot.slane %v4362_v60, 4  ;;  %v4199_v11 = vmul.f32 %v8882_v25, %v4111_v9  ;;  %v9068_v18 = vmul.f32 %v4245_v16, %v9894_v21  ;;  %v9896_v34 = vld [vmem:[#allocation33_spill] sm:$0xff] }
 0x93e   : > { %9891 = vst [vmem:[#allocation47_spill] sm:$0xff] %v9055_v24  ;;  %v9062_v38 = vpop.eup %6133  ;;  %v4125_v27 = vpop.permute.xlu1 %4124  ;;  %v4292_v45 = vadd.f32 %v8967_v2, %v4196_v42  ;;  %v4201_v35 = vmul.f32 %v9859_v17, %v4115_v31  ;;  %v4253_v14 = vsub.f32 1.0, %v9045_v56  ;;  %v4255_v7 = vsub.f32 1.0, %v9055_v24  ;;  %v9897_v21 = vld [vmem:[#allocation29_spill] sm:$0xff] }
 0x93f   : > { %9895 = vst [vmem:[#allocation48_spill] sm:$0xff] %v9068_v18  ;;  %v4340_v5 = vadd.f32 %v4339_v30, %v4338_v13  ;;  %v4391_v46 = vrot.slane %v4390_v61, 4  ;;  %v4247_v26 = vsub.f32 1.0, %v9062_v38  ;;  %v9076_v63 = vmul.f32 %v4252_v55, %v9896_v34  ;;  %v9898_v55 = vld [vmem:[#allocation36_spill] sm:$0xff] }
 0x940   : > { %v4326_v25 = vadd.f32 %v4325_v4, %v4324_v28  ;;  %v4331_v9 = vadd.f32 %v4330_v41, %v4329_v19  ;;  %v4299_v16 = vadd.f32 %v8932_v6, %v4203_v58  ;;  %v9080_v18 = vmul.f32 %v4248_v47, %v9897_v21  ;;  %v9899_v28 = vld [vmem:[#allocation35_spill] sm:$0xff] }
 0x941   : > { %v4345_v2 = vadd.f32 %v4344_v20, %v4343_v48  ;;  %v4364_v17 = vadd.f32 %v4363_v15, %v4362_v60  ;;  %v4295_v31 = vadd.f32 %v8973_v44, %v4199_v11  ;;  %v4197_v42 = vmul.f32 %v8915_v3, %v4107_v29  ;;  %v4113_v13 = vpop.permute.xlu0 %4112  ;;  %v9900_v4 = vld [vmem:[#allocation27_spill] sm:$0xff] }
 0x942   : > { %v4348_v30 = vsel %vm403_vm0, %v4292_v45, 0.0  ;;  %v4297_v24 = vadd.f32 %v8961_v50, %v4201_v35  ;;  %v9087_v34 = vmul.f32 %v4253_v14, %v9898_v55  ;;  %v9090_v19 = vmul.f32 %v4255_v7, %v9899_v28  ;;  %v4121_v60 = vpop.permute.xlu1 %4120 }
 0x943   : > { %v4547_v6 = vmul.f32 0.125, %v4340_v5  ;;  %v4392_v47 = vadd.f32 %v4391_v46, %v4390_v61  ;;  %v4293_v48 = vadd.f32 %v8985_v33, %v4197_v42  ;;  %v9094_v44 = vmul.f32 %v4247_v26, %v9900_v4 }
 0x944   : > { %v4545_v3 = vmul.f32 0.125, %v4326_v25  ;;  %v4332_v29 = vrot.slane %v4331_v9, 1  ;;  %v4397_v41 = vsel %vm403_vm0, %v4299_v16, 0.0  ;;  %v4206_v50 = vmul.f32 %v9861_v62, %v4125_v27 }
 0x945   : > { %v4346_v58 = vrot.slane %v4345_v2, 1  ;;  %v4365_v14 = vrot.slane %v4364_v17, 2  ;;  %v4349_v20 = vrot.slane %v4348_v30, 4  ;;  %v4369_v7 = vsel %vm403_vm0, %v4295_v31, 0.0  ;;  %v4133_v26 = vpop.permute.xlu0 %4132 }
 0x946   : > { %v4383_v5 = vsel %vm403_vm0, %v4297_v24, 0.0  ;;  %v4355_v61 = vsel %vm403_vm0, %v4293_v48, 0.0  ;;  %v4302_v33 = vadd.f32 %v8976_v23, %v4206_v50  ;;  %v4200_v15 = vmul.f32 %v8937_v0, %v4113_v13  ;;  %v4127_v55 = vpop.permute.xlu1 %4126 }
 0x947   : > { %v4579_v11 = vpack.c.bf16 %v4547_v6, %v4547_v6  ;;  %v4393_v45 = vrot.slane %v4392_v47, 2  ;;  %v4398_v35 = vrot.slane %v4397_v41, 4  ;;  %v4204_v46 = vmul.f32 %v8895_v51, %v4121_v60 }
 0x948   : > { %v4333_v62 = vadd.f32 %v4332_v29, %v4331_v9  ;;  %v4370_v27 = vrot.slane %v4369_v7, 4  ;;  %v4418_v25 = vsel %vm403_vm0, %v4302_v33, 0.0  ;;  %v4296_v16 = vadd.f32 %v8996_v1, %v4200_v15 }
 0x949   : > { %v4347_v21 = vadd.f32 %v4346_v58, %v4345_v2  ;;  %v4350_v24 = vadd.f32 %v4349_v20, %v4348_v30  ;;  %v4384_v31 = vrot.slane %v4383_v5, 4  ;;  %v4356_v42 = vrot.slane %v4355_v61, 4 }
 0x94a   : > { %v4419_v23 = vrot.slane %v4418_v25, 4  ;;  %v4376_v0 = vsel %vm403_vm0, %v4296_v16, 0.0  ;;  %v4300_v13 = vadd.f32 %v8979_v43, %v4204_v46  ;;  %v4210_v28 = vmul.f32 %v8946_v10, %v4133_v26 }
 0x94b   : > { %v4366_v51 = vadd.f32 %v4365_v14, %v4364_v17  ;;  %v4394_v6 = vadd.f32 %v4393_v45, %v4392_v47  ;;  %v4399_v9 = vadd.f32 %v4398_v35, %v4397_v41  ;;  %v4377_v48 = vrot.slane %v4376_v0, 4 }
 0x94c   : > { %v4546_v60 = vmul.f32 0.125, %v4333_v62  ;;  %v4371_v4 = vadd.f32 %v4370_v27, %v4369_v7  ;;  %v4404_v1 = vsel %vm403_vm0, %v4300_v13, 0.0  ;;  %v4207_v2 = vmul.f32 %v8928_v37, %v4127_v55  ;;  %v4129_v37 = vpop.permute.xlu0 %4128 }
 0x94d   : > { %v4577_v30 = vpack.c.bf16 %v4545_v3, %v4545_v3  ;;  %v4548_v29 = vmul.f32 0.125, %v4347_v21  ;;  %v4385_v50 = vadd.f32 %v4384_v31, %v4383_v5  ;;  %v4378_v58 = vadd.f32 %v4377_v48, %v4376_v0 }
 0x94e   : > { %v4351_v20 = vrot.slane %v4350_v24, 2  ;;  %v4357_v33 = vadd.f32 %v4356_v42, %v4355_v61  ;;  %v4420_v43 = vadd.f32 %v4419_v23, %v4418_v25  ;;  %v4306_v10 = vadd.f32 %v9013_v39, %v4210_v28  ;;  %v4123_v25 = vpop.permute.xlu1 %4122 }
 0x94f   : > { %v4367_v17 = vrot.slane %v4366_v51, 1  ;;  %v4379_v47 = vrot.slane %v4378_v58, 2  ;;  %v4405_v41 = vrot.slane %v4404_v1, 4  ;;  %v4303_v14 = vadd.f32 %v8989_v57, %v4207_v2 }
 0x950   : > { %v4578_v7 = vpack.c.bf16 %v4546_v60, %v4546_v60  ;;  %v4395_v15 = vrot.slane %v4394_v6, 1  ;;  %v4400_v45 = vrot.slane %v4399_v9, 2  ;;  %v4372_v35 = vrot.slane %v4371_v4, 2 }
 0x951   : > { %v4651_v3 = vunpack.c.l.b16 %v4579_v11  ;;  %v4649_v46 = vunpack.c.l.b16 %v4577_v30  ;;  %v4580_v26 = vpack.c.bf16 %v4548_v29, %v4548_v29  ;;  %v4386_v5 = vrot.slane %v4385_v50, 2  ;;  %v4135_v29 = vpop.permute.xlu0 %4134 }
 0x952   : > { %v4352_v62 = vadd.f32 %v4351_v20, %v4350_v24  ;;  %v4358_v61 = vrot.slane %v4357_v33, 2  ;;  %v4421_v27 = vrot.slane %v4420_v43, 2  ;;  %v4446_v39 = vsel %vm403_vm0, %v4306_v10, 0.0 }
 0x953   : > { %v4368_v16 = vadd.f32 %v4367_v17, %v4366_v51  ;;  %v4380_v21 = vadd.f32 %v4379_v47, %v4378_v58  ;;  %v4406_v31 = vadd.f32 %v4405_v41, %v4404_v1  ;;  %v4425_v57 = vsel %vm403_vm0, %v4303_v14, 0.0 }
 0x954   : > { %v4650_v42 = vunpack.c.l.b16 %v4578_v7  ;;  %v4396_v55 = vadd.f32 %v4395_v15, %v4394_v6  ;;  %v4401_v23 = vadd.f32 %v4400_v45, %v4399_v9  ;;  %v4373_v0 = vadd.f32 %v4372_v35, %v4371_v4 }
 0x955   : > { %v4387_v11 = vadd.f32 %v4386_v5, %v4385_v50  ;;  %v4447_v13 = vrot.slane %v4446_v39, 4  ;;  %v4208_v28 = vmul.f32 %v8954_v49, %v4129_v37  ;;  %v4205_v24 = vmul.f32 %v8940_v40, %v4123_v25  ;;  %v4131_v49 = vpop.permute.xlu1 %4130 }
 0x956   : > { %v4353_v48 = vrot.slane %v4352_v62, 1  ;;  %v4359_v60 = vadd.f32 %v4358_v61, %v4357_v33  ;;  %v4422_v2 = vadd.f32 %v4421_v27, %v4420_v43  ;;  %v4426_v30 = vrot.slane %v4425_v57, 4 }
 0x957   : > { %v4381_v51 = vrot.slane %v4380_v21, 1  ;;  %v4407_v58 = vrot.slane %v4406_v31, 2  ;;  %v4304_v1 = vadd.f32 %v9026_v12, %v4208_v28  ;;  %v4301_v20 = vadd.f32 %v9003_v59, %v4205_v24 }
 0x958   : > { %v9119_v6 = vunpack.c.l.b16 %v4580_v26  ;;  %v4682_v9 = vsel %vm4681_vm13, %v4650_v42, %v4649_v46  ;;  %v4551_v4 = vmul.f32 0.125, %v4368_v16  ;;  %v4402_v50 = vrot.slane %v4401_v23, 1  ;;  %v4137_v26 = vpop.permute.xlu0 %4136 }
 0x959   : > { %v4374_v10 = vrot.slane %v4373_v0, 1  ;;  %v4388_v40 = vrot.slane %v4387_v11, 1  ;;  %v4448_v17 = vadd.f32 %v4447_v13, %v4446_v39  ;;  %v4432_v33 = vsel %vm403_vm0, %v4304_v1, 0.0 }
 0x95a   : > { %v4555_v43 = vmul.f32 0.125, %v4396_v55  ;;  %v4354_v47 = vadd.f32 %v4353_v48, %v4352_v62  ;;  %v4360_v41 = vrot.slane %v4359_v60, 1  ;;  %v4427_v14 = vadd.f32 %v4426_v30, %v4425_v57 }
 0x95b   : > { %v4423_v7 = vrot.slane %v4422_v2, 1  ;;  %v4382_v12 = vadd.f32 %v4381_v51, %v4380_v21  ;;  %v4408_v15 = vadd.f32 %v4407_v58, %v4406_v31  ;;  %v4411_v59 = vsel %vm403_vm0, %v4301_v20, 0.0  ;;  %v4149_v31 = vpop.permute.xlu1 %4148 }
 0x95c   : > { %v9125_v45 = vsel %vm4683_vm14, %v4651_v3, %v4682_v9  ;;  %v4403_v35 = vadd.f32 %v4402_v50, %v4401_v23  ;;  %v4433_v37 = vrot.slane %v4432_v33, 4  ;;  %v4211_v46 = vmul.f32 %v8964_v53, %v4135_v29  ;;  %v4139_v51 = vpop.permute.xlu0 %4138 }
 0x95d   : > { %v4375_v5 = vadd.f32 %v4374_v10, %v4373_v0  ;;  %v4389_v61 = vadd.f32 %v4388_v40, %v4387_v11  ;;  %v4449_v27 = vrot.slane %v4448_v17, 2  ;;  %v4209_v62 = vmul.f32 %v8949_v54, %v4131_v49 }
 0x95e   : > { %v4549_v39 = vmul.f32 0.125, %v4354_v47  ;;  %v4361_v25 = vadd.f32 %v4360_v41, %v4359_v60  ;;  %v4428_v16 = vrot.slane %v4427_v14, 2  ;;  %v4412_v21 = vrot.slane %v4411_v59, 4 }
 0x95f   : > { %v4583_v57 = vpack.c.bf16 %v4551_v4, %v4551_v4  ;;  %v4424_v42 = vadd.f32 %v4423_v7, %v4422_v2  ;;  %v4553_v55 = vmul.f32 0.125, %v4382_v12  ;;  %v4409_v3 = vrot.slane %v4408_v15, 1  ;;  %v4151_v49 = vpop.permute.xlu1 %4150 }
 0x960   : > { %v4587_v13 = vpack.c.bf16 %v4555_v43, %v4555_v43  ;;  %v4556_v23 = vmul.f32 0.125, %v4403_v35  ;;  %v4434_v28 = vadd.f32 %v4433_v37, %v4432_v33  ;;  %v4307_v53 = vadd.f32 %v9036_v52, %v4211_v46  ;;  %v9901_v46 = vld [vmem:[#allocation50_spill] sm:$0xff] }
 0x961   : > { %v4552_v24 = vmul.f32 0.125, %v4375_v5  ;;  %v4554_v0 = vmul.f32 0.125, %v4389_v61  ;;  %v4450_v11 = vadd.f32 %v4449_v27, %v4448_v17  ;;  %v4305_v48 = vadd.f32 %v9021_v32, %v4209_v62  ;;  %v4145_v61 = vpop.permute.xlu0 %4144 }
 0x962   : > { %v4581_v54 = vpack.c.bf16 %v4549_v39, %v4549_v39  ;;  %v4550_v30 = vmul.f32 0.125, %v4361_v25  ;;  %v4429_v60 = vadd.f32 %v4428_v16, %v4427_v14  ;;  %v4413_v29 = vadd.f32 %v4412_v21, %v4411_v59  ;;  %v9902_v25 = vld [vmem:[#allocation38_spill] sm:$0xff] }
 0x963   : > { %v9131_v58 = vunpack.c.l.b16 %v4583_v57  ;;  %v4559_v2 = vmul.f32 0.125, %v4424_v42  ;;  %v4585_v1 = vpack.c.bf16 %v4553_v55, %v4553_v55  ;;  %v4410_v20 = vadd.f32 %v4409_v3, %v4408_v15  ;;  %v9903_v55 = vld [vmem:[#allocation91_spill] sm:$0xff] }
 0x964   : > { %v4659_v9 = vunpack.c.l.b16 %v4587_v13  ;;  %v4588_v4 = vpack.c.bf16 %v4556_v23, %v4556_v23  ;;  %v4435_v50 = vrot.slane %v4434_v28, 2  ;;  %v4453_v52 = vsel %vm403_vm0, %v4307_v53, 0.0  ;;  %v4147_v13 = vpop.permute.xlu1 %4146 }
 0x965   : > { %v4584_v10 = vpack.c.bf16 %v4552_v24, %v4552_v24  ;;  %v4586_v40 = vpack.c.bf16 %v4554_v0, %v4554_v0  ;;  %v4451_v17 = vrot.slane %v4450_v11, 1  ;;  %v4439_v32 = vsel %vm403_vm0, %v4305_v48, 0.0 }
 0x966   : > { %v9135_v33 = vunpack.c.l.b16 %v4581_v54  ;;  %v4582_v43 = vpack.c.bf16 %v4550_v30, %v4550_v30  ;;  %v4430_v47 = vrot.slane %v4429_v60, 1  ;;  %v4414_v41 = vrot.slane %v4413_v29, 2  ;;  %v9904_v30 = vld [vmem:[#allocation43_spill] sm:$0xff] }
 0x967   : > { %v4591_v14 = vpack.c.bf16 %v4559_v2, %v4559_v2  ;;  %v4657_v7 = vunpack.c.l.b16 %v4585_v1  ;;  %v4557_v12 = vmul.f32 0.125, %v4410_v20  ;;  %v4454_v15 = vrot.slane %v4453_v52, 4 }
 0x968   : > { %v9137_v59 = vunpack.c.l.b16 %v4588_v4  ;;  %v4436_v35 = vadd.f32 %v4435_v50, %v4434_v28  ;;  %v4440_v37 = vrot.slane %v4439_v32, 4  ;;  %v4218_v5 = vmul.f32 %v9901_v46, %v4149_v31  ;;  %v9906_v50 = vld [vmem:[#allocation42_spill] sm:$0xff] }
 0x969   : > { %v9140_v27 = vunpack.c.l.b16 %v4584_v10  ;;  %v4658_v62 = vunpack.c.l.b16 %v4586_v40  ;;  %v4452_v39 = vadd.f32 %v4451_v17, %v4450_v11  ;;  %v4212_v16 = vmul.f32 %v9902_v25, %v4137_v26 }
 0x96a   : > { %v9143_v21 = vunpack.c.l.b16 %v4582_v43  ;;  %v4431_v57 = vadd.f32 %v4430_v47, %v4429_v60  ;;  %v4415_v42 = vadd.f32 %v4414_v41, %v4413_v29  ;;  %v4219_v3 = vmul.f32 %v9903_v55, %v4151_v49  ;;  %v9905_v29 = vld [vmem:[#allocation39_spill] sm:$0xff]  ;;  %v4141_v49 = vpop.permute.xlu0 %4140  ;;  %v9908_v43 = vld [vmem:[#allocation48_spill] sm:$0xff] }
 0x96b   : > { %v9146_v23 = vunpack.c.l.b16 %v4591_v14  ;;  %v4695_v28 = vsel %vm4681_vm13, %v4658_v62, %v4657_v7  ;;  %v4589_v53 = vpack.c.bf16 %v4557_v12, %v4557_v12  ;;  %v4455_v31 = vadd.f32 %v4454_v15, %v4453_v52  ;;  %v9909_v7 = vld [vmem:[#allocation37_spill] sm:$0xff]  ;;  %v4157_v15 = vpop.permute.xlu1 %4156 }
 0x96c   : > { %v4437_v24 = vrot.slane %v4436_v35, 1  ;;  %v4441_v0 = vadd.f32 %v4440_v37, %v4439_v32  ;;  %v4314_v48 = vadd.f32 %v9029_v36, %v4218_v5  ;;  %v4213_v11 = vmul.f32 %v9010_v8, %v4139_v51  ;;  %v9907_v51 = vld [vmem:[#allocation46_spill] sm:$0xff] }
 0x96d   : > { %v4563_v26 = vmul.f32 0.125, %v4452_v39  ;;  %v4308_v54 = vadd.f32 %v9050_v22, %v4212_v16  ;;  %v4216_v60 = vmul.f32 %v9904_v30, %v4145_v61  ;;  %v4217_v2 = vmul.f32 %v9905_v29, %v4147_v13 }
 0x96e   : > { %v9155_v1 = vsel %vm4683_vm14, %v4659_v9, %v4695_v28  ;;  %v4560_v20 = vmul.f32 0.125, %v4431_v57  ;;  %v4416_v4 = vrot.slane %v4415_v42, 1  ;;  %v4315_v52 = vadd.f32 %v9906_v50, %v4219_v3 }
 0x96f   : > { %v9158_v10 = vunpack.c.l.b16 %v4589_v53  ;;  %v4456_v36 = vrot.slane %v4455_v31, 2  ;;  %v4312_v8 = vadd.f32 %v9080_v18, %v4216_v60  ;;  %v4313_v40 = vadd.f32 %v9907_v51, %v4217_v2  ;;  %v9910_v53 = vld [vmem:[#allocation45_spill] sm:$0xff]  ;;  %v4153_v2 = vpop.permute.xlu1 %4152 }
 0x970   : > { %v4438_v22 = vadd.f32 %v4437_v24, %v4436_v35  ;;  %v4442_v17 = vrot.slane %v4441_v0, 2  ;;  %v4502_v32 = vsel %vm403_vm0, %v4314_v48, 0.0  ;;  %v4309_v47 = vadd.f32 %v9908_v43, %v4213_v11  ;;  %v9911_v11 = vld [vmem:[#allocation41_spill] sm:$0xff]  ;;  %v9913_v43 = vld [vmem:[#allocation40_spill] sm:$0xff] }
 0x971   : > { %v4460_v9 = vsel %vm403_vm0, %v4308_v54, 0.0  ;;  %v4488_v41 = vsel %vm403_vm0, %v4312_v8, 0.0  ;;  %v4495_v14 = vsel %vm403_vm0, %v4313_v40, 0.0  ;;  %v4214_v12 = vmul.f32 %v9909_v7, %v4141_v49  ;;  %v4143_v54 = vpop.permute.xlu0 %4142  ;;  %v9912_v8 = vld [vmem:[#allocation69_spill] sm:$0xff] }
 0x972   : > { %v4595_v37 = vpack.c.bf16 %v4563_v26, %v4563_v26  ;;  %v4592_v46 = vpack.c.bf16 %v4560_v20, %v4560_v20  ;;  %v4417_v18 = vadd.f32 %v4416_v4, %v4415_v42  ;;  %v4509_v5 = vsel %vm403_vm0, %v4315_v52, 0.0 }
 0x973   : > { %v4457_v35 = vadd.f32 %v4456_v36, %v4455_v31  ;;  %v4503_v61 = vrot.slane %v4502_v32, 4  ;;  %v4489_v62 = vrot.slane %v4488_v41, 4  ;;  %v4496_v39 = vrot.slane %v4495_v14, 4 }
 0x974   : > { %v9169_v25 = vmul.f32 0.125, %v4438_v22  ;;  %v4443_v16 = vadd.f32 %v4442_v17, %v4441_v0  ;;  %v4461_v57 = vrot.slane %v4460_v9, 4  ;;  %v4467_v55 = vsel %vm403_vm0, %v4309_v47, 0.0 }
 0x975   : > { %v4510_v3 = vrot.slane %v4509_v5, 4  ;;  %v4490_v13 = vadd.f32 %v4489_v62, %v4488_v41  ;;  %v4497_v28 = vadd.f32 %v4496_v39, %v4495_v14  ;;  %v4310_v24 = vadd.f32 %v9910_v53, %v4214_v12 }
 0x976   : > { %v9173_v42 = vunpack.c.l.b16 %v4595_v37  ;;  %v9175_v48 = vunpack.c.l.b16 %v4592_v46  ;;  %v4558_v31 = vmul.f32 0.125, %v4417_v18  ;;  %v4222_v26 = vmul.f32 %v9911_v11, %v4157_v15 }
 0x977   : > { %v4458_v0 = vrot.slane %v4457_v35, 1  ;;  %v4504_v30 = vadd.f32 %v4503_v61, %v4502_v32  ;;  %v4491_v60 = vrot.slane %v4490_v13, 2  ;;  %v4474_v29 = vsel %vm403_vm0, %v4310_v24, 0.0  ;;  %v4155_v24 = vpop.permute.xlu1 %4154 }
 0x978   : > { %v4444_v20 = vrot.slane %v4443_v16, 1  ;;  %v4462_v4 = vadd.f32 %v4461_v57, %v4460_v9  ;;  %v4468_v50 = vrot.slane %v4467_v55, 4  ;;  %v4498_v52 = vrot.slane %v4497_v28, 2 }
 0x979   : > { %v4593_v49 = vpack.c.bf16 %v9169_v25, %v9169_v25  ;;  %v4511_v36 = vadd.f32 %v4510_v3, %v4509_v5  ;;  %v4318_v51 = vadd.f32 %v9912_v8, %v4222_v26  ;;  %v4215_v40 = vmul.f32 %v9062_v38, %v4143_v54 }
 0x97a   : > { %v4590_v22 = vpack.c.bf16 %v4558_v31, %v4558_v31  ;;  %v4492_v17 = vadd.f32 %v4491_v60, %v4490_v13  ;;  %v4475_v32 = vrot.slane %v4474_v29, 4  ;;  %v4220_v47 = vmul.f32 %v9913_v43, %v4153_v2 }
 0x97b   : > { %v9184_v41 = vadd.f32 %v4458_v0, %v4457_v35  ;;  %v4505_v14 = vrot.slane %v4504_v30, 2  ;;  %v4530_v9 = vsel %vm403_vm0, %v4318_v51, 0.0  ;;  %v4311_v7 = vadd.f32 %v9094_v44, %v4215_v40 }
 0x97c   : > { %v4445_v12 = vadd.f32 %v4444_v20, %v4443_v16  ;;  %v4463_v15 = vrot.slane %v4462_v4, 2  ;;  %v4499_v37 = vadd.f32 %v4498_v52, %v4497_v28  ;;  %v4316_v46 = vadd.f32 %v9076_v63, %v4220_v47 }
 0x97d   : > { %v4469_v38 = vadd.f32 %v4468_v50, %v4467_v55  ;;  %v4512_v18 = vrot.slane %v4511_v36, 2  ;;  %v4531_v5 = vrot.slane %v4530_v9, 4  ;;  %v4481_v61 = vsel %vm403_vm0, %v4311_v7, 0.0 }
 0x97e   : > { %v4493_v62 = vrot.slane %v4492_v17, 1  ;;  %v4476_v39 = vadd.f32 %v4475_v32, %v4474_v29  ;;  %v4482_v35 = vrot.slane %v4481_v61, 4  ;;  %v4516_v57 = vsel %vm403_vm0, %v4316_v46, 0.0 }
 0x97f   : > { %v4662_v3 = vunpack.c.l.b16 %v4590_v22  ;;  %v4506_v13 = vadd.f32 %v4505_v14, %v4504_v30  ;;  %v4517_v53 = vrot.slane %v4516_v57, 4  ;;  %v4686_v44 = vsel %vm4685_vm15, %v9119_v6, %v9125_v45 }
 0x980   : > { %v4464_v16 = vadd.f32 %v4463_v15, %v4462_v4  ;;  %v4500_v63 = vrot.slane %v4499_v37, 1  ;;  %v4483_v28 = vadd.f32 %v4482_v35, %v4481_v61  ;;  %v4688_v55 = vsel %vm4687_vm1, %v9135_v33, %v4686_v44  ;;  %v9914_v15 = vld [vmem:[#allocation47_spill] sm:$0xff] }
 0x981   : > { %v4470_v31 = vrot.slane %v4469_v38, 2  ;;  %v4532_v11 = vadd.f32 %v4531_v5, %v4530_v9  ;;  %v4518_v26 = vadd.f32 %v4517_v53, %v4516_v57  ;;  %v4690_v54 = vsel %vm4689_vm2, %v9143_v21, %v4688_v55 }
 0x982   : > { %v4513_v0 = vadd.f32 %v4512_v18, %v4511_v36  ;;  %v4494_v30 = vadd.f32 %v4493_v62, %v4492_v17  ;;  %v4477_v60 = vrot.slane %v4476_v39, 2  ;;  %v4697_v6 = vsel %vm4685_vm15, %v9137_v59, %v9155_v1  ;;  %v4159_v17 = vpop.permute.xlu1 %4158 }
 0x983   : > { %v4562_v45 = vmul.f32 0.125, %v4445_v12  ;;  %v4507_v29 = vrot.slane %v4506_v13, 1  ;;  %v4519_v2 = vrot.slane %v4518_v26, 2  ;;  %v4698_v33 = vsel %vm4687_vm1, %v9158_v10, %v4697_v6 }
 0x984   : > { %v4501_v20 = vadd.f32 %v4500_v63, %v4499_v37  ;;  %v4484_v4 = vrot.slane %v4483_v28, 2  ;;  %v4692_v50 = vsel %vm4691_vm3, %v9131_v58, %v4690_v54  ;;  %v4699_v21 = vsel %vm4689_vm2, %v4662_v3, %v4698_v33 }
 0x985   : > { %v4533_v52 = vrot.slane %v4532_v11, 2  ;;  %v4520_v36 = vadd.f32 %v4519_v2, %v4518_v26  ;;  %v4700_v8 = vsel %vm4691_vm3, %v9146_v23, %v4699_v21  ;;  %v4221_v59 = vmul.f32 %v9045_v56, %v4155_v24 }
 0x986   : > { %v4471_v1 = vadd.f32 %v4470_v31, %v4469_v38  ;;  %v4514_v51 = vrot.slane %v4513_v0, 1  ;;  %v4569_v40 = vmul.f32 0.125, %v4494_v30  ;;  %v4478_v22 = vadd.f32 %v4477_v60, %v4476_v39 }
 0x987   : > { %v4521_v10 = vrot.slane %v4520_v36, 1  ;;  %v4694_v32 = vsel %vm4693_vm4, %v9140_v27, %v4692_v50  ;;  %v4701_v58 = vsel %vm4693_vm4, %v9175_v48, %v4700_v8  ;;  %v4317_v43 = vadd.f32 %v9087_v34, %v4221_v59 }
 0x988   : > { %v4465_v47 = vrot.slane %v4464_v16, 1  ;;  %v4570_v14 = vmul.f32 0.125, %v4501_v20  ;;  %v4485_v9 = vadd.f32 %v4484_v4, %v4483_v28  ;;  %v4716_v23 = vpack.c.b16 %v4701_v58, %v4694_v32 }
 0x989   : > { %v4508_v7 = vadd.f32 %v4507_v29, %v4506_v13  ;;  %v4534_v56 = vadd.f32 %v4533_v52, %v4532_v11  ;;  %v4523_v12 = vsel %vm403_vm0, %v4317_v43, 0.0  ;;  %v4223_v37 = vmul.f32 %v9914_v15, %v4159_v17 }
 0x98a   : > { %v4594_v46 = vpack.c.bf16 %v4562_v45, %v4562_v45  ;;  %v4472_v38 = vrot.slane %v4471_v1, 1  ;;  %v4515_v18 = vadd.f32 %v4514_v51, %v4513_v0  ;;  %5734 = vmatprep.mubr.msk.bf16.mxu0 %vm403_vm0, %v4716_v23  ;;  %v4524_v27 = vrot.slane %v4523_v12, 4 }
 0x98b   : > { %v4601_v5 = vpack.c.bf16 %v4569_v40, %v4569_v40  ;;  %v4479_v48 = vrot.slane %v4478_v22, 1  ;;  %v4522_v61 = vadd.f32 %v4521_v10, %v4520_v36  ;;  %v4319_v34 = vadd.f32 %v9090_v19, %v4223_v37 }
 0x98c   : > { %v4564_v62 = vmul.f32 0.125, %v9184_v41  ;;  %v4602_v39 = vpack.c.bf16 %v4570_v14, %v4570_v14  ;;  %v4486_v35 = vrot.slane %v4485_v9, 1  ;;  %v4525_v57 = vadd.f32 %v4524_v27, %v4523_v12 }
 0x98d   : > { %v4466_v3 = vadd.f32 %v4465_v47, %v4464_v16  ;;  %v4571_v13 = vmul.f32 0.125, %v4508_v7  ;;  %v4535_v53 = vrot.slane %v4534_v56, 1  ;;  %v4537_v44 = vsel %vm403_vm0, %v4319_v34, 0.0 }
 0x98e   : > { %v4666_v63 = vunpack.c.l.b16 %v4594_v46  ;;  %v4473_v28 = vadd.f32 %v4472_v38, %v4471_v1  ;;  %v4526_v55 = vrot.slane %v4525_v57, 2  ;;  %v4538_v24 = vrot.slane %v4537_v44, 4 }
 0x98f   : > { %v4572_v31 = vmul.f32 0.125, %v4515_v18  ;;  %v4673_v11 = vunpack.c.l.b16 %v4601_v5  ;;  %v4480_v26 = vadd.f32 %v4479_v48, %v4478_v22  ;;  %v4573_v54 = vmul.f32 0.125, %v4522_v61 }
 0x990   : > { %v4674_v0 = vunpack.c.l.b16 %v4602_v39  ;;  %v4487_v19 = vadd.f32 %v4486_v35, %v4485_v9  ;;  %v4527_v30 = vadd.f32 %v4526_v55, %v4525_v57  ;;  %v4539_v41 = vadd.f32 %v4538_v24, %v4537_v44 }
 0x991   : > { %v4665_v16 = vunpack.c.l.b16 %v4593_v49  ;;  %v4565_v60 = vmul.f32 0.125, %v4466_v3  ;;  %v4603_v6 = vpack.c.bf16 %v4571_v13, %v4571_v13  ;;  %v4536_v45 = vadd.f32 %v4535_v53, %v4534_v56 }
 0x992   : > { %v4596_v29 = vpack.c.bf16 %v4564_v62, %v4564_v62  ;;  %v4566_v2 = vmul.f32 0.125, %v4473_v28  ;;  %v4528_v33 = vrot.slane %v4527_v30, 1  ;;  %v4540_v20 = vrot.slane %v4539_v41, 2  ;;  %v9915_v28 = vld [vmem:[#allocation3_spill] sm:$0xff] }
 0x993   : > { %v4702_v4 = vsel %vm4681_vm13, %v4666_v63, %v4665_v16  ;;  %v4604_v50 = vpack.c.bf16 %v4572_v31, %v4572_v31  ;;  %v4567_v21 = vmul.f32 0.125, %v4480_v26  ;;  %v4605_v52 = vpack.c.bf16 %v4573_v54, %v4573_v54  ;;  %v9242_v63 = vld [vmem:[%s9432_s4 + $0x8] sm:$0xff] }
 0x994   : > { %v4709_v36 = vsel %vm4681_vm13, %v4674_v0, %v4673_v11  ;;  %v4568_v8 = vmul.f32 0.125, %v4487_v19  ;;  %v4529_v59 = vadd.f32 %v4528_v33, %v4527_v30  ;;  %v4541_v1 = vadd.f32 %v4540_v20, %v4539_v41 }
 0x995   : > { %v4597_v51 = vpack.c.bf16 %v4565_v60, %v4565_v60  ;;  %v4675_v25 = vunpack.c.l.b16 %v4603_v6  ;;  %v4575_v49 = vmul.f32 0.125, %v4536_v45  ;;  %v4703_v40 = vsel %vm4683_vm14, %v9173_v42, %v4702_v4 }
 0x996   : > { %v4598_v22 = vpack.c.bf16 %v4566_v2, %v4566_v2  ;;  %v4574_v17 = vmul.f32 0.125, %v4529_v59  ;;  %v4542_v10 = vrot.slane %v4541_v1, 1  ;;  %v4668_v32 = vunpack.c.l.b16 %v4596_v29  ;;  %v296_v59 = vld [vmem:[%s9433_s5 + $0x20] sm:$0xff] }
 0x997   : > { %v4710_v58 = vsel %vm4683_vm14, %v4675_v25, %v4709_v36  ;;  %v4599_v43 = vpack.c.bf16 %v4567_v21, %v4567_v21  ;;  %v4677_v47 = vunpack.c.l.b16 %v4605_v52  ;;  %v4676_v14 = vunpack.c.l.b16 %v4604_v50  ;;  %v299_v52 = vld [vmem:[%s9433_s5 + $0x38] sm:$0xff]  ;;  %v298_v36 = vld [vmem:[%s9433_s5 + $0x30] sm:$0xff]  ;;  %v293_v25 = vld [vmem:[%s9433_s5 + $0x8] sm:$0xff] }
 0x998   : > { %v4600_v9 = vpack.c.bf16 %v4568_v8, %v4568_v8  ;;  %v4606_v23 = vpack.c.bf16 %v4574_v17, %v4574_v17  ;;  %v4543_v7 = vadd.f32 %v4542_v10, %v4541_v1  ;;  %v4669_v56 = vunpack.c.l.b16 %v4597_v51  ;;  %5738 = vmatprep.subr.mxu0 %v299_v52  ;;  %v297_v8 = vld [vmem:[%s9433_s5 + $0x28] sm:$0xff]  ;;  %v295_v1 = vld [vmem:[%s9433_s5 + $0x18] sm:$0xff]  ;;  %v294_v51 = vld [vmem:[%s9433_s5 + $0x10] sm:$0xff] }
 0x999   : > { %v4704_v12 = vsel %vm4685_vm15, %v4668_v32, %v4703_v40  ;;  %v4607_v15 = vpack.c.bf16 %v4575_v49, %v4575_v49  ;;  %v4670_v37 = vunpack.c.l.b16 %v4598_v22  ;;  %v4711_v46 = vsel %vm4685_vm15, %v4676_v14, %v4710_v58  ;;  %v292_v49 = vld [vmem:[%s9433_s5] sm:$0xff] }
 0x99a   : > { %v4678_v42 = vunpack.c.l.b16 %v4606_v23  ;;  %v4576_v38 = vmul.f32 0.125, %v4543_v7  ;;  %v4671_v18 = vunpack.c.l.b16 %v4599_v43  ;;  %v4712_v27 = vsel %vm4687_vm1, %v4677_v47, %v4711_v46 }
 0x99b   : > { %v4672_v5 = vunpack.c.l.b16 %v4600_v9  ;;  %v4705_v34 = vsel %vm4687_vm1, %v4669_v56, %v4704_v12  ;;  %v4679_v62 = vunpack.c.l.b16 %v4607_v15  ;;  %v4616_v55 = vrot.slane %v9242_v63, %v9915_v28 }
 0x99c   : > { %v4713_v48 = vsel %vm4689_vm2, %v4678_v42, %v4712_v27  ;;  %v4608_v61 = vpack.c.bf16 %v4576_v38, %v4576_v38  ;;  %v4706_v39 = vsel %vm4689_vm2, %v4670_v37, %v4705_v34  ;;  %vm5174_vm1 = vcmask 64512  }
 0x99d   : > { %v4707_v57 = vsel %vm4691_vm3, %v4671_v18, %v4706_v39  ;;  %v4714_v3 = vsel %vm4691_vm3, %v4679_v62, %v4713_v48  ;;  %vm6177_vm2 = vmmov 0  }
 0x99e   : > { %v4680_v35 = vunpack.c.l.b16 %v4608_v61  ;;  %v4708_v13 = vsel %vm4693_vm4, %v4672_v5, %v4707_v57 }
 0x9a0   : > { %v4715_v53 = vsel %vm4693_vm4, %v4680_v35, %v4714_v3 }
 0x9a1   : > { %v4717_v44 = vpack.c.b16 %v4715_v53, %v4708_v13 }
 0x9a3   : > { %5735 = vmatmul.mubr.msk.bf16.vlgmr.msra.gmra.mxu0 %vm403_vm0, %v4717_v44 }
 0x9a4   : > { %5739 = vmatpush3.msra.mxu0 %v299_v52 }
 0x9a5   : > { %5740 = vmatprep.subr.mxu0 %v298_v36 }
 0x9a6   : > { %5741 = vmatpush3.msra.mxu0 %v298_v36 }
 0x9a7   : > { %5742 = vmatprep.subr.mxu0 %v297_v8 }
 0x9a8   : > { %5743 = vmatpush3.msra.mxu0 %v297_v8 }
 0x9a9   : > { %5744 = vmatprep.subr.mxu0 %v296_v59 }
 0x9aa   : > { %5745 = vmatpush3.msra.mxu0 %v296_v59 }
 0x9ab   : > { %5746 = vmatprep.subr.mxu0 %v295_v1 }
 0x9ac   : > { %5747 = vmatpush3.msra.mxu0 %v295_v1 }
 0x9ad   : > { %5748 = vmatprep.subr.mxu0 %v294_v51 }
 0x9ae   : > { %5749 = vmatpush3.msra.mxu0 %v294_v51 }
 0x9af   : > { %5750 = vmatprep.subr.mxu0 %v293_v25 }
 0x9b0   : > { %5751 = vmatpush3.msra.mxu0 %v293_v25 }
 0x9b1   : > { %5752 = vmatprep.subr.mxu0 %v292_v49 }
 0x9b2   : > { %5753 = vmatpush3.msra.mxu0 %v292_v49 }
 0xa63   : > { %v5736_v24 = vpop.f32.mrf.mxu0 }
 0xa64   : > { %v9246_v31 = vadd.f32 %v5736_v24, %v4616_v55 }
 0xa65   : > { %v4770_v11 = vpop.f32.mrf.mxu0 }
 0xa66   : > { %v9248_v26 = vadd.f32 %v4770_v11, %v4616_v55  ;;  %v4791_v54 = vsel %vm2193_vm8, %v9246_v31, 0.0  ;;  %v4804_v4 = vmul.f32 %v9246_v31, %v9246_v31 }
 0xa67   : > { %4792 = vadd.xlane.f32.xlu0 %v4791_v54  ;;  %v5737_v0 = vpop.f32.mrf.mxu0 }
 0xa68   : > { %v4785_v41 = vsel %vm2193_vm8, %v9248_v26, 0.0  ;;  %v4802_v16 = vmul.f32 %v9248_v26, %v9248_v26  ;;  %v9258_v60 = vadd.f32 %v5737_v0, %v4616_v55  ;;  %v4812_v21 = vsel %vm2193_vm8, %v4804_v4, 0.0  ;;  %v9917_v0 = vld [vmem:[#allocation2_spill] sm:$0xff] }
 0xa69   : > { %v4773_v19 = vpop.f32.mrf.mxu0 }
 0xa6a   : > { %v9252_v30 = vadd.f32 %v4773_v19, %v4616_v55  ;;  %v4806_v45 = vsel %vm2193_vm8, %v4802_v16, 0.0  ;;  %v4794_v2 = vsel %vm2193_vm8, %v9258_v60, 0.0  ;;  %v4805_v33 = vmul.f32 %v9258_v60, %v9258_v60  ;;  %v9916_v55 = vld [vmem:[#allocation4_spill] sm:$0xff] }
 0xa6b   : > { %4786 = vadd.xlane.f32.xlu0 %v4785_v41  ;;  %v4853_v24 = vrot.slane %v9242_v63, %v9916_v55  ;;  %v9918_v19 = vsub.s32 2, %v9917_v0 }
 0xa6c   : > { %v4788_v6 = vsel %vm2193_vm8, %v9252_v30, 0.0  ;;  %v4803_v29 = vmul.f32 %v9252_v30, %v9252_v30  ;;  %v4815_v50 = vsel %vm2193_vm8, %v4805_v33, 0.0 }
 0xa6d   : > { %4789 = vadd.xlane.f32.xlu1 %v4788_v6  ;;  %v4861_v41 = vrot.slane %v9242_v63, %v9918_v19 }
 0xa6e   : > { %v4809_v20 = vsel %vm2193_vm8, %v4803_v29, 0.0 }
 0xa6f   : > { %4807 = vadd.xlane.f32.xlu0 %v4806_v45 }
 0xa71   : > { %4795 = vadd.xlane.f32.xlu1 %v4794_v2 }
 0xa73   : > { %4810 = vadd.xlane.f32.xlu0 %v4809_v20 }
 0xa75   : > { %4816 = vadd.xlane.f32.xlu1 %v4815_v50 }
 0xa77   : > { %4813 = vadd.xlane.f32.xlu0 %v4812_v21 }
 0xaf0   : > { %v4793_v40 = vpop.xlane.xlu0 %4792 }
 0xaf1   : > { %v4800_v7 = vmul.f32 0.015625, %v4793_v40 }
 0xaf3   : > { %v4824_v5 = vmul.f32 %v4800_v7, %v4800_v7 }
 0xaf4   : > { %v4787_v22 = vpop.xlane.xlu0 %4786 }
 0xaf5   : > { %v4798_v17 = vmul.f32 0.015625, %v4787_v22 }
 0xaf6   : > { %v4790_v10 = vpop.xlane.xlu1 %4789 }
 0xaf7   : > { %v4822_v58 = vmul.f32 %v4798_v17, %v4798_v17  ;;  %v4799_v43 = vmul.f32 0.015625, %v4790_v10  ;;  %v4834_v44 = vsub.f32 %v9248_v26, %v4798_v17  ;;  %v4836_v26 = vsub.f32 %v9246_v31, %v4800_v7  ;;  %v301_v10 = vld [vmem:[%s9433_s5 + $0x48] sm:$0xff] }
 0xaf8   : > { %v4808_v32 = vpop.xlane.xlu0 %4807  ;;  %5760 = vmatprep.subr.mxu1 %v301_v10 }
 0xaf9   : > { %v4818_v47 = vmul.f32 0.015625, %v4808_v32  ;;  %v4823_v12 = vmul.f32 %v4799_v43, %v4799_v43  ;;  %v4835_v16 = vsub.f32 %v9252_v30, %v4799_v43  ;;  %5761 = vmatpush3.msra.mxu1 %v301_v10  ;;  %v9919_v32 = vsub.s32 3, %v9917_v0 }
 0xafa   : > { %v4796_v14 = vpop.xlane.xlu1 %4795 }
 0xafb   : > { %v4826_v9 = vsub.f32 %v4818_v47, %v4822_v58  ;;  %v4801_v23 = vmul.f32 0.015625, %v4796_v14  ;;  %v4881_v58 = vrot.slane %v9242_v63, %v9919_v32  ;;  %v9921_v32 = vsub.s32 5, %v9917_v0 }
 0xafc   : > { %v4811_v56 = vpop.xlane.xlu0 %4810 }
 0xafd   : > { %v4830_v15 = vmax.f32 %v4826_v9, 0.0  ;;  %v4819_v37 = vmul.f32 0.015625, %v4811_v56  ;;  %v4825_v38 = vmul.f32 %v4801_v23, %v4801_v23  ;;  %v4837_v29 = vsub.f32 %v9258_v60, %v4801_v23 }
 0xafe   : > { %v4817_v46 = vpop.xlane.xlu1 %4816 }
 0xaff   : > { %v4838_v42 = vadd.f32 1e-05, %v4830_v15  ;;  %v4827_v18 = vsub.f32 %v4819_v37, %v4823_v12  ;;  %v4821_v27 = vmul.f32 0.015625, %v4817_v46 }
 0xb00   : > { %v4814_v48 = vpop.xlane.xlu0 %4813 }
 0xb01   : > { %6135 = vrsqrt.f32 %v4838_v42  ;;  %v4831_v61 = vmax.f32 %v4827_v18, 0.0  ;;  %v4829_v34 = vsub.f32 %v4821_v27, %v4825_v38  ;;  %v4820_v62 = vmul.f32 0.015625, %v4814_v48 }
 0xb03   : > { %v4839_v39 = vadd.f32 1e-05, %v4831_v61  ;;  %v4833_v35 = vmax.f32 %v4829_v34, 0.0  ;;  %v4828_v57 = vsub.f32 %v4820_v62, %v4824_v5 }
 0xb05   : > { %6137 = vrsqrt.f32 %v4839_v39  ;;  %v4841_v3 = vadd.f32 1e-05, %v4833_v35  ;;  %v4832_v13 = vmax.f32 %v4828_v57, 0.0  ;;  %v300_v39 = vld [vmem:[%s9433_s5 + $0x40] sm:$0xff] }
 0xb06   : > { %5762 = vmatprep.subr.mxu1 %v300_v39 }
 0xb07   : > { %6139 = vrsqrt.f32 %v4841_v3  ;;  %v4840_v53 = vadd.f32 1e-05, %v4832_v13  ;;  %5763 = vmatpush3.msra.mxu1 %v300_v39 }
 0xb09   : > { %6141 = vrsqrt.f32 %v4840_v53 }
 0xb0e   : > { %v6136_v11 = vpop.eup %6135 }
 0xb0f   : > { %v4846_v54 = vmul.f32 %v6136_v11, %v4834_v44 }
 0xb11   : > { %v4854_v6 = vmul.f32 %v4853_v24, %v4846_v54 }
 0xb12   : > { %v6138_v45 = vpop.eup %6137 }
 0xb13   : > { %v4862_v2 = vadd.f32 %v4861_v41, %v4854_v6  ;;  %v4847_v33 = vmul.f32 %v6138_v45, %v4835_v16 }
 0xb14   : > { %v6140_v20 = vpop.eup %6139 }
 0xb15   : > { %vm4866_vm0 = vcmp.ge.f32.partialorder %v4862_v2, 0.0  ;;  %v4870_v4 = vmul.f32 0.05, %v4862_v2  ;;  %v4855_v50 = vmul.f32 %v4853_v24, %v4847_v33  ;;  %v4849_v21 = vmul.f32 %v6140_v20, %v4837_v29 }
 0xb16   : > { %v6142_v52 = vpop.eup %6141 }
 0xb17   : > { %v4874_v36 = vsel %vm4866_vm0, %v4862_v2, %v4870_v4  ;;  %v4863_v8 = vadd.f32 %v4861_v41, %v4855_v50  ;;  %v4848_v59 = vmul.f32 %v6142_v52, %v4836_v26  ;;  %v4857_v1 = vmul.f32 %v4853_v24, %v4849_v21 }
 0xb18   : > { %5754 = vmatprep.mubr.msk.f32.mxu0 %vm2193_vm8, %v4874_v36 }
 0xb19   : > { %vm4867_vm5 = vcmp.ge.f32.partialorder %v4863_v8, 0.0  ;;  %v4871_v30 = vmul.f32 0.05, %v4863_v8  ;;  %v4856_v51 = vmul.f32 %v4853_v24, %v4848_v59  ;;  %v4865_v60 = vadd.f32 %v4861_v41, %v4857_v1 }
 0xb1b   : > { %v4875_v25 = vsel %vm4867_vm5, %v4863_v8, %v4871_v30  ;;  %v4864_v49 = vadd.f32 %v4861_v41, %v4856_v51  ;;  %v4873_v31 = vmul.f32 0.05, %v4865_v60  ;;  %vm4869_vm7 = vcmp.ge.f32.partialorder %v4865_v60, 0.0 }
 0xb1c   : > { %5755 = vmatmul.mubr.msk.f32.vlgmr.msra.gmra.mxu0 %vm2193_vm8, %v4875_v25 }
 0xb1d   : > { %vm4868_vm6 = vcmp.ge.f32.partialorder %v4864_v49, 0.0  ;;  %v4872_v40 = vmul.f32 0.05, %v4864_v49  ;;  %v4877_v17 = vsel %vm4869_vm7, %v4865_v60, %v4873_v31 }
 0xb1f   : > { %v4876_v22 = vsel %vm4868_vm6, %v4864_v49, %v4872_v40  ;;  %v9920_v40 = vsub.s32 4, %v9917_v0 }
 0xb20   : > { %5757 = vmatprep.mubr.msk.f32.mxu0 %vm2193_vm8, %v4876_v22 }
 0xb21   : > { %5758 = vmatmul.mubr.msk.f32.gmra.mxu0 %vm2193_vm8, %v4877_v17  ;;  %v5048_v22 = vrot.slane %v9242_v63, %v9920_v40 }
 0xbdc   : > { %v5756_v43 = vpop.f32.mrf.mxu0 }
 0xbdd   : > { %v9317_v47 = vadd.f32 %v5756_v43, %v4881_v58 }
 0xbde   : > { %v4960_v14 = vpop.f32.mrf.mxu0 }
 0xbdf   : > { %v9319_v9 = vadd.f32 %v4960_v14, %v4881_v58  ;;  %v4983_v23 = vsel %vm4979_vm9, %v9317_v47, 0.0  ;;  %v4998_v7 = vmul.f32 %v9317_v47, %v9317_v47 }
 0xbe0   : > { %4984 = vadd.xlane.f32.xlu1 %v4983_v23 }
 0xbe1   : > { %v5759_v56 = vpop.f32.mrf.mxu0  ;;  %v4980_v12 = vsel %vm4979_vm9, %v9319_v9, 0.0  ;;  %v4997_v15 = vmul.f32 %v9319_v9, %v9319_v9  ;;  %v5004_v42 = vsel %vm4979_vm9, %v4998_v7, 0.0 }
 0xbe2   : > { %4981 = vadd.xlane.f32.xlu0 %v4980_v12  ;;  %v9329_v37 = vadd.f32 %v5759_v56, %v4881_v58 }
 0xbe3   : > { %v4970_v46 = vpop.f32.mrf.mxu0  ;;  %v5001_v18 = vsel %vm4979_vm9, %v4997_v15, 0.0 }
 0xbe4   : > { %5005 = vadd.xlane.f32.xlu1 %v5004_v42  ;;  %v9332_v38 = vadd.f32 %v4970_v46, %v4881_v58  ;;  %v4989_v27 = vsel %vm4979_vm9, %v9329_v37, 0.0  ;;  %v5000_v5 = vmul.f32 %v9329_v37, %v9329_v37  ;;  %v5056_v58 = vrot.slane %v9242_v63, %v9921_v32 }
 0xbe6   : > { %5002 = vadd.xlane.f32.xlu0 %v5001_v18  ;;  %v4986_v48 = vsel %vm4979_vm9, %v9332_v38, 0.0  ;;  %v4999_v61 = vmul.f32 %v9332_v38, %v9332_v38  ;;  %v5010_v34 = vsel %vm4979_vm9, %v5000_v5, 0.0 }
 0xbe8   : > { %4990 = vadd.xlane.f32.xlu1 %v4989_v27  ;;  %v5007_v62 = vsel %vm4979_vm9, %v4999_v61, 0.0 }
 0xbea   : > { %4987 = vadd.xlane.f32.xlu0 %v4986_v48 }
 0xbec   : > { %5011 = vadd.xlane.f32.xlu1 %v5010_v34 }
 0xbee   : > { %5008 = vadd.xlane.f32.xlu0 %v5007_v62 }
 0xc69   : > { %v4985_v35 = vpop.xlane.xlu1 %4984 }
 0xc6a   : > { %v4994_v57 = vmul.f32 0.0625, %v4985_v35 }
 0xc6b   : > { %v4982_v3 = vpop.xlane.xlu0 %4981 }
 0xc6c   : > { %v4993_v13 = vmul.f32 0.0625, %v4982_v3  ;;  %v5018_v44 = vmul.f32 %v4994_v57, %v4994_v57  ;;  %v5030_v31 = vsub.f32 %v9317_v47, %v4994_v57 }
 0xc6d   : > { %v5006_v53 = vpop.xlane.xlu1 %5005 }
 0xc6e   : > { %v5014_v24 = vmul.f32 0.0625, %v5006_v53  ;;  %v5017_v54 = vmul.f32 %v4993_v13, %v4993_v13  ;;  %v5029_v10 = vsub.f32 %v9319_v9, %v4993_v13  ;;  %v9922_v53 = vsub.s32 6, %v9917_v0 }
 0xc6f   : > { %v5003_v11 = vpop.xlane.xlu0 %5002 }
 0xc70   : > { %v5022_v19 = vsub.f32 %v5014_v24, %v5018_v44  ;;  %v5013_v41 = vmul.f32 0.0625, %v5003_v11  ;;  %v5076_v44 = vrot.slane %v9242_v63, %v9922_v53 }
 0xc71   : > { %v4991_v16 = vpop.xlane.xlu1 %4990 }
 0xc72   : > { %v5026_v6 = vmax.f32 %v5022_v19, 0.0  ;;  %v5021_v45 = vsub.f32 %v5013_v41, %v5017_v54  ;;  %v4996_v29 = vmul.f32 0.0625, %v4991_v16 }
 0xc73   : > { %v4988_v2 = vpop.xlane.xlu0 %4987 }
 0xc74   : > { %v5034_v33 = vadd.f32 1e-05, %v5026_v6  ;;  %v5025_v20 = vmax.f32 %v5021_v45, 0.0  ;;  %v4995_v26 = vmul.f32 0.0625, %v4988_v2  ;;  %v5020_v21 = vmul.f32 %v4996_v29, %v4996_v29 }
 0xc75   : > { %v5012_v4 = vpop.xlane.xlu1 %5011  ;;  %v5032_v15 = vsub.f32 %v9329_v37, %v4996_v29 }
 0xc76   : > { %6143 = vrsqrt.f32 %v5034_v33  ;;  %v5033_v50 = vadd.f32 1e-05, %v5025_v20  ;;  %v5016_v52 = vmul.f32 0.0625, %v5012_v4  ;;  %v5019_v8 = vmul.f32 %v4995_v26, %v4995_v26 }
 0xc77   : > { %v5009_v36 = vpop.xlane.xlu0 %5008  ;;  %v5031_v42 = vsub.f32 %v9332_v38, %v4995_v26 }
 0xc78   : > { %6145 = vrsqrt.f32 %v5033_v50  ;;  %v5024_v59 = vsub.f32 %v5016_v52, %v5020_v21  ;;  %v5015_v1 = vmul.f32 0.0625, %v5009_v36 }
 0xc7a   : > { %v5028_v30 = vmax.f32 %v5024_v59, 0.0  ;;  %v5023_v51 = vsub.f32 %v5015_v1, %v5019_v8  ;;  %v302_v1 = vld [vmem:[%s9433_s5 + $0x50] sm:$0xff] }
 0xc7c   : > { %v5036_v60 = vadd.f32 1e-05, %v5028_v30  ;;  %v5027_v25 = vmax.f32 %v5023_v51, 0.0  ;;  %v6176_v30 = vmov 0.0  }
 0xc7d   : > { %5770 = vmatprep.subr.mxu0 %v6176_v30  ;;  %5772 = vmatprep.mubr.msk.f32.mxu0 %vm6177_vm2, %v6176_v30 }
 0xc7e   : > { %6147 = vrsqrt.f32 %v5036_v60  ;;  %v5035_v49 = vadd.f32 1e-05, %v5027_v25  ;;  %5771 = vmatpush3.msra.mxu0 %v302_v1 }
 0xc80   : > { %6149 = vrsqrt.f32 %v5035_v49 }
 0xc83   : > { %v6144_v17 = vpop.eup %6143 }
 0xc84   : > { %v5042_v43 = vmul.f32 %v6144_v17, %v5030_v31 }
 0xc85   : > { %v6146_v14 = vpop.eup %6145 }
 0xc86   : > { %v5041_v23 = vmul.f32 %v6146_v14, %v5029_v10  ;;  %v5050_v7 = vmul.f32 %v5048_v22, %v5042_v43 }
 0xc88   : > { %v5049_v56 = vmul.f32 %v5048_v22, %v5041_v23  ;;  %v5058_v12 = vadd.f32 %v5056_v58, %v5050_v7 }
 0xc8a   : > { %v5057_v47 = vadd.f32 %v5056_v58, %v5049_v56  ;;  %v5066_v18 = vmul.f32 0.05, %v5058_v12  ;;  %vm5062_vm10 = vcmp.ge.f32.partialorder %v5058_v12, 0.0 }
 0xc8b   : > { %v6148_v46 = vpop.eup %6147 }
 0xc8c   : > { %vm5061_vm8 = vcmp.ge.f32.partialorder %v5057_v47, 0.0  ;;  %v5065_v27 = vmul.f32 0.05, %v5057_v47  ;;  %v5044_v9 = vmul.f32 %v6148_v46, %v5032_v15  ;;  %v5070_v62 = vsel %vm5062_vm10, %v5058_v12, %v5066_v18 }
 0xc8d   : > { %v6150_v5 = vpop.eup %6149 }
 0xc8e   : > { %v5069_v48 = vsel %vm5061_vm8, %v5057_v47, %v5065_v27  ;;  %v5043_v61 = vmul.f32 %v6150_v5, %v5031_v42  ;;  %v5052_v34 = vmul.f32 %v5048_v22, %v5044_v9 }
 0xc8f   : > { %5764 = vmatprep.mubr.msk.f32.mxu1 %vm4979_vm9, %v5069_v48 }
 0xc90   : > { %5765 = vmatmul.mubr.msk.f32.vlgmr.msra.gmra.mxu1 %vm4979_vm9, %v5070_v62  ;;  %v5051_v39 = vmul.f32 %v5048_v22, %v5043_v61  ;;  %v5060_v37 = vadd.f32 %v5056_v58, %v5052_v34 }
 0xc92   : > { %v5059_v35 = vadd.f32 %v5056_v58, %v5051_v39  ;;  %v5068_v57 = vmul.f32 0.05, %v5060_v37  ;;  %vm5064_vm12 = vcmp.ge.f32.partialorder %v5060_v37, 0.0 }
 0xc94   : > { %vm5063_vm11 = vcmp.ge.f32.partialorder %v5059_v35, 0.0  ;;  %v5067_v38 = vmul.f32 0.05, %v5059_v35  ;;  %v5072_v13 = vsel %vm5064_vm12, %v5060_v37, %v5068_v57  ;;  %v9399_v57 = vld [vmem:[%s9432_s4 + $0x10] sm:$0x3] }
 0xc96   : > { %v5071_v3 = vsel %vm5063_vm11, %v5059_v35, %v5067_v38  ;;  %v9923_v38 = vsub.s32 7, %v9917_v0 }
 0xc97   : > { %5767 = vmatprep.mubr.msk.f32.mxu1 %vm4979_vm9, %v5071_v3 }
 0xc98   : > { %5768 = vmatmul.mubr.msk.f32.gmra.mxu1 %vm4979_vm9, %v5072_v13  ;;  %v5242_v3 = vrot.slane %v9242_v63, %v9923_v38 }
 0xd50   : > { %v5766_v24 = vpop.f32.mrf.mxu1 }
 0xd51   : > { %v9365_v11 = vadd.f32 %v5766_v24, %v5076_v44  ;;  %v5250_v24 = vrot.slane %v9399_v57, %v9915_v28 }
 0xd52   : > { %v5155_v54 = vpop.f32.mrf.mxu1 }
 0xd53   : > { %v9367_v19 = vadd.f32 %v5155_v54, %v5076_v44  ;;  %v5178_v41 = vsel %vm5174_vm1, %v9365_v11, 0.0  ;;  %v5192_v16 = vmul.f32 %v9365_v11, %v9365_v11 }
 0xd54   : > { %5179 = vadd.xlane.f32.xlu1 %v5178_v41 }
 0xd55   : > { %v5175_v6 = vsel %vm5174_vm1, %v9367_v19, 0.0  ;;  %v5191_v45 = vmul.f32 %v9367_v19, %v9367_v19  ;;  %v5198_v29 = vsel %vm5174_vm1, %v5192_v16, 0.0 }
 0xd56   : > { %5176 = vadd.xlane.f32.xlu0 %v5175_v6 }
 0xd57   : > { %v5195_v20 = vsel %vm5174_vm1, %v5191_v45, 0.0 }
 0xd58   : > { %5199 = vadd.xlane.f32.xlu1 %v5198_v29  ;;  %v5769_v2 = vpop.f32.mrf.mxu1 }
 0xd59   : > { %v9378_v33 = vadd.f32 %v5769_v2, %v5076_v44 }
 0xd5a   : > { %5196 = vadd.xlane.f32.xlu0 %v5195_v20  ;;  %v5165_v26 = vpop.f32.mrf.mxu1 }
 0xd5b   : > { %v9381_v4 = vadd.f32 %v5165_v26, %v5076_v44  ;;  %v5184_v50 = vsel %vm5174_vm1, %v9378_v33, 0.0  ;;  %v5194_v21 = vmul.f32 %v9378_v33, %v9378_v33 }
 0xd5c   : > { %5185 = vadd.xlane.f32.xlu1 %v5184_v50 }
 0xd5d   : > { %v5181_v52 = vsel %vm5174_vm1, %v9381_v4, 0.0  ;;  %v5193_v36 = vmul.f32 %v9381_v4, %v9381_v4  ;;  %v5204_v8 = vsel %vm5174_vm1, %v5194_v21, 0.0 }
 0xd5e   : > { %5182 = vadd.xlane.f32.xlu0 %v5181_v52 }
 0xd5f   : > { %v5201_v59 = vsel %vm5174_vm1, %v5193_v36, 0.0 }
 0xd60   : > { %5205 = vadd.xlane.f32.xlu1 %v5204_v8 }
 0xd62   : > { %5202 = vadd.xlane.f32.xlu0 %v5201_v59 }
 0xddd   : > { %v5180_v51 = vpop.xlane.xlu1 %5179 }
 0xdde   : > { %v5188_v60 = vmul.f32 0.125, %v5180_v51 }
 0xddf   : > { %v5177_v25 = vpop.xlane.xlu0 %5176 }
 0xde0   : > { %v5187_v49 = vmul.f32 0.125, %v5177_v25  ;;  %v5212_v40 = vmul.f32 %v5188_v60, %v5188_v60  ;;  %v5224_v13 = vsub.f32 %v9365_v11, %v5188_v60 }
 0xde1   : > { %v5200_v31 = vpop.xlane.xlu1 %5199 }
 0xde2   : > { %v5208_v22 = vmul.f32 0.125, %v5200_v31  ;;  %v5211_v10 = vmul.f32 %v5187_v49, %v5187_v49  ;;  %v5223_v44 = vsub.f32 %v9367_v19, %v5187_v49 }
 0xde3   : > { %v5197_v17 = vpop.xlane.xlu0 %5196 }
 0xde4   : > { %v5216_v32 = vsub.f32 %v5208_v22, %v5212_v40  ;;  %v5207_v58 = vmul.f32 0.125, %v5197_v17 }
 0xde5   : > { %v5186_v43 = vpop.xlane.xlu1 %5185 }
 0xde6   : > { %v5220_v14 = vmax.f32 %v5216_v32, 0.0  ;;  %v5215_v23 = vsub.f32 %v5207_v58, %v5211_v10  ;;  %v5190_v7 = vmul.f32 0.125, %v5186_v43 }
 0xde7   : > { %v5183_v56 = vpop.xlane.xlu0 %5182 }
 0xde8   : > { %v5228_v12 = vadd.f32 1e-05, %v5220_v14  ;;  %v5219_v15 = vmax.f32 %v5215_v23, 0.0  ;;  %v5189_v47 = vmul.f32 0.125, %v5183_v56  ;;  %v5214_v18 = vmul.f32 %v5190_v7, %v5190_v7 }
 0xde9   : > { %v5206_v46 = vpop.xlane.xlu1 %5205  ;;  %v5226_v26 = vsub.f32 %v9378_v33, %v5190_v7 }
 0xdea   : > { %6151 = vrsqrt.f32 %v5228_v12  ;;  %v5227_v42 = vadd.f32 1e-05, %v5219_v15  ;;  %v5210_v27 = vmul.f32 0.125, %v5206_v46  ;;  %v5213_v5 = vmul.f32 %v5189_v47, %v5189_v47 }
 0xdeb   : > { %v5203_v9 = vpop.xlane.xlu0 %5202  ;;  %v5225_v11 = vsub.f32 %v9381_v4, %v5189_v47 }
 0xdec   : > { %6153 = vrsqrt.f32 %v5227_v42  ;;  %v5218_v48 = vsub.f32 %v5210_v27, %v5214_v18  ;;  %v5209_v61 = vmul.f32 0.125, %v5203_v9 }
 0xdee   : > { %v5222_v34 = vmax.f32 %v5218_v48, 0.0  ;;  %v5217_v62 = vsub.f32 %v5209_v61, %v5213_v5 }
 0xdf0   : > { %v5230_v39 = vadd.f32 1e-05, %v5222_v34  ;;  %v5221_v37 = vmax.f32 %v5217_v62, 0.0 }
 0xdf2   : > { %6155 = vrsqrt.f32 %v5230_v39  ;;  %v5229_v35 = vadd.f32 1e-05, %v5221_v37 }
 0xdf4   : > { %6157 = vrsqrt.f32 %v5229_v35 }
 0xdf7   : > { %v6152_v53 = vpop.eup %6151 }
 0xdf8   : > { %v5236_v54 = vmul.f32 %v6152_v53, %v5224_v13 }
 0xdf9   : > { %v6154_v41 = vpop.eup %6153 }
 0xdfa   : > { %v5244_v16 = vmul.f32 %v5242_v3, %v5236_v54  ;;  %v5235_v6 = vmul.f32 %v6154_v41, %v5223_v44 }
 0xdfc   : > { %v5252_v45 = vadd.f32 %v5250_v24, %v5244_v16  ;;  %v5243_v29 = vmul.f32 %v5242_v3, %v5235_v6 }
 0xdfe   : > { %v5260_v2 = vmul.f32 0.05, %v5252_v45  ;;  %v5251_v20 = vadd.f32 %v5250_v24, %v5243_v29  ;;  %vm5256_vm3 = vcmp.ge.f32.partialorder %v5252_v45, 0.0 }
 0xdff   : > { %v6156_v63 = vpop.eup %6155 }
 0xe00   : > { %v5259_v50 = vmul.f32 0.05, %v5251_v20  ;;  %v5238_v21 = vmul.f32 %v6156_v63, %v5226_v26  ;;  %vm5255_vm4 = vcmp.ge.f32.partialorder %v5251_v20, 0.0  ;;  %v5264_v19 = vsel %vm5256_vm3, %v5252_v45, %v5260_v2 }
 0xe01   : > { %v6158_v52 = vpop.eup %6157  ;;  %v5274_v28 = vsel %vm5174_vm1, %v5264_v19, 0.0  ;;  %v6178_v2 = vmov 1966171168  }
 0xe02   : > { %v5246_v36 = vmul.f32 %v5242_v3, %v5238_v21  ;;  %v5237_v8 = vmul.f32 %v6158_v52, %v5225_v11  ;;  %v5263_v59 = vsel %vm5255_vm4, %v5251_v20, %v5259_v50  ;;  %v5275_v1 = vrot.slane %v5274_v28, 4 }
 0xe03   : > { %v5267_v30 = vsel %vm5174_vm1, %v5263_v59, 0.0  ;;  %v5390_v20 = vunpack.c.l.s4 %v6178_v2 }
 0xe04   : > { %v5254_v51 = vadd.f32 %v5250_v24, %v5246_v36  ;;  %v5245_v60 = vmul.f32 %v5242_v3, %v5237_v8  ;;  %v5268_v33 = vrot.slane %v5267_v30, 4  ;;  %v5276_v25 = vadd.f32 %v5275_v1, %v5274_v28 }
 0xe05   : > { %v5391_v26 = vunpack.c.0.s8 %v5390_v20 }
 0xe06   : > { %v5253_v49 = vadd.f32 %v5250_v24, %v5245_v60  ;;  %vm5258_vm0 = vcmp.ge.f32.partialorder %v5254_v51, 0.0  ;;  %v5262_v4 = vmul.f32 0.05, %v5254_v51  ;;  %v5269_v31 = vadd.f32 %v5268_v33, %v5267_v30 }
 0xe07   : > { %v5277_v40 = vrot.slane %v5276_v25, 2  ;;  %v5302_v24 = vrot.slane %v9399_v57, %v9916_v55  ;;  %v5394_v63 = vsub.s32 %v5391_v26, %v9917_v0 }
 0xe08   : > { %v5261_v22 = vmul.f32 0.05, %v5253_v49  ;;  %vm5257_vm5 = vcmp.ge.f32.partialorder %v5253_v49, 0.0  ;;  %v5266_v17 = vsel %vm5258_vm0, %v5254_v51, %v5262_v4  ;;  %v5270_v10 = vrot.slane %v5269_v31, 2 }
 0xe09   : > { %v5288_v32 = vsel %vm5174_vm1, %v5266_v17, 0.0  ;;  %v5278_v23 = vadd.f32 %v5277_v40, %v5276_v25 }
 0xe0a   : > { %v5265_v58 = vsel %vm5257_vm5, %v5253_v49, %v5261_v22  ;;  %v5271_v43 = vadd.f32 %v5270_v10, %v5269_v31  ;;  %v5289_v14 = vrot.slane %v5288_v32, 4 }
 0xe0b   : > { %v5281_v7 = vsel %vm5174_vm1, %v5265_v58, 0.0  ;;  %v5279_v42 = vrot.slane %v5278_v23, 1 }
 0xe0c   : > { %v5282_v56 = vrot.slane %v5281_v7, 4  ;;  %v5290_v12 = vadd.f32 %v5289_v14, %v5288_v32  ;;  %v5272_v15 = vrot.slane %v5271_v43, 1 }
 0xe0d   : > { %v5280_v61 = vadd.f32 %v5279_v42, %v5278_v23 }
 0xe0e   : > { %v5283_v47 = vadd.f32 %v5282_v56, %v5281_v7  ;;  %v5291_v46 = vrot.slane %v5290_v12, 2  ;;  %v5273_v9 = vadd.f32 %v5272_v15, %v5271_v43 }
 0xe0f   : > { %v5296_v35 = vmul.f32 0.125, %v5280_v61 }
 0xe10   : > { %v5284_v18 = vrot.slane %v5283_v47, 2  ;;  %v5292_v27 = vadd.f32 %v5291_v46, %v5290_v12  ;;  %v5295_v39 = vmul.f32 0.125, %v5273_v9 }
 0xe12   : > { %v5285_v5 = vadd.f32 %v5284_v18, %v5283_v47  ;;  %v5293_v48 = vrot.slane %v5292_v27, 1  ;;  %v5307_v13 = vsel %vm4681_vm13, %v5296_v35, %v5295_v39  ;;  %vm5417_vm13 = vcmask 0  }
 0xe14   : > { %v5286_v34 = vrot.slane %v5285_v5, 1  ;;  %v5294_v62 = vadd.f32 %v5293_v48, %v5292_v27 }
 0xe16   : > { %v5287_v37 = vadd.f32 %v5286_v34, %v5285_v5  ;;  %v5298_v3 = vmul.f32 0.125, %v5294_v62 }
 0xe18   : > { %v5297_v38 = vmul.f32 0.125, %v5287_v37 }
 0xe1a   : > { %v5308_v53 = vsel %vm4683_vm14, %v5297_v38, %v5307_v13 }
 0xe1b   : > { %v5309_v44 = vsel %vm4685_vm15, %v5298_v3, %v5308_v53 }
 0xe1c   : > { %5773 = vmatmul.mubr.msk.f32.vlgmr.msra.gmra.mxu0 %vm5174_vm1, %v5309_v44 }
 0xedc   : > { %v5378_v54 = vpop.f32.mrf.mxu0 }
 0xedd   : > { %v5379_v41 = vadd.f32 %v5378_v54, %v5302_v24 }
 0xede   : > { %v5774_v16 = vpop.f32.mrf.mxu0 }
 0xedf   : > { %v5582_v6 = vmul.f32 -1.442695, %v5379_v41 }
 0xee1   : > { %6159 = vpow2.f32 %v5582_v6 }
 0xeee   : > { %v6160_v45 = vpop.eup %6159 }
 0xeef   : > { %v5385_v29 = vadd.f32 1.0, %v6160_v45 }
 0xef1   : > { %6161 = vrcp.f32 %v5385_v29 }
 0xefe   : > { %v6162_v11 = vpop.eup %6161 }
 0xeff   : > { %v5395_v50 = vrot.slane %v6162_v11, %v5394_v63 }
 0xf01   : > { %v5396_v55 = vcombine.high %v5395_v50, %v5395_v50  ;;  %v5403_v57 = vrot.slane %v5395_v50, %v5394_v63 }
 0xf03   : > { %v5410_v21 = vrot.slane %v5396_v55, %v5394_v63  ;;  %v5411_v19 = vcombine.high %v5403_v57, %v5403_v57  ;;  %5418 = vst.msk [vmem:[%s254_s17] sm:$0x1] %vm5417_vm13, %v5403_v57 }
 0xf05   : > { %v5412_v52 = vcombine.high %v5410_v21, %v5410_v21  ;;  %5419 = vst.msk [vmem:[%s254_s17 + $0x1] sm:$0x1] %vm5417_vm13, %v5410_v21  ;;  %5420 = vst.msk [vmem:[%s254_s17 + $0x2] sm:$0x1] %vm5417_vm13, %v5411_v19 }
 0xf07   : > { %5421 = vst.msk [vmem:[%s254_s17 + $0x3] sm:$0x1] %vm5417_vm13, %v5412_v52 }
 0xf08 PF: > { %s16_s21 = sadd.s32 1, %s6171_s21  }
 0xf09   : > { %p13_p4 = scmp.ge.s32.totalorder %s16_s21, 4  }
 0xf0b   :  { %15 = sbr.rel (!%p13_p4) target bundleno = 1 (0x1), region = 74 }

</bundles_post_ra>
